<compile_context>
chip_gen: v6e
topology: v6e:2x2x1
jax: 0.10.0
libtpu: 0.0.40
codegen_flags: <defaults>
</compile_context>

<pallas_src>
import functools

import jax
import jax.numpy as jnp
import numpy as np
from jax.experimental import pallas as pl
from jax.experimental.pallas import tpu as pltpu

# ----------------------------- module constants -----------------------------
GAUSSIAN_SIGMAS = (0.5, 1.0, 2.0, 4.0, 8.0)   # 5 scales
CHANNEL = 3
DATA_RANGE = 255.0
K1, K2 = 0.01, 0.03
C1 = (K1 * DATA_RANGE) ** 2
C2 = (K2 * DATA_RANGE) ** 2
ALPHA = 0.025
COMPENSATION = 200.0
FILTER_SIZE = int(4 * GAUSSIAN_SIGMAS[-1] + 1)   # 33
PAD = int(2 * GAUSSIAN_SIGMAS[-1])               # 16
NUM_SIGMAS = len(GAUSSIAN_SIGMAS)
NUM_OUT = CHANNEL * NUM_SIGMAS                   # 15 grouped-conv output channels
NUM_MOMENTS = 5                                  # x, y, x*x, y*y, x*y

# PyTorch grouped-conv mapping (groups=3, 15 out channels, g_masks[3*idx+c]=gauss(sigma_idx)):
#   output channel j uses input channel j // 5 and the Gaussian with sigma index j // 3.
PAIRS = tuple((j // NUM_SIGMAS, j // CHANNEL) for j in range(NUM_OUT))  # (ic, si)
PAIR_MULT = {}
for _p in PAIRS:
    PAIR_MULT[_p] = PAIR_MULT.get(_p, 0) + 1
SIGMA_CHANNELS = {si: tuple(sorted({ic for (ic, s) in PAIRS if s == si}))
                  for si in range(NUM_SIGMAS)}
# lM = l[:, -1] * l[:, -2] * l[:, -3]  (reference quirk: all three are (ic=2, si=4))
LM_PAIRS = (PAIRS[-1], PAIRS[-2], PAIRS[-3])
LM_SET = frozenset(LM_PAIRS)


# ---------------------- deterministic parameter setup -----------------------
def _fspecial_gauss_1d(size, sigma):
    coords = np.arange(size, dtype=np.float32) - size // 2
    g = np.exp(-(coords ** 2) / (2.0 * sigma ** 2))
    return (g / g.sum()).astype(np.float32)


def _band_matrix(g1d, n, pad):
    """G[i, j] = g1d[j - i + pad] (zero outside the band).  G @ X == 'same'
    cross-correlation of X with g1d along axis 0, with zero padding `pad`."""
    size = g1d.shape[0]
    i = np.arange(n)[:, None]
    j = np.arange(n)[None, :]
    k = j - i + pad
    valid = (k >= 0) & (k < size)
    kc = np.clip(k, 0, size - 1)
    return np.where(valid, g1d[kc], 0.0).astype(np.float32)


def build_band_matrices(h, w):
    gh = np.stack([_band_matrix(_fspecial_gauss_1d(FILTER_SIZE, s), h, PAD)
                   for s in GAUSSIAN_SIGMAS], axis=0)            # (5, H, H)
    gwt = np.stack([_band_matrix(_fspecial_gauss_1d(FILTER_SIZE, s), w, PAD).T
                    for s in GAUSSIAN_SIGMAS], axis=0)           # (5, W, W)
    return jnp.asarray(gh), jnp.asarray(gwt)


# --------------------------------- kernel -----------------------------------
def _ms_ssim_l1_kernel(x_ref, y_ref, gh_ref, gwt_ref, out_ref,
                       *, c1, c2, coef_ssim, coef_l1):
    # x_ref / y_ref : (Bt, C, H, W) VMEM tile for the current batch block
    # gh_ref        : (NUM_SIGMAS, H, H) banded row-conv matrices   (constant)
    # gwt_ref       : (NUM_SIGMAS, W, W) banded col-conv matrices   (constant)
    # out_ref       : (1, 1, 1) partial sum of the mixed loss over this block
    bt, nc, h, w = x_ref.shape
    last = NUM_SIGMAS - 1

    # ---- memoized per-(image, channel) moment planes -----------------------
    mom_cache = {}

    def moments(b, ic):
        key = (b, ic)
        if key not in mom_cache:
            xi = x_ref[b, ic]                    # (H, W) loads straight from VMEM
            yi = y_ref[b, ic]
            mom_cache[key] = (xi, yi, xi * xi, yi * yi, xi * yi)
        return mom_cache[key]

    def absdiff(b):
        s = None
        for ic in range(nc):
            xi, yi = moments(b, ic)[:2]
            d = jnp.abs(xi - yi)
            s = d if s is None else s + d
        return s

    pics = [None] * bt                 # running product of cs^multiplicity
    lmaps = [dict() for _ in range(bt)]  # l maps needed for lM (only (2, 4))
    l1conv = [None] * bt               # conv(sum_c |x_c - y_c|, sigma=8)

    for si in range(NUM_SIGMAS):
        chans = SIGMA_CHANNELS[si]
        gh_si = gh_ref[si]             # (H, H)  only this sigma's plane is loaded
        gwt_si = gwt_ref[si]           # (W, W)

        # Stack every plane that needs this sigma along the lane axis.
        tags, planes = [], []
        for b in range(bt):
            for ic in chans:
                xi, yi, xx, yy, xy = moments(b, ic)
                tags += [("mux", b, ic), ("muy", b, ic),
                         ("ex2", b, ic), ("ey2", b, ic), ("exy", b, ic)]
                planes += [xi, yi, xx, yy, xy]
            if si == last:
                tags.append(("l1", b, -1))
                planes.append(absdiff(b))
        n = len(planes)

        # Row conv for all planes at once: one wide MXU matmul.
        stacked = jnp.concatenate(planes, axis=1)                    # (H, n*W)
        rowc = jnp.dot(gh_si, stacked,
                       preferred_element_type=jnp.float32)           # (H, n*W)
        # Restack along sublanes, then one wide matmul for the column conv.
        restack = jnp.concatenate(
            [rowc[:, j * w:(j + 1) * w] for j in range(n)], axis=0)   # (n*H, W)
        conv = jnp.dot(restack, gwt_si,
                       preferred_element_type=jnp.float32)            # (n*H, W)
        outp = {tag: conv[j * h:(j + 1) * h, :] for j, tag in enumerate(tags)}

        # SSIM terms for every (image, channel) pair that uses this sigma.
        for b in range(bt):
            for ic in chans:
                mux = outp[("mux", b, ic)]
                muy = outp[("muy", b, ic)]
                mux2 = mux * mux
                muy2 = muy * muy
                muxy = mux * muy
                sigx2 = outp[("ex2", b, ic)] - mux2
                sigy2 = outp[("ey2", b, ic)] - muy2
                sigxy = outp[("exy", b, ic)] - muxy
                cs = (2.0 * sigxy + c2) / (sigx2 + sigy2 + c2)
                term = cs
                for _ in range(PAIR_MULT[(ic, si)] - 1):   # cs^multiplicity
                    term = term * cs
                pics[b] = term if pics[b] is None else pics[b] * term
                if (ic, si) in LM_SET:
                    lmaps[b][(ic, si)] = (2.0 * muxy + c1) / (mux2 + muy2 + c1)
            if si == last:
                l1conv[b] = outp[("l1", b, -1)]

    # ---- combine and reduce to a single partial sum for this batch block ----
    acc = None
    for b in range(bt):
        lM = None
        for p in LM_PAIRS:
            lM = lmaps[b][p] if lM is None else lM * lmaps[b][p]
        loss_b = coef_ssim * (1.0 - lM * pics[b]) + coef_l1 * l1conv[b]
        acc = loss_b if acc is None else acc + loss_b
    part = jnp.sum(acc, axis=1, keepdims=True)   # (H, 1)
    part = jnp.sum(part, axis=0, keepdims=True)  # (1, 1)
    out_ref[0] = part


# -------------------------------- wrapper ------------------------------------
def _pick_batch_block(batch, w):
    """Largest divisor of `batch` (<=8) keeping the widest per-sigma plane
    stack at <= ~4 lane tiles (512 lanes)."""
    widest = 2 * NUM_MOMENTS   # sigma groups 1.0 / 4.0 touch two channels
    best = 1
    for cand in range(1, min(batch, 8) + 1):
        if batch % cand == 0 and cand * widest * w <= 512:
            best = cand
    return best


def ms_ssim_l1_loss(x, y, *, batch_block=None):
    assert x.shape == y.shape
    b, c, h, w = x.shape
    assert c == CHANNEL
    x = x.astype(jnp.float32)
    y = y.astype(jnp.float32)
    gh, gwt = build_band_matrices(h, w)

    bt = batch_block if batch_block is not None else _pick_batch_block(b, w)
    assert b % bt == 0
    steps = b // bt

    # Fold constant scalar factors on the host.
    coef_ssim = float(COMPENSATION * ALPHA)
    coef_l1 = float(COMPENSATION * (1.0 - ALPHA) / (DATA_RANGE * CHANNEL))

    kernel = functools.partial(
        _ms_ssim_l1_kernel,
        c1=float(C1), c2=float(C2), coef_ssim=coef_ssim, coef_l1=coef_l1)

    # Explicit VMEM budget: double-buffered x/y blocks + band matrices + headroom.
    block_bytes = 4 * (2 * 2 * bt * c * h * w + 2 * NUM_SIGMAS * (h * h + w * w))
    vmem_limit = int(min(100 * (1 << 20), max(32 * (1 << 20), 8 * block_bytes)))

    partial_sums = pl.pallas_call(
        kernel,
        out_shape=jax.ShapeDtypeStruct((steps, 1, 1), jnp.float32),
        grid=(steps,),
        in_specs=[
            pl.BlockSpec((bt, c, h, w), lambda i: (i, 0, 0, 0)),
            pl.BlockSpec((bt, c, h, w), lambda i: (i, 0, 0, 0)),
            pl.BlockSpec((NUM_SIGMAS, h, h), lambda i: (0, 0, 0)),
            pl.BlockSpec((NUM_SIGMAS, w, w), lambda i: (0, 0, 0)),
        ],
        out_specs=pl.BlockSpec((1, 1, 1), lambda i: (i, 0, 0)),
        compiler_params=pltpu.CompilerParams(
            dimension_semantics=("parallel",),
            vmem_limit_bytes=vmem_limit),
    )(x, y, gh, gwt)

    # Finish the mean over (B, H, W) — same scalar as torch loss_mix.mean().
    return jnp.sum(partial_sums) / float(b * h * w)


# --------------------------------- main --------------------------------------
if __name__ == "__main__":
    key = jax.random.PRNGKey(0)
    kx, ky = jax.random.split(key)
    B, C, H, W = 2, 3, 16, 16
    x = jax.random.uniform(kx, (B, C, H, W), dtype=jnp.float32) * DATA_RANGE
    y = jax.random.uniform(ky, (B, C, H, W), dtype=jnp.float32) * DATA_RANGE

    loss = ms_ssim_l1_loss(x, y)
    jax.block_until_ready(loss)
    assert jnp.isfinite(loss)
    print("KERNEL_OK")
</pallas_src>

<mosaic_0001>
module attributes {stable_mosaic.version = 11 : i64} {
  func.func @_ms_ssim_l1_kernel(%arg0: i32, %arg1: memref<2x3x16x16xf32, #tpu.memory_space<vmem>>, %arg2: memref<2x3x16x16xf32, #tpu.memory_space<vmem>>, %arg3: memref<5x16x16xf32, #tpu.memory_space<vmem>>, %arg4: memref<5x16x16xf32, #tpu.memory_space<vmem>>, %arg5: memref<1x1x1xf32, #tpu.memory_space<vmem>>) attributes {dimension_semantics = [#tpu.dimension_semantics<parallel>], iteration_bounds = array<i64: 1>, scalar_prefetch = 0 : i64, scratch_operands = 0 : i64, tpu.core_type = #tpu.core_type<tc>, window_params = [{transform_indices = @transform_0, window_bounds = array<i64: 2, 3, 16, 16>}, {transform_indices = @transform_1, window_bounds = array<i64: 2, 3, 16, 16>}, {pipeline_mode = #tpu.pipeline_mode<synchronous>, transform_indices = @transform_2, window_bounds = array<i64: 5, 16, 16>}, {pipeline_mode = #tpu.pipeline_mode<synchronous>, transform_indices = @transform_3, window_bounds = array<i64: 5, 16, 16>}, {transform_indices = @transform_4, window_bounds = array<i64: 1, 1, 1>}]} {
    %c0 = arith.constant 0 : index
    %c0_0 = arith.constant 0 : index
    %c0_1 = arith.constant 0 : index
    %0 = vector.load %arg3[%c0, %c0_0, %c0_1] : memref<5x16x16xf32, #tpu.memory_space<vmem>>, vector<1x16x16xf32>
    %1 = vector.shape_cast %0 : vector<1x16x16xf32> to vector<16x16xf32>
    %c0_2 = arith.constant 0 : index
    %c0_3 = arith.constant 0 : index
    %c0_4 = arith.constant 0 : index
    %2 = vector.load %arg4[%c0_2, %c0_3, %c0_4] : memref<5x16x16xf32, #tpu.memory_space<vmem>>, vector<1x16x16xf32>
    %3 = vector.shape_cast %2 : vector<1x16x16xf32> to vector<16x16xf32>
    %c0_5 = arith.constant 0 : index
    %c0_6 = arith.constant 0 : index
    %c0_7 = arith.constant 0 : index
    %c0_8 = arith.constant 0 : index
    %4 = vector.load %arg1[%c0_5, %c0_6, %c0_7, %c0_8] : memref<2x3x16x16xf32, #tpu.memory_space<vmem>>, vector<1x1x16x16xf32>
    %5 = vector.shape_cast %4 : vector<1x1x16x16xf32> to vector<16x16xf32>
    %c0_9 = arith.constant 0 : index
    %c0_10 = arith.constant 0 : index
    %c0_11 = arith.constant 0 : index
    %c0_12 = arith.constant 0 : index
    %6 = vector.load %arg2[%c0_9, %c0_10, %c0_11, %c0_12] : memref<2x3x16x16xf32, #tpu.memory_space<vmem>>, vector<1x1x16x16xf32>
    %7 = vector.shape_cast %6 : vector<1x1x16x16xf32> to vector<16x16xf32>
    %8 = arith.mulf %5, %5 : vector<16x16xf32>
    %9 = arith.mulf %7, %7 : vector<16x16xf32>
    %10 = arith.mulf %5, %7 : vector<16x16xf32>
    %c1 = arith.constant 1 : index
    %c0_13 = arith.constant 0 : index
    %c0_14 = arith.constant 0 : index
    %c0_15 = arith.constant 0 : index
    %11 = vector.load %arg1[%c1, %c0_13, %c0_14, %c0_15] : memref<2x3x16x16xf32, #tpu.memory_space<vmem>>, vector<1x1x16x16xf32>
    %12 = vector.shape_cast %11 : vector<1x1x16x16xf32> to vector<16x16xf32>
    %c1_16 = arith.constant 1 : index
    %c0_17 = arith.constant 0 : index
    %c0_18 = arith.constant 0 : index
    %c0_19 = arith.constant 0 : index
    %13 = vector.load %arg2[%c1_16, %c0_17, %c0_18, %c0_19] : memref<2x3x16x16xf32, #tpu.memory_space<vmem>>, vector<1x1x16x16xf32>
    %14 = vector.shape_cast %13 : vector<1x1x16x16xf32> to vector<16x16xf32>
    %15 = arith.mulf %12, %12 : vector<16x16xf32>
    %16 = arith.mulf %14, %14 : vector<16x16xf32>
    %17 = arith.mulf %12, %14 : vector<16x16xf32>
    %18 = tpu.concatenate %5, %7, %8, %9, %10, %12, %14, %15, %16, %17 in 1 : vector<16x16xf32>, vector<16x16xf32>, vector<16x16xf32>, vector<16x16xf32>, vector<16x16xf32>, vector<16x16xf32>, vector<16x16xf32>, vector<16x16xf32>, vector<16x16xf32>, vector<16x16xf32> -> vector<16x160xf32>
    %cst = arith.constant dense<0.000000e+00> : vector<16x160xf32>
    %19 = tpu.matmul %1, %18, %cst {dimension_numbers = #tpu.dot_dimension_numbers<[1], [0], [0], [1], [0, 0, 1, 1], [], []>} : vector<16x16xf32>, vector<16x160xf32>, vector<16x160xf32> -> vector<16x160xf32>
    %20 = vector.extract_strided_slice %19 {offsets = [0, 0], sizes = [16, 16], strides = [1, 1]} : vector<16x160xf32> to vector<16x16xf32>
    %21 = vector.extract_strided_slice %19 {offsets = [0, 16], sizes = [16, 16], strides = [1, 1]} : vector<16x160xf32> to vector<16x16xf32>
    %22 = vector.extract_strided_slice %19 {offsets = [0, 32], sizes = [16, 16], strides = [1, 1]} : vector<16x160xf32> to vector<16x16xf32>
    %23 = vector.extract_strided_slice %19 {offsets = [0, 48], sizes = [16, 16], strides = [1, 1]} : vector<16x160xf32> to vector<16x16xf32>
    %24 = vector.extract_strided_slice %19 {offsets = [0, 64], sizes = [16, 16], strides = [1, 1]} : vector<16x160xf32> to vector<16x16xf32>
    %25 = vector.extract_strided_slice %19 {offsets = [0, 80], sizes = [16, 16], strides = [1, 1]} : vector<16x160xf32> to vector<16x16xf32>
    %26 = vector.extract_strided_slice %19 {offsets = [0, 96], sizes = [16, 16], strides = [1, 1]} : vector<16x160xf32> to vector<16x16xf32>
    %27 = vector.extract_strided_slice %19 {offsets = [0, 112], sizes = [16, 16], strides = [1, 1]} : vector<16x160xf32> to vector<16x16xf32>
    %28 = vector.extract_strided_slice %19 {offsets = [0, 128], sizes = [16, 16], strides = [1, 1]} : vector<16x160xf32> to vector<16x16xf32>
    %29 = vector.extract_strided_slice %19 {offsets = [0, 144], sizes = [16, 16], strides = [1, 1]} : vector<16x160xf32> to vector<16x16xf32>
    %30 = tpu.concatenate %20, %21, %22, %23, %24, %25, %26, %27, %28, %29 in 0 : vector<16x16xf32>, vector<16x16xf32>, vector<16x16xf32>, vector<16x16xf32>, vector<16x16xf32>, vector<16x16xf32>, vector<16x16xf32>, vector<16x16xf32>, vector<16x16xf32>, vector<16x16xf32> -> vector<160x16xf32>
    %cst_20 = arith.constant dense<0.000000e+00> : vector<160x16xf32>
    %31 = tpu.matmul %30, %3, %cst_20 {dimension_numbers = #tpu.dot_dimension_numbers<[1], [0], [0], [1], [0, 0, 1, 1], [], []>} : vector<160x16xf32>, vector<16x16xf32>, vector<160x16xf32> -> vector<160x16xf32>
    %32 = vector.extract_strided_slice %31 {offsets = [0, 0], sizes = [16, 16], strides = [1, 1]} : vector<160x16xf32> to vector<16x16xf32>
    %33 = vector.extract_strided_slice %31 {offsets = [16, 0], sizes = [16, 16], strides = [1, 1]} : vector<160x16xf32> to vector<16x16xf32>
    %34 = vector.extract_strided_slice %31 {offsets = [32, 0], sizes = [16, 16], strides = [1, 1]} : vector<160x16xf32> to vector<16x16xf32>
    %35 = vector.extract_strided_slice %31 {offsets = [48, 0], sizes = [16, 16], strides = [1, 1]} : vector<160x16xf32> to vector<16x16xf32>
    %36 = vector.extract_strided_slice %31 {offsets = [64, 0], sizes = [16, 16], strides = [1, 1]} : vector<160x16xf32> to vector<16x16xf32>
    %37 = vector.extract_strided_slice %31 {offsets = [80, 0], sizes = [16, 16], strides = [1, 1]} : vector<160x16xf32> to vector<16x16xf32>
    %38 = vector.extract_strided_slice %31 {offsets = [96, 0], sizes = [16, 16], strides = [1, 1]} : vector<160x16xf32> to vector<16x16xf32>
    %39 = vector.extract_strided_slice %31 {offsets = [112, 0], sizes = [16, 16], strides = [1, 1]} : vector<160x16xf32> to vector<16x16xf32>
    %40 = vector.extract_strided_slice %31 {offsets = [128, 0], sizes = [16, 16], strides = [1, 1]} : vector<160x16xf32> to vector<16x16xf32>
    %41 = vector.extract_strided_slice %31 {offsets = [144, 0], sizes = [16, 16], strides = [1, 1]} : vector<160x16xf32> to vector<16x16xf32>
    %42 = arith.mulf %32, %32 : vector<16x16xf32>
    %43 = arith.mulf %33, %33 : vector<16x16xf32>
    %44 = arith.mulf %32, %33 : vector<16x16xf32>
    %45 = arith.subf %34, %42 : vector<16x16xf32>
    %46 = arith.subf %35, %43 : vector<16x16xf32>
    %47 = arith.subf %36, %44 : vector<16x16xf32>
    %cst_21 = arith.constant 2.000000e+00 : f32
    %48 = vector.broadcast %cst_21 : f32 to vector<16x16xf32>
    %49 = arith.mulf %48, %47 : vector<16x16xf32>
    %cst_22 = arith.constant 5.852250e+01 : f32
    %50 = vector.broadcast %cst_22 : f32 to vector<16x16xf32>
    %51 = arith.addf %49, %50 : vector<16x16xf32>
    %52 = arith.addf %45, %46 : vector<16x16xf32>
    %cst_23 = arith.constant 5.852250e+01 : f32
    %53 = vector.broadcast %cst_23 : f32 to vector<16x16xf32>
    %54 = arith.addf %52, %53 : vector<16x16xf32>
    %55 = arith.divf %51, %54 : vector<16x16xf32>
    %56 = arith.mulf %55, %55 : vector<16x16xf32>
    %57 = arith.mulf %56, %55 : vector<16x16xf32>
    %58 = arith.mulf %37, %37 : vector<16x16xf32>
    %59 = arith.mulf %38, %38 : vector<16x16xf32>
    %60 = arith.mulf %37, %38 : vector<16x16xf32>
    %61 = arith.subf %39, %58 : vector<16x16xf32>
    %62 = arith.subf %40, %59 : vector<16x16xf32>
    %63 = arith.subf %41, %60 : vector<16x16xf32>
    %cst_24 = arith.constant 2.000000e+00 : f32
    %64 = vector.broadcast %cst_24 : f32 to vector<16x16xf32>
    %65 = arith.mulf %64, %63 : vector<16x16xf32>
    %cst_25 = arith.constant 5.852250e+01 : f32
    %66 = vector.broadcast %cst_25 : f32 to vector<16x16xf32>
    %67 = arith.addf %65, %66 : vector<16x16xf32>
    %68 = arith.addf %61, %62 : vector<16x16xf32>
    %cst_26 = arith.constant 5.852250e+01 : f32
    %69 = vector.broadcast %cst_26 : f32 to vector<16x16xf32>
    %70 = arith.addf %68, %69 : vector<16x16xf32>
    %71 = arith.divf %67, %70 : vector<16x16xf32>
    %72 = arith.mulf %71, %71 : vector<16x16xf32>
    %73 = arith.mulf %72, %71 : vector<16x16xf32>
    %c1_27 = arith.constant 1 : index
    %c0_28 = arith.constant 0 : index
    %c0_29 = arith.constant 0 : index
    %74 = vector.load %arg3[%c1_27, %c0_28, %c0_29] : memref<5x16x16xf32, #tpu.memory_space<vmem>>, vector<1x16x16xf32>
    %75 = vector.shape_cast %74 : vector<1x16x16xf32> to vector<16x16xf32>
    %c1_30 = arith.constant 1 : index
    %c0_31 = arith.constant 0 : index
    %c0_32 = arith.constant 0 : index
    %76 = vector.load %arg4[%c1_30, %c0_31, %c0_32] : memref<5x16x16xf32, #tpu.memory_space<vmem>>, vector<1x16x16xf32>
    %77 = vector.shape_cast %76 : vector<1x16x16xf32> to vector<16x16xf32>
    %c0_33 = arith.constant 0 : index
    %c1_34 = arith.constant 1 : index
    %c0_35 = arith.constant 0 : index
    %c0_36 = arith.constant 0 : index
    %78 = vector.load %arg1[%c0_33, %c1_34, %c0_35, %c0_36] : memref<2x3x16x16xf32, #tpu.memory_space<vmem>>, vector<1x1x16x16xf32>
    %79 = vector.shape_cast %78 : vector<1x1x16x16xf32> to vector<16x16xf32>
    %c0_37 = arith.constant 0 : index
    %c1_38 = arith.constant 1 : index
    %c0_39 = arith.constant 0 : index
    %c0_40 = arith.constant 0 : index
    %80 = vector.load %arg2[%c0_37, %c1_38, %c0_39, %c0_40] : memref<2x3x16x16xf32, #tpu.memory_space<vmem>>, vector<1x1x16x16xf32>
    %81 = vector.shape_cast %80 : vector<1x1x16x16xf32> to vector<16x16xf32>
    %82 = arith.mulf %79, %79 : vector<16x16xf32>
    %83 = arith.mulf %81, %81 : vector<16x16xf32>
    %84 = arith.mulf %79, %81 : vector<16x16xf32>
    %c1_41 = arith.constant 1 : index
    %c1_42 = arith.constant 1 : index
    %c0_43 = arith.constant 0 : index
    %c0_44 = arith.constant 0 : index
    %85 = vector.load %arg1[%c1_41, %c1_42, %c0_43, %c0_44] : memref<2x3x16x16xf32, #tpu.memory_space<vmem>>, vector<1x1x16x16xf32>
    %86 = vector.shape_cast %85 : vector<1x1x16x16xf32> to vector<16x16xf32>
    %c1_45 = arith.constant 1 : index
    %c1_46 = arith.constant 1 : index
    %c0_47 = arith.constant 0 : index
    %c0_48 = arith.constant 0 : index
    %87 = vector.load %arg2[%c1_45, %c1_46, %c0_47, %c0_48] : memref<2x3x16x16xf32, #tpu.memory_space<vmem>>, vector<1x1x16x16xf32>
    %88 = vector.shape_cast %87 : vector<1x1x16x16xf32> to vector<16x16xf32>
    %89 = arith.mulf %86, %86 : vector<16x16xf32>
    %90 = arith.mulf %88, %88 : vector<16x16xf32>
    %91 = arith.mulf %86, %88 : vector<16x16xf32>
    %92 = tpu.concatenate %5, %7, %8, %9, %10, %79, %81, %82, %83, %84, %12, %14, %15, %16, %17, %86 in 1 : vector<16x16xf32>, vector<16x16xf32>, vector<16x16xf32>, vector<16x16xf32>, vector<16x16xf32>, vector<16x16xf32>, vector<16x16xf32>, vector<16x16xf32>, vector<16x16xf32>, vector<16x16xf32>, vector<16x16xf32>, vector<16x16xf32>, vector<16x16xf32>, vector<16x16xf32>, vector<16x16xf32>, vector<16x16xf32> -> vector<16x256xf32>
    %93 = tpu.concatenate %88, %89, %90, %91 in 1 : vector<16x16xf32>, vector<16x16xf32>, vector<16x16xf32>, vector<16x16xf32> -> vector<16x64xf32>
    %94 = tpu.concatenate %92, %93 in 1 : vector<16x256xf32>, vector<16x64xf32> -> vector<16x320xf32>
    %cst_49 = arith.constant dense<0.000000e+00> : vector<16x320xf32>
    %95 = tpu.matmul %75, %94, %cst_49 {dimension_numbers = #tpu.dot_dimension_numbers<[1], [0], [0], [1], [0, 0, 1, 1], [], []>} : vector<16x16xf32>, vector<16x320xf32>, vector<16x320xf32> -> vector<16x320xf32>
    %96 = vector.extract_strided_slice %95 {offsets = [0, 0], sizes = [16, 16], strides = [1, 1]} : vector<16x320xf32> to vector<16x16xf32>
    %97 = vector.extract_strided_slice %95 {offsets = [0, 16], sizes = [16, 16], strides = [1, 1]} : vector<16x320xf32> to vector<16x16xf32>
    %98 = vector.extract_strided_slice %95 {offsets = [0, 32], sizes = [16, 16], strides = [1, 1]} : vector<16x320xf32> to vector<16x16xf32>
    %99 = vector.extract_strided_slice %95 {offsets = [0, 48], sizes = [16, 16], strides = [1, 1]} : vector<16x320xf32> to vector<16x16xf32>
    %100 = vector.extract_strided_slice %95 {offsets = [0, 64], sizes = [16, 16], strides = [1, 1]} : vector<16x320xf32> to vector<16x16xf32>
    %101 = vector.extract_strided_slice %95 {offsets = [0, 80], sizes = [16, 16], strides = [1, 1]} : vector<16x320xf32> to vector<16x16xf32>
    %102 = vector.extract_strided_slice %95 {offsets = [0, 96], sizes = [16, 16], strides = [1, 1]} : vector<16x320xf32> to vector<16x16xf32>
    %103 = vector.extract_strided_slice %95 {offsets = [0, 112], sizes = [16, 16], strides = [1, 1]} : vector<16x320xf32> to vector<16x16xf32>
    %104 = vector.extract_strided_slice %95 {offsets = [0, 128], sizes = [16, 16], strides = [1, 1]} : vector<16x320xf32> to vector<16x16xf32>
    %105 = vector.extract_strided_slice %95 {offsets = [0, 144], sizes = [16, 16], strides = [1, 1]} : vector<16x320xf32> to vector<16x16xf32>
    %106 = vector.extract_strided_slice %95 {offsets = [0, 160], sizes = [16, 16], strides = [1, 1]} : vector<16x320xf32> to vector<16x16xf32>
    %107 = vector.extract_strided_slice %95 {offsets = [0, 176], sizes = [16, 16], strides = [1, 1]} : vector<16x320xf32> to vector<16x16xf32>
    %108 = vector.extract_strided_slice %95 {offsets = [0, 192], sizes = [16, 16], strides = [1, 1]} : vector<16x320xf32> to vector<16x16xf32>
    %109 = vector.extract_strided_slice %95 {offsets = [0, 208], sizes = [16, 16], strides = [1, 1]} : vector<16x320xf32> to vector<16x16xf32>
    %110 = vector.extract_strided_slice %95 {offsets = [0, 224], sizes = [16, 16], strides = [1, 1]} : vector<16x320xf32> to vector<16x16xf32>
    %111 = vector.extract_strided_slice %95 {offsets = [0, 240], sizes = [16, 16], strides = [1, 1]} : vector<16x320xf32> to vector<16x16xf32>
    %112 = vector.extract_strided_slice %95 {offsets = [0, 256], sizes = [16, 16], strides = [1, 1]} : vector<16x320xf32> to vector<16x16xf32>
    %113 = vector.extract_strided_slice %95 {offsets = [0, 272], sizes = [16, 16], strides = [1, 1]} : vector<16x320xf32> to vector<16x16xf32>
    %114 = vector.extract_strided_slice %95 {offsets = [0, 288], sizes = [16, 16], strides = [1, 1]} : vector<16x320xf32> to vector<16x16xf32>
    %115 = vector.extract_strided_slice %95 {offsets = [0, 304], sizes = [16, 16], strides = [1, 1]} : vector<16x320xf32> to vector<16x16xf32>
    %116 = tpu.concatenate %96, %97, %98, %99, %100, %101, %102, %103, %104, %105, %106, %107, %108, %109, %110, %111 in 0 : vector<16x16xf32>, vector<16x16xf32>, vector<16x16xf32>, vector<16x16xf32>, vector<16x16xf32>, vector<16x16xf32>, vector<16x16xf32>, vector<16x16xf32>, vector<16x16xf32>, vector<16x16xf32>, vector<16x16xf32>, vector<16x16xf32>, vector<16x16xf32>, vector<16x16xf32>, vector<16x16xf32>, vector<16x16xf32> -> vector<256x16xf32>
    %117 = tpu.concatenate %112, %113, %114, %115 in 0 : vector<16x16xf32>, vector<16x16xf32>, vector<16x16xf32>, vector<16x16xf32> -> vector<64x16xf32>
    %118 = tpu.concatenate %116, %117 in 0 : vector<256x16xf32>, vector<64x16xf32> -> vector<320x16xf32>
    %cst_50 = arith.constant dense<0.000000e+00> : vector<320x16xf32>
    %119 = tpu.matmul %118, %77, %cst_50 {dimension_numbers = #tpu.dot_dimension_numbers<[1], [0], [0], [1], [0, 0, 1, 1], [], []>} : vector<320x16xf32>, vector<16x16xf32>, vector<320x16xf32> -> vector<320x16xf32>
    %120 = vector.extract_strided_slice %119 {offsets = [0, 0], sizes = [16, 16], strides = [1, 1]} : vector<320x16xf32> to vector<16x16xf32>
    %121 = vector.extract_strided_slice %119 {offsets = [16, 0], sizes = [16, 16], strides = [1, 1]} : vector<320x16xf32> to vector<16x16xf32>
    %122 = vector.extract_strided_slice %119 {offsets = [32, 0], sizes = [16, 16], strides = [1, 1]} : vector<320x16xf32> to vector<16x16xf32>
    %123 = vector.extract_strided_slice %119 {offsets = [48, 0], sizes = [16, 16], strides = [1, 1]} : vector<320x16xf32> to vector<16x16xf32>
    %124 = vector.extract_strided_slice %119 {offsets = [64, 0], sizes = [16, 16], strides = [1, 1]} : vector<320x16xf32> to vector<16x16xf32>
    %125 = vector.extract_strided_slice %119 {offsets = [80, 0], sizes = [16, 16], strides = [1, 1]} : vector<320x16xf32> to vector<16x16xf32>
    %126 = vector.extract_strided_slice %119 {offsets = [96, 0], sizes = [16, 16], strides = [1, 1]} : vector<320x16xf32> to vector<16x16xf32>
    %127 = vector.extract_strided_slice %119 {offsets = [112, 0], sizes = [16, 16], strides = [1, 1]} : vector<320x16xf32> to vector<16x16xf32>
    %128 = vector.extract_strided_slice %119 {offsets = [128, 0], sizes = [16, 16], strides = [1, 1]} : vector<320x16xf32> to vector<16x16xf32>
    %129 = vector.extract_strided_slice %119 {offsets = [144, 0], sizes = [16, 16], strides = [1, 1]} : vector<320x16xf32> to vector<16x16xf32>
    %130 = vector.extract_strided_slice %119 {offsets = [160, 0], sizes = [16, 16], strides = [1, 1]} : vector<320x16xf32> to vector<16x16xf32>
    %131 = vector.extract_strided_slice %119 {offsets = [176, 0], sizes = [16, 16], strides = [1, 1]} : vector<320x16xf32> to vector<16x16xf32>
    %132 = vector.extract_strided_slice %119 {offsets = [192, 0], sizes = [16, 16], strides = [1, 1]} : vector<320x16xf32> to vector<16x16xf32>
    %133 = vector.extract_strided_slice %119 {offsets = [208, 0], sizes = [16, 16], strides = [1, 1]} : vector<320x16xf32> to vector<16x16xf32>
    %134 = vector.extract_strided_slice %119 {offsets = [224, 0], sizes = [16, 16], strides = [1, 1]} : vector<320x16xf32> to vector<16x16xf32>
    %135 = vector.extract_strided_slice %119 {offsets = [240, 0], sizes = [16, 16], strides = [1, 1]} : vector<320x16xf32> to vector<16x16xf32>
    %136 = vector.extract_strided_slice %119 {offsets = [256, 0], sizes = [16, 16], strides = [1, 1]} : vector<320x16xf32> to vector<16x16xf32>
    %137 = vector.extract_strided_slice %119 {offsets = [272, 0], sizes = [16, 16], strides = [1, 1]} : vector<320x16xf32> to vector<16x16xf32>
    %138 = vector.extract_strided_slice %119 {offsets = [288, 0], sizes = [16, 16], strides = [1, 1]} : vector<320x16xf32> to vector<16x16xf32>
    %139 = vector.extract_strided_slice %119 {offsets = [304, 0], sizes = [16, 16], strides = [1, 1]} : vector<320x16xf32> to vector<16x16xf32>
    %140 = arith.mulf %120, %120 : vector<16x16xf32>
    %141 = arith.mulf %121, %121 : vector<16x16xf32>
    %142 = arith.mulf %120, %121 : vector<16x16xf32>
    %143 = arith.subf %122, %140 : vector<16x16xf32>
    %144 = arith.subf %123, %141 : vector<16x16xf32>
    %145 = arith.subf %124, %142 : vector<16x16xf32>
    %cst_51 = arith.constant 2.000000e+00 : f32
    %146 = vector.broadcast %cst_51 : f32 to vector<16x16xf32>
    %147 = arith.mulf %146, %145 : vector<16x16xf32>
    %cst_52 = arith.constant 5.852250e+01 : f32
    %148 = vector.broadcast %cst_52 : f32 to vector<16x16xf32>
    %149 = arith.addf %147, %148 : vector<16x16xf32>
    %150 = arith.addf %143, %144 : vector<16x16xf32>
    %cst_53 = arith.constant 5.852250e+01 : f32
    %151 = vector.broadcast %cst_53 : f32 to vector<16x16xf32>
    %152 = arith.addf %150, %151 : vector<16x16xf32>
    %153 = arith.divf %149, %152 : vector<16x16xf32>
    %154 = arith.mulf %153, %153 : vector<16x16xf32>
    %155 = arith.mulf %57, %154 : vector<16x16xf32>
    %156 = arith.mulf %125, %125 : vector<16x16xf32>
    %157 = arith.mulf %126, %126 : vector<16x16xf32>
    %158 = arith.mulf %125, %126 : vector<16x16xf32>
    %159 = arith.subf %127, %156 : vector<16x16xf32>
    %160 = arith.subf %128, %157 : vector<16x16xf32>
    %161 = arith.subf %129, %158 : vector<16x16xf32>
    %cst_54 = arith.constant 2.000000e+00 : f32
    %162 = vector.broadcast %cst_54 : f32 to vector<16x16xf32>
    %163 = arith.mulf %162, %161 : vector<16x16xf32>
    %cst_55 = arith.constant 5.852250e+01 : f32
    %164 = vector.broadcast %cst_55 : f32 to vector<16x16xf32>
    %165 = arith.addf %163, %164 : vector<16x16xf32>
    %166 = arith.addf %159, %160 : vector<16x16xf32>
    %cst_56 = arith.constant 5.852250e+01 : f32
    %167 = vector.broadcast %cst_56 : f32 to vector<16x16xf32>
    %168 = arith.addf %166, %167 : vector<16x16xf32>
    %169 = arith.divf %165, %168 : vector<16x16xf32>
    %170 = arith.mulf %155, %169 : vector<16x16xf32>
    %171 = arith.mulf %130, %130 : vector<16x16xf32>
    %172 = arith.mulf %131, %131 : vector<16x16xf32>
    %173 = arith.mulf %130, %131 : vector<16x16xf32>
    %174 = arith.subf %132, %171 : vector<16x16xf32>
    %175 = arith.subf %133, %172 : vector<16x16xf32>
    %176 = arith.subf %134, %173 : vector<16x16xf32>
    %cst_57 = arith.constant 2.000000e+00 : f32
    %177 = vector.broadcast %cst_57 : f32 to vector<16x16xf32>
    %178 = arith.mulf %177, %176 : vector<16x16xf32>
    %cst_58 = arith.constant 5.852250e+01 : f32
    %179 = vector.broadcast %cst_58 : f32 to vector<16x16xf32>
    %180 = arith.addf %178, %179 : vector<16x16xf32>
    %181 = arith.addf %174, %175 : vector<16x16xf32>
    %cst_59 = arith.constant 5.852250e+01 : f32
    %182 = vector.broadcast %cst_59 : f32 to vector<16x16xf32>
    %183 = arith.addf %181, %182 : vector<16x16xf32>
    %184 = arith.divf %180, %183 : vector<16x16xf32>
    %185 = arith.mulf %184, %184 : vector<16x16xf32>
    %186 = arith.mulf %73, %185 : vector<16x16xf32>
    %187 = arith.mulf %135, %135 : vector<16x16xf32>
    %188 = arith.mulf %136, %136 : vector<16x16xf32>
    %189 = arith.mulf %135, %136 : vector<16x16xf32>
    %190 = arith.subf %137, %187 : vector<16x16xf32>
    %191 = arith.subf %138, %188 : vector<16x16xf32>
    %192 = arith.subf %139, %189 : vector<16x16xf32>
    %cst_60 = arith.constant 2.000000e+00 : f32
    %193 = vector.broadcast %cst_60 : f32 to vector<16x16xf32>
    %194 = arith.mulf %193, %192 : vector<16x16xf32>
    %cst_61 = arith.constant 5.852250e+01 : f32
    %195 = vector.broadcast %cst_61 : f32 to vector<16x16xf32>
    %196 = arith.addf %194, %195 : vector<16x16xf32>
    %197 = arith.addf %190, %191 : vector<16x16xf32>
    %cst_62 = arith.constant 5.852250e+01 : f32
    %198 = vector.broadcast %cst_62 : f32 to vector<16x16xf32>
    %199 = arith.addf %197, %198 : vector<16x16xf32>
    %200 = arith.divf %196, %199 : vector<16x16xf32>
    %201 = arith.mulf %186, %200 : vector<16x16xf32>
    %c2 = arith.constant 2 : index
    %c0_63 = arith.constant 0 : index
    %c0_64 = arith.constant 0 : index
    %202 = vector.load %arg3[%c2, %c0_63, %c0_64] : memref<5x16x16xf32, #tpu.memory_space<vmem>>, vector<1x16x16xf32>
    %203 = vector.shape_cast %202 : vector<1x16x16xf32> to vector<16x16xf32>
    %c2_65 = arith.constant 2 : index
    %c0_66 = arith.constant 0 : index
    %c0_67 = arith.constant 0 : index
    %204 = vector.load %arg4[%c2_65, %c0_66, %c0_67] : memref<5x16x16xf32, #tpu.memory_space<vmem>>, vector<1x16x16xf32>
    %205 = vector.shape_cast %204 : vector<1x16x16xf32> to vector<16x16xf32>
    %206 = tpu.concatenate %79, %81, %82, %83, %84, %86, %88, %89, %90, %91 in 1 : vector<16x16xf32>, vector<16x16xf32>, vector<16x16xf32>, vector<16x16xf32>, vector<16x16xf32>, vector<16x16xf32>, vector<16x16xf32>, vector<16x16xf32>, vector<16x16xf32>, vector<16x16xf32> -> vector<16x160xf32>
    %cst_68 = arith.constant dense<0.000000e+00> : vector<16x160xf32>
    %207 = tpu.matmul %203, %206, %cst_68 {dimension_numbers = #tpu.dot_dimension_numbers<[1], [0], [0], [1], [0, 0, 1, 1], [], []>} : vector<16x16xf32>, vector<16x160xf32>, vector<16x160xf32> -> vector<16x160xf32>
    %208 = vector.extract_strided_slice %207 {offsets = [0, 0], sizes = [16, 16], strides = [1, 1]} : vector<16x160xf32> to vector<16x16xf32>
    %209 = vector.extract_strided_slice %207 {offsets = [0, 16], sizes = [16, 16], strides = [1, 1]} : vector<16x160xf32> to vector<16x16xf32>
    %210 = vector.extract_strided_slice %207 {offsets = [0, 32], sizes = [16, 16], strides = [1, 1]} : vector<16x160xf32> to vector<16x16xf32>
    %211 = vector.extract_strided_slice %207 {offsets = [0, 48], sizes = [16, 16], strides = [1, 1]} : vector<16x160xf32> to vector<16x16xf32>
    %212 = vector.extract_strided_slice %207 {offsets = [0, 64], sizes = [16, 16], strides = [1, 1]} : vector<16x160xf32> to vector<16x16xf32>
    %213 = vector.extract_strided_slice %207 {offsets = [0, 80], sizes = [16, 16], strides = [1, 1]} : vector<16x160xf32> to vector<16x16xf32>
    %214 = vector.extract_strided_slice %207 {offsets = [0, 96], sizes = [16, 16], strides = [1, 1]} : vector<16x160xf32> to vector<16x16xf32>
    %215 = vector.extract_strided_slice %207 {offsets = [0, 112], sizes = [16, 16], strides = [1, 1]} : vector<16x160xf32> to vector<16x16xf32>
    %216 = vector.extract_strided_slice %207 {offsets = [0, 128], sizes = [16, 16], strides = [1, 1]} : vector<16x160xf32> to vector<16x16xf32>
    %217 = vector.extract_strided_slice %207 {offsets = [0, 144], sizes = [16, 16], strides = [1, 1]} : vector<16x160xf32> to vector<16x16xf32>
    %218 = tpu.concatenate %208, %209, %210, %211, %212, %213, %214, %215, %216, %217 in 0 : vector<16x16xf32>, vector<16x16xf32>, vector<16x16xf32>, vector<16x16xf32>, vector<16x16xf32>, vector<16x16xf32>, vector<16x16xf32>, vector<16x16xf32>, vector<16x16xf32>, vector<16x16xf32> -> vector<160x16xf32>
    %cst_69 = arith.constant dense<0.000000e+00> : vector<160x16xf32>
    %219 = tpu.matmul %218, %205, %cst_69 {dimension_numbers = #tpu.dot_dimension_numbers<[1], [0], [0], [1], [0, 0, 1, 1], [], []>} : vector<160x16xf32>, vector<16x16xf32>, vector<160x16xf32> -> vector<160x16xf32>
    %220 = vector.extract_strided_slice %219 {offsets = [0, 0], sizes = [16, 16], strides = [1, 1]} : vector<160x16xf32> to vector<16x16xf32>
    %221 = vector.extract_strided_slice %219 {offsets = [16, 0], sizes = [16, 16], strides = [1, 1]} : vector<160x16xf32> to vector<16x16xf32>
    %222 = vector.extract_strided_slice %219 {offsets = [32, 0], sizes = [16, 16], strides = [1, 1]} : vector<160x16xf32> to vector<16x16xf32>
    %223 = vector.extract_strided_slice %219 {offsets = [48, 0], sizes = [16, 16], strides = [1, 1]} : vector<160x16xf32> to vector<16x16xf32>
    %224 = vector.extract_strided_slice %219 {offsets = [64, 0], sizes = [16, 16], strides = [1, 1]} : vector<160x16xf32> to vector<16x16xf32>
    %225 = vector.extract_strided_slice %219 {offsets = [80, 0], sizes = [16, 16], strides = [1, 1]} : vector<160x16xf32> to vector<16x16xf32>
    %226 = vector.extract_strided_slice %219 {offsets = [96, 0], sizes = [16, 16], strides = [1, 1]} : vector<160x16xf32> to vector<16x16xf32>
    %227 = vector.extract_strided_slice %219 {offsets = [112, 0], sizes = [16, 16], strides = [1, 1]} : vector<160x16xf32> to vector<16x16xf32>
    %228 = vector.extract_strided_slice %219 {offsets = [128, 0], sizes = [16, 16], strides = [1, 1]} : vector<160x16xf32> to vector<16x16xf32>
    %229 = vector.extract_strided_slice %219 {offsets = [144, 0], sizes = [16, 16], strides = [1, 1]} : vector<160x16xf32> to vector<16x16xf32>
    %230 = arith.mulf %220, %220 : vector<16x16xf32>
    %231 = arith.mulf %221, %221 : vector<16x16xf32>
    %232 = arith.mulf %220, %221 : vector<16x16xf32>
    %233 = arith.subf %222, %230 : vector<16x16xf32>
    %234 = arith.subf %223, %231 : vector<16x16xf32>
    %235 = arith.subf %224, %232 : vector<16x16xf32>
    %cst_70 = arith.constant 2.000000e+00 : f32
    %236 = vector.broadcast %cst_70 : f32 to vector<16x16xf32>
    %237 = arith.mulf %236, %235 : vector<16x16xf32>
    %cst_71 = arith.constant 5.852250e+01 : f32
    %238 = vector.broadcast %cst_71 : f32 to vector<16x16xf32>
    %239 = arith.addf %237, %238 : vector<16x16xf32>
    %240 = arith.addf %233, %234 : vector<16x16xf32>
    %cst_72 = arith.constant 5.852250e+01 : f32
    %241 = vector.broadcast %cst_72 : f32 to vector<16x16xf32>
    %242 = arith.addf %240, %241 : vector<16x16xf32>
    %243 = arith.divf %239, %242 : vector<16x16xf32>
    %244 = arith.mulf %243, %243 : vector<16x16xf32>
    %245 = arith.mulf %244, %243 : vector<16x16xf32>
    %246 = arith.mulf %170, %245 : vector<16x16xf32>
    %247 = arith.mulf %225, %225 : vector<16x16xf32>
    %248 = arith.mulf %226, %226 : vector<16x16xf32>
    %249 = arith.mulf %225, %226 : vector<16x16xf32>
    %250 = arith.subf %227, %247 : vector<16x16xf32>
    %251 = arith.subf %228, %248 : vector<16x16xf32>
    %252 = arith.subf %229, %249 : vector<16x16xf32>
    %cst_73 = arith.constant 2.000000e+00 : f32
    %253 = vector.broadcast %cst_73 : f32 to vector<16x16xf32>
    %254 = arith.mulf %253, %252 : vector<16x16xf32>
    %cst_74 = arith.constant 5.852250e+01 : f32
    %255 = vector.broadcast %cst_74 : f32 to vector<16x16xf32>
    %256 = arith.addf %254, %255 : vector<16x16xf32>
    %257 = arith.addf %250, %251 : vector<16x16xf32>
    %cst_75 = arith.constant 5.852250e+01 : f32
    %258 = vector.broadcast %cst_75 : f32 to vector<16x16xf32>
    %259 = arith.addf %257, %258 : vector<16x16xf32>
    %260 = arith.divf %256, %259 : vector<16x16xf32>
    %261 = arith.mulf %260, %260 : vector<16x16xf32>
    %262 = arith.mulf %261, %260 : vector<16x16xf32>
    %263 = arith.mulf %201, %262 : vector<16x16xf32>
    %c3 = arith.constant 3 : index
    %c0_76 = arith.constant 0 : index
    %c0_77 = arith.constant 0 : index
    %264 = vector.load %arg3[%c3, %c0_76, %c0_77] : memref<5x16x16xf32, #tpu.memory_space<vmem>>, vector<1x16x16xf32>
    %265 = vector.shape_cast %264 : vector<1x16x16xf32> to vector<16x16xf32>
    %c3_78 = arith.constant 3 : index
    %c0_79 = arith.constant 0 : index
    %c0_80 = arith.constant 0 : index
    %266 = vector.load %arg4[%c3_78, %c0_79, %c0_80] : memref<5x16x16xf32, #tpu.memory_space<vmem>>, vector<1x16x16xf32>
    %267 = vector.shape_cast %266 : vector<1x16x16xf32> to vector<16x16xf32>
    %c0_81 = arith.constant 0 : index
    %c2_82 = arith.constant 2 : index
    %c0_83 = arith.constant 0 : index
    %c0_84 = arith.constant 0 : index
    %268 = vector.load %arg1[%c0_81, %c2_82, %c0_83, %c0_84] : memref<2x3x16x16xf32, #tpu.memory_space<vmem>>, vector<1x1x16x16xf32>
    %269 = vector.shape_cast %268 : vector<1x1x16x16xf32> to vector<16x16xf32>
    %c0_85 = arith.constant 0 : index
    %c2_86 = arith.constant 2 : index
    %c0_87 = arith.constant 0 : index
    %c0_88 = arith.constant 0 : index
    %270 = vector.load %arg2[%c0_85, %c2_86, %c0_87, %c0_88] : memref<2x3x16x16xf32, #tpu.memory_space<vmem>>, vector<1x1x16x16xf32>
    %271 = vector.shape_cast %270 : vector<1x1x16x16xf32> to vector<16x16xf32>
    %272 = arith.mulf %269, %269 : vector<16x16xf32>
    %273 = arith.mulf %271, %271 : vector<16x16xf32>
    %274 = arith.mulf %269, %271 : vector<16x16xf32>
    %c1_89 = arith.constant 1 : index
    %c2_90 = arith.constant 2 : index
    %c0_91 = arith.constant 0 : index
    %c0_92 = arith.constant 0 : index
    %275 = vector.load %arg1[%c1_89, %c2_90, %c0_91, %c0_92] : memref<2x3x16x16xf32, #tpu.memory_space<vmem>>, vector<1x1x16x16xf32>
    %276 = vector.shape_cast %275 : vector<1x1x16x16xf32> to vector<16x16xf32>
    %c1_93 = arith.constant 1 : index
    %c2_94 = arith.constant 2 : index
    %c0_95 = arith.constant 0 : index
    %c0_96 = arith.constant 0 : index
    %277 = vector.load %arg2[%c1_93, %c2_94, %c0_95, %c0_96] : memref<2x3x16x16xf32, #tpu.memory_space<vmem>>, vector<1x1x16x16xf32>
    %278 = vector.shape_cast %277 : vector<1x1x16x16xf32> to vector<16x16xf32>
    %279 = arith.mulf %276, %276 : vector<16x16xf32>
    %280 = arith.mulf %278, %278 : vector<16x16xf32>
    %281 = arith.mulf %276, %278 : vector<16x16xf32>
    %282 = tpu.concatenate %79, %81, %82, %83, %84, %269, %271, %272, %273, %274, %86, %88, %89, %90, %91, %276 in 1 : vector<16x16xf32>, vector<16x16xf32>, vector<16x16xf32>, vector<16x16xf32>, vector<16x16xf32>, vector<16x16xf32>, vector<16x16xf32>, vector<16x16xf32>, vector<16x16xf32>, vector<16x16xf32>, vector<16x16xf32>, vector<16x16xf32>, vector<16x16xf32>, vector<16x16xf32>, vector<16x16xf32>, vector<16x16xf32> -> vector<16x256xf32>
    %283 = tpu.concatenate %278, %279, %280, %281 in 1 : vector<16x16xf32>, vector<16x16xf32>, vector<16x16xf32>, vector<16x16xf32> -> vector<16x64xf32>
    %284 = tpu.concatenate %282, %283 in 1 : vector<16x256xf32>, vector<16x64xf32> -> vector<16x320xf32>
    %cst_97 = arith.constant dense<0.000000e+00> : vector<16x320xf32>
    %285 = tpu.matmul %265, %284, %cst_97 {dimension_numbers = #tpu.dot_dimension_numbers<[1], [0], [0], [1], [0, 0, 1, 1], [], []>} : vector<16x16xf32>, vector<16x320xf32>, vector<16x320xf32> -> vector<16x320xf32>
    %286 = vector.extract_strided_slice %285 {offsets = [0, 0], sizes = [16, 16], strides = [1, 1]} : vector<16x320xf32> to vector<16x16xf32>
    %287 = vector.extract_strided_slice %285 {offsets = [0, 16], sizes = [16, 16], strides = [1, 1]} : vector<16x320xf32> to vector<16x16xf32>
    %288 = vector.extract_strided_slice %285 {offsets = [0, 32], sizes = [16, 16], strides = [1, 1]} : vector<16x320xf32> to vector<16x16xf32>
    %289 = vector.extract_strided_slice %285 {offsets = [0, 48], sizes = [16, 16], strides = [1, 1]} : vector<16x320xf32> to vector<16x16xf32>
    %290 = vector.extract_strided_slice %285 {offsets = [0, 64], sizes = [16, 16], strides = [1, 1]} : vector<16x320xf32> to vector<16x16xf32>
    %291 = vector.extract_strided_slice %285 {offsets = [0, 80], sizes = [16, 16], strides = [1, 1]} : vector<16x320xf32> to vector<16x16xf32>
    %292 = vector.extract_strided_slice %285 {offsets = [0, 96], sizes = [16, 16], strides = [1, 1]} : vector<16x320xf32> to vector<16x16xf32>
    %293 = vector.extract_strided_slice %285 {offsets = [0, 112], sizes = [16, 16], strides = [1, 1]} : vector<16x320xf32> to vector<16x16xf32>
    %294 = vector.extract_strided_slice %285 {offsets = [0, 128], sizes = [16, 16], strides = [1, 1]} : vector<16x320xf32> to vector<16x16xf32>
    %295 = vector.extract_strided_slice %285 {offsets = [0, 144], sizes = [16, 16], strides = [1, 1]} : vector<16x320xf32> to vector<16x16xf32>
    %296 = vector.extract_strided_slice %285 {offsets = [0, 160], sizes = [16, 16], strides = [1, 1]} : vector<16x320xf32> to vector<16x16xf32>
    %297 = vector.extract_strided_slice %285 {offsets = [0, 176], sizes = [16, 16], strides = [1, 1]} : vector<16x320xf32> to vector<16x16xf32>
    %298 = vector.extract_strided_slice %285 {offsets = [0, 192], sizes = [16, 16], strides = [1, 1]} : vector<16x320xf32> to vector<16x16xf32>
    %299 = vector.extract_strided_slice %285 {offsets = [0, 208], sizes = [16, 16], strides = [1, 1]} : vector<16x320xf32> to vector<16x16xf32>
    %300 = vector.extract_strided_slice %285 {offsets = [0, 224], sizes = [16, 16], strides = [1, 1]} : vector<16x320xf32> to vector<16x16xf32>
    %301 = vector.extract_strided_slice %285 {offsets = [0, 240], sizes = [16, 16], strides = [1, 1]} : vector<16x320xf32> to vector<16x16xf32>
    %302 = vector.extract_strided_slice %285 {offsets = [0, 256], sizes = [16, 16], strides = [1, 1]} : vector<16x320xf32> to vector<16x16xf32>
    %303 = vector.extract_strided_slice %285 {offsets = [0, 272], sizes = [16, 16], strides = [1, 1]} : vector<16x320xf32> to vector<16x16xf32>
    %304 = vector.extract_strided_slice %285 {offsets = [0, 288], sizes = [16, 16], strides = [1, 1]} : vector<16x320xf32> to vector<16x16xf32>
    %305 = vector.extract_strided_slice %285 {offsets = [0, 304], sizes = [16, 16], strides = [1, 1]} : vector<16x320xf32> to vector<16x16xf32>
    %306 = tpu.concatenate %286, %287, %288, %289, %290, %291, %292, %293, %294, %295, %296, %297, %298, %299, %300, %301 in 0 : vector<16x16xf32>, vector<16x16xf32>, vector<16x16xf32>, vector<16x16xf32>, vector<16x16xf32>, vector<16x16xf32>, vector<16x16xf32>, vector<16x16xf32>, vector<16x16xf32>, vector<16x16xf32>, vector<16x16xf32>, vector<16x16xf32>, vector<16x16xf32>, vector<16x16xf32>, vector<16x16xf32>, vector<16x16xf32> -> vector<256x16xf32>
    %307 = tpu.concatenate %302, %303, %304, %305 in 0 : vector<16x16xf32>, vector<16x16xf32>, vector<16x16xf32>, vector<16x16xf32> -> vector<64x16xf32>
    %308 = tpu.concatenate %306, %307 in 0 : vector<256x16xf32>, vector<64x16xf32> -> vector<320x16xf32>
    %cst_98 = arith.constant dense<0.000000e+00> : vector<320x16xf32>
    %309 = tpu.matmul %308, %267, %cst_98 {dimension_numbers = #tpu.dot_dimension_numbers<[1], [0], [0], [1], [0, 0, 1, 1], [], []>} : vector<320x16xf32>, vector<16x16xf32>, vector<320x16xf32> -> vector<320x16xf32>
    %310 = vector.extract_strided_slice %309 {offsets = [0, 0], sizes = [16, 16], strides = [1, 1]} : vector<320x16xf32> to vector<16x16xf32>
    %311 = vector.extract_strided_slice %309 {offsets = [16, 0], sizes = [16, 16], strides = [1, 1]} : vector<320x16xf32> to vector<16x16xf32>
    %312 = vector.extract_strided_slice %309 {offsets = [32, 0], sizes = [16, 16], strides = [1, 1]} : vector<320x16xf32> to vector<16x16xf32>
    %313 = vector.extract_strided_slice %309 {offsets = [48, 0], sizes = [16, 16], strides = [1, 1]} : vector<320x16xf32> to vector<16x16xf32>
    %314 = vector.extract_strided_slice %309 {offsets = [64, 0], sizes = [16, 16], strides = [1, 1]} : vector<320x16xf32> to vector<16x16xf32>
    %315 = vector.extract_strided_slice %309 {offsets = [80, 0], sizes = [16, 16], strides = [1, 1]} : vector<320x16xf32> to vector<16x16xf32>
    %316 = vector.extract_strided_slice %309 {offsets = [96, 0], sizes = [16, 16], strides = [1, 1]} : vector<320x16xf32> to vector<16x16xf32>
    %317 = vector.extract_strided_slice %309 {offsets = [112, 0], sizes = [16, 16], strides = [1, 1]} : vector<320x16xf32> to vector<16x16xf32>
    %318 = vector.extract_strided_slice %309 {offsets = [128, 0], sizes = [16, 16], strides = [1, 1]} : vector<320x16xf32> to vector<16x16xf32>
    %319 = vector.extract_strided_slice %309 {offsets = [144, 0], sizes = [16, 16], strides = [1, 1]} : vector<320x16xf32> to vector<16x16xf32>
    %320 = vector.extract_strided_slice %309 {offsets = [160, 0], sizes = [16, 16], strides = [1, 1]} : vector<320x16xf32> to vector<16x16xf32>
    %321 = vector.extract_strided_slice %309 {offsets = [176, 0], sizes = [16, 16], strides = [1, 1]} : vector<320x16xf32> to vector<16x16xf32>
    %322 = vector.extract_strided_slice %309 {offsets = [192, 0], sizes = [16, 16], strides = [1, 1]} : vector<320x16xf32> to vector<16x16xf32>
    %323 = vector.extract_strided_slice %309 {offsets = [208, 0], sizes = [16, 16], strides = [1, 1]} : vector<320x16xf32> to vector<16x16xf32>
    %324 = vector.extract_strided_slice %309 {offsets = [224, 0], sizes = [16, 16], strides = [1, 1]} : vector<320x16xf32> to vector<16x16xf32>
    %325 = vector.extract_strided_slice %309 {offsets = [240, 0], sizes = [16, 16], strides = [1, 1]} : vector<320x16xf32> to vector<16x16xf32>
    %326 = vector.extract_strided_slice %309 {offsets = [256, 0], sizes = [16, 16], strides = [1, 1]} : vector<320x16xf32> to vector<16x16xf32>
    %327 = vector.extract_strided_slice %309 {offsets = [272, 0], sizes = [16, 16], strides = [1, 1]} : vector<320x16xf32> to vector<16x16xf32>
    %328 = vector.extract_strided_slice %309 {offsets = [288, 0], sizes = [16, 16], strides = [1, 1]} : vector<320x16xf32> to vector<16x16xf32>
    %329 = vector.extract_strided_slice %309 {offsets = [304, 0], sizes = [16, 16], strides = [1, 1]} : vector<320x16xf32> to vector<16x16xf32>
    %330 = arith.mulf %310, %310 : vector<16x16xf32>
    %331 = arith.mulf %311, %311 : vector<16x16xf32>
    %332 = arith.mulf %310, %311 : vector<16x16xf32>
    %333 = arith.subf %312, %330 : vector<16x16xf32>
    %334 = arith.subf %313, %331 : vector<16x16xf32>
    %335 = arith.subf %314, %332 : vector<16x16xf32>
    %cst_99 = arith.constant 2.000000e+00 : f32
    %336 = vector.broadcast %cst_99 : f32 to vector<16x16xf32>
    %337 = arith.mulf %336, %335 : vector<16x16xf32>
    %cst_100 = arith.constant 5.852250e+01 : f32
    %338 = vector.broadcast %cst_100 : f32 to vector<16x16xf32>
    %339 = arith.addf %337, %338 : vector<16x16xf32>
    %340 = arith.addf %333, %334 : vector<16x16xf32>
    %cst_101 = arith.constant 5.852250e+01 : f32
    %341 = vector.broadcast %cst_101 : f32 to vector<16x16xf32>
    %342 = arith.addf %340, %341 : vector<16x16xf32>
    %343 = arith.divf %339, %342 : vector<16x16xf32>
    %344 = arith.mulf %246, %343 : vector<16x16xf32>
    %345 = arith.mulf %315, %315 : vector<16x16xf32>
    %346 = arith.mulf %316, %316 : vector<16x16xf32>
    %347 = arith.mulf %315, %316 : vector<16x16xf32>
    %348 = arith.subf %317, %345 : vector<16x16xf32>
    %349 = arith.subf %318, %346 : vector<16x16xf32>
    %350 = arith.subf %319, %347 : vector<16x16xf32>
    %cst_102 = arith.constant 2.000000e+00 : f32
    %351 = vector.broadcast %cst_102 : f32 to vector<16x16xf32>
    %352 = arith.mulf %351, %350 : vector<16x16xf32>
    %cst_103 = arith.constant 5.852250e+01 : f32
    %353 = vector.broadcast %cst_103 : f32 to vector<16x16xf32>
    %354 = arith.addf %352, %353 : vector<16x16xf32>
    %355 = arith.addf %348, %349 : vector<16x16xf32>
    %cst_104 = arith.constant 5.852250e+01 : f32
    %356 = vector.broadcast %cst_104 : f32 to vector<16x16xf32>
    %357 = arith.addf %355, %356 : vector<16x16xf32>
    %358 = arith.divf %354, %357 : vector<16x16xf32>
    %359 = arith.mulf %358, %358 : vector<16x16xf32>
    %360 = arith.mulf %344, %359 : vector<16x16xf32>
    %361 = arith.mulf %320, %320 : vector<16x16xf32>
    %362 = arith.mulf %321, %321 : vector<16x16xf32>
    %363 = arith.mulf %320, %321 : vector<16x16xf32>
    %364 = arith.subf %322, %361 : vector<16x16xf32>
    %365 = arith.subf %323, %362 : vector<16x16xf32>
    %366 = arith.subf %324, %363 : vector<16x16xf32>
    %cst_105 = arith.constant 2.000000e+00 : f32
    %367 = vector.broadcast %cst_105 : f32 to vector<16x16xf32>
    %368 = arith.mulf %367, %366 : vector<16x16xf32>
    %cst_106 = arith.constant 5.852250e+01 : f32
    %369 = vector.broadcast %cst_106 : f32 to vector<16x16xf32>
    %370 = arith.addf %368, %369 : vector<16x16xf32>
    %371 = arith.addf %364, %365 : vector<16x16xf32>
    %cst_107 = arith.constant 5.852250e+01 : f32
    %372 = vector.broadcast %cst_107 : f32 to vector<16x16xf32>
    %373 = arith.addf %371, %372 : vector<16x16xf32>
    %374 = arith.divf %370, %373 : vector<16x16xf32>
    %375 = arith.mulf %263, %374 : vector<16x16xf32>
    %376 = arith.mulf %325, %325 : vector<16x16xf32>
    %377 = arith.mulf %326, %326 : vector<16x16xf32>
    %378 = arith.mulf %325, %326 : vector<16x16xf32>
    %379 = arith.subf %327, %376 : vector<16x16xf32>
    %380 = arith.subf %328, %377 : vector<16x16xf32>
    %381 = arith.subf %329, %378 : vector<16x16xf32>
    %cst_108 = arith.constant 2.000000e+00 : f32
    %382 = vector.broadcast %cst_108 : f32 to vector<16x16xf32>
    %383 = arith.mulf %382, %381 : vector<16x16xf32>
    %cst_109 = arith.constant 5.852250e+01 : f32
    %384 = vector.broadcast %cst_109 : f32 to vector<16x16xf32>
    %385 = arith.addf %383, %384 : vector<16x16xf32>
    %386 = arith.addf %379, %380 : vector<16x16xf32>
    %cst_110 = arith.constant 5.852250e+01 : f32
    %387 = vector.broadcast %cst_110 : f32 to vector<16x16xf32>
    %388 = arith.addf %386, %387 : vector<16x16xf32>
    %389 = arith.divf %385, %388 : vector<16x16xf32>
    %390 = arith.mulf %389, %389 : vector<16x16xf32>
    %391 = arith.mulf %375, %390 : vector<16x16xf32>
    %c4 = arith.constant 4 : index
    %c0_111 = arith.constant 0 : index
    %c0_112 = arith.constant 0 : index
    %392 = vector.load %arg3[%c4, %c0_111, %c0_112] : memref<5x16x16xf32, #tpu.memory_space<vmem>>, vector<1x16x16xf32>
    %393 = vector.shape_cast %392 : vector<1x16x16xf32> to vector<16x16xf32>
    %c4_113 = arith.constant 4 : index
    %c0_114 = arith.constant 0 : index
    %c0_115 = arith.constant 0 : index
    %394 = vector.load %arg4[%c4_113, %c0_114, %c0_115] : memref<5x16x16xf32, #tpu.memory_space<vmem>>, vector<1x16x16xf32>
    %395 = vector.shape_cast %394 : vector<1x16x16xf32> to vector<16x16xf32>
    %396 = arith.subf %5, %7 : vector<16x16xf32>
    %397 = math.absf %396 : vector<16x16xf32>
    %398 = arith.subf %79, %81 : vector<16x16xf32>
    %399 = math.absf %398 : vector<16x16xf32>
    %400 = arith.addf %397, %399 : vector<16x16xf32>
    %401 = arith.subf %269, %271 : vector<16x16xf32>
    %402 = math.absf %401 : vector<16x16xf32>
    %403 = arith.addf %400, %402 : vector<16x16xf32>
    %404 = arith.subf %12, %14 : vector<16x16xf32>
    %405 = math.absf %404 : vector<16x16xf32>
    %406 = arith.subf %86, %88 : vector<16x16xf32>
    %407 = math.absf %406 : vector<16x16xf32>
    %408 = arith.addf %405, %407 : vector<16x16xf32>
    %409 = arith.subf %276, %278 : vector<16x16xf32>
    %410 = math.absf %409 : vector<16x16xf32>
    %411 = arith.addf %408, %410 : vector<16x16xf32>
    %412 = tpu.concatenate %269, %271, %272, %273, %274, %403, %276, %278, %279, %280, %281, %411 in 1 : vector<16x16xf32>, vector<16x16xf32>, vector<16x16xf32>, vector<16x16xf32>, vector<16x16xf32>, vector<16x16xf32>, vector<16x16xf32>, vector<16x16xf32>, vector<16x16xf32>, vector<16x16xf32>, vector<16x16xf32>, vector<16x16xf32> -> vector<16x192xf32>
    %cst_116 = arith.constant dense<0.000000e+00> : vector<16x192xf32>
    %413 = tpu.matmul %393, %412, %cst_116 {dimension_numbers = #tpu.dot_dimension_numbers<[1], [0], [0], [1], [0, 0, 1, 1], [], []>} : vector<16x16xf32>, vector<16x192xf32>, vector<16x192xf32> -> vector<16x192xf32>
    %414 = vector.extract_strided_slice %413 {offsets = [0, 0], sizes = [16, 16], strides = [1, 1]} : vector<16x192xf32> to vector<16x16xf32>
    %415 = vector.extract_strided_slice %413 {offsets = [0, 16], sizes = [16, 16], strides = [1, 1]} : vector<16x192xf32> to vector<16x16xf32>
    %416 = vector.extract_strided_slice %413 {offsets = [0, 32], sizes = [16, 16], strides = [1, 1]} : vector<16x192xf32> to vector<16x16xf32>
    %417 = vector.extract_strided_slice %413 {offsets = [0, 48], sizes = [16, 16], strides = [1, 1]} : vector<16x192xf32> to vector<16x16xf32>
    %418 = vector.extract_strided_slice %413 {offsets = [0, 64], sizes = [16, 16], strides = [1, 1]} : vector<16x192xf32> to vector<16x16xf32>
    %419 = vector.extract_strided_slice %413 {offsets = [0, 80], sizes = [16, 16], strides = [1, 1]} : vector<16x192xf32> to vector<16x16xf32>
    %420 = vector.extract_strided_slice %413 {offsets = [0, 96], sizes = [16, 16], strides = [1, 1]} : vector<16x192xf32> to vector<16x16xf32>
    %421 = vector.extract_strided_slice %413 {offsets = [0, 112], sizes = [16, 16], strides = [1, 1]} : vector<16x192xf32> to vector<16x16xf32>
    %422 = vector.extract_strided_slice %413 {offsets = [0, 128], sizes = [16, 16], strides = [1, 1]} : vector<16x192xf32> to vector<16x16xf32>
    %423 = vector.extract_strided_slice %413 {offsets = [0, 144], sizes = [16, 16], strides = [1, 1]} : vector<16x192xf32> to vector<16x16xf32>
    %424 = vector.extract_strided_slice %413 {offsets = [0, 160], sizes = [16, 16], strides = [1, 1]} : vector<16x192xf32> to vector<16x16xf32>
    %425 = vector.extract_strided_slice %413 {offsets = [0, 176], sizes = [16, 16], strides = [1, 1]} : vector<16x192xf32> to vector<16x16xf32>
    %426 = tpu.concatenate %414, %415, %416, %417, %418, %419, %420, %421, %422, %423, %424, %425 in 0 : vector<16x16xf32>, vector<16x16xf32>, vector<16x16xf32>, vector<16x16xf32>, vector<16x16xf32>, vector<16x16xf32>, vector<16x16xf32>, vector<16x16xf32>, vector<16x16xf32>, vector<16x16xf32>, vector<16x16xf32>, vector<16x16xf32> -> vector<192x16xf32>
    %cst_117 = arith.constant dense<0.000000e+00> : vector<192x16xf32>
    %427 = tpu.matmul %426, %395, %cst_117 {dimension_numbers = #tpu.dot_dimension_numbers<[1], [0], [0], [1], [0, 0, 1, 1], [], []>} : vector<192x16xf32>, vector<16x16xf32>, vector<192x16xf32> -> vector<192x16xf32>
    %428 = vector.extract_strided_slice %427 {offsets = [0, 0], sizes = [16, 16], strides = [1, 1]} : vector<192x16xf32> to vector<16x16xf32>
    %429 = vector.extract_strided_slice %427 {offsets = [16, 0], sizes = [16, 16], strides = [1, 1]} : vector<192x16xf32> to vector<16x16xf32>
    %430 = vector.extract_strided_slice %427 {offsets = [32, 0], sizes = [16, 16], strides = [1, 1]} : vector<192x16xf32> to vector<16x16xf32>
    %431 = vector.extract_strided_slice %427 {offsets = [48, 0], sizes = [16, 16], strides = [1, 1]} : vector<192x16xf32> to vector<16x16xf32>
    %432 = vector.extract_strided_slice %427 {offsets = [64, 0], sizes = [16, 16], strides = [1, 1]} : vector<192x16xf32> to vector<16x16xf32>
    %433 = vector.extract_strided_slice %427 {offsets = [80, 0], sizes = [16, 16], strides = [1, 1]} : vector<192x16xf32> to vector<16x16xf32>
    %434 = vector.extract_strided_slice %427 {offsets = [96, 0], sizes = [16, 16], strides = [1, 1]} : vector<192x16xf32> to vector<16x16xf32>
    %435 = vector.extract_strided_slice %427 {offsets = [112, 0], sizes = [16, 16], strides = [1, 1]} : vector<192x16xf32> to vector<16x16xf32>
    %436 = vector.extract_strided_slice %427 {offsets = [128, 0], sizes = [16, 16], strides = [1, 1]} : vector<192x16xf32> to vector<16x16xf32>
    %437 = vector.extract_strided_slice %427 {offsets = [144, 0], sizes = [16, 16], strides = [1, 1]} : vector<192x16xf32> to vector<16x16xf32>
    %438 = vector.extract_strided_slice %427 {offsets = [160, 0], sizes = [16, 16], strides = [1, 1]} : vector<192x16xf32> to vector<16x16xf32>
    %439 = vector.extract_strided_slice %427 {offsets = [176, 0], sizes = [16, 16], strides = [1, 1]} : vector<192x16xf32> to vector<16x16xf32>
    %440 = arith.mulf %428, %428 : vector<16x16xf32>
    %441 = arith.mulf %429, %429 : vector<16x16xf32>
    %442 = arith.mulf %428, %429 : vector<16x16xf32>
    %443 = arith.subf %430, %440 : vector<16x16xf32>
    %444 = arith.subf %431, %441 : vector<16x16xf32>
    %445 = arith.subf %432, %442 : vector<16x16xf32>
    %cst_118 = arith.constant 2.000000e+00 : f32
    %446 = vector.broadcast %cst_118 : f32 to vector<16x16xf32>
    %447 = arith.mulf %446, %445 : vector<16x16xf32>
    %cst_119 = arith.constant 5.852250e+01 : f32
    %448 = vector.broadcast %cst_119 : f32 to vector<16x16xf32>
    %449 = arith.addf %447, %448 : vector<16x16xf32>
    %450 = arith.addf %443, %444 : vector<16x16xf32>
    %cst_120 = arith.constant 5.852250e+01 : f32
    %451 = vector.broadcast %cst_120 : f32 to vector<16x16xf32>
    %452 = arith.addf %450, %451 : vector<16x16xf32>
    %453 = arith.divf %449, %452 : vector<16x16xf32>
    %454 = arith.mulf %453, %453 : vector<16x16xf32>
    %455 = arith.mulf %454, %453 : vector<16x16xf32>
    %456 = arith.mulf %360, %455 : vector<16x16xf32>
    %cst_121 = arith.constant 2.000000e+00 : f32
    %457 = vector.broadcast %cst_121 : f32 to vector<16x16xf32>
    %458 = arith.mulf %457, %442 : vector<16x16xf32>
    %cst_122 = arith.constant 6.502500e+00 : f32
    %459 = vector.broadcast %cst_122 : f32 to vector<16x16xf32>
    %460 = arith.addf %458, %459 : vector<16x16xf32>
    %461 = arith.addf %440, %441 : vector<16x16xf32>
    %cst_123 = arith.constant 6.502500e+00 : f32
    %462 = vector.broadcast %cst_123 : f32 to vector<16x16xf32>
    %463 = arith.addf %461, %462 : vector<16x16xf32>
    %464 = arith.divf %460, %463 : vector<16x16xf32>
    %465 = arith.mulf %434, %434 : vector<16x16xf32>
    %466 = arith.mulf %435, %435 : vector<16x16xf32>
    %467 = arith.mulf %434, %435 : vector<16x16xf32>
    %468 = arith.subf %436, %465 : vector<16x16xf32>
    %469 = arith.subf %437, %466 : vector<16x16xf32>
    %470 = arith.subf %438, %467 : vector<16x16xf32>
    %cst_124 = arith.constant 2.000000e+00 : f32
    %471 = vector.broadcast %cst_124 : f32 to vector<16x16xf32>
    %472 = arith.mulf %471, %470 : vector<16x16xf32>
    %cst_125 = arith.constant 5.852250e+01 : f32
    %473 = vector.broadcast %cst_125 : f32 to vector<16x16xf32>
    %474 = arith.addf %472, %473 : vector<16x16xf32>
    %475 = arith.addf %468, %469 : vector<16x16xf32>
    %cst_126 = arith.constant 5.852250e+01 : f32
    %476 = vector.broadcast %cst_126 : f32 to vector<16x16xf32>
    %477 = arith.addf %475, %476 : vector<16x16xf32>
    %478 = arith.divf %474, %477 : vector<16x16xf32>
    %479 = arith.mulf %478, %478 : vector<16x16xf32>
    %480 = arith.mulf %479, %478 : vector<16x16xf32>
    %481 = arith.mulf %391, %480 : vector<16x16xf32>
    %cst_127 = arith.constant 2.000000e+00 : f32
    %482 = vector.broadcast %cst_127 : f32 to vector<16x16xf32>
    %483 = arith.mulf %482, %467 : vector<16x16xf32>
    %cst_128 = arith.constant 6.502500e+00 : f32
    %484 = vector.broadcast %cst_128 : f32 to vector<16x16xf32>
    %485 = arith.addf %483, %484 : vector<16x16xf32>
    %486 = arith.addf %465, %466 : vector<16x16xf32>
    %cst_129 = arith.constant 6.502500e+00 : f32
    %487 = vector.broadcast %cst_129 : f32 to vector<16x16xf32>
    %488 = arith.addf %486, %487 : vector<16x16xf32>
    %489 = arith.divf %485, %488 : vector<16x16xf32>
    %490 = arith.mulf %464, %464 : vector<16x16xf32>
    %491 = arith.mulf %490, %464 : vector<16x16xf32>
    %492 = arith.mulf %491, %456 : vector<16x16xf32>
    %cst_130 = arith.constant 1.000000e+00 : f32
    %493 = vector.broadcast %cst_130 : f32 to vector<16x16xf32>
    %494 = arith.subf %493, %492 : vector<16x16xf32>
    %cst_131 = arith.constant 5.000000e+00 : f32
    %495 = vector.broadcast %cst_131 : f32 to vector<16x16xf32>
    %496 = arith.mulf %495, %494 : vector<16x16xf32>
    %cst_132 = arith.constant 0.254901975 : f32
    %497 = vector.broadcast %cst_132 : f32 to vector<16x16xf32>
    %498 = arith.mulf %497, %433 : vector<16x16xf32>
    %499 = arith.addf %496, %498 : vector<16x16xf32>
    %500 = arith.mulf %489, %489 : vector<16x16xf32>
    %501 = arith.mulf %500, %489 : vector<16x16xf32>
    %502 = arith.mulf %501, %481 : vector<16x16xf32>
    %cst_133 = arith.constant 1.000000e+00 : f32
    %503 = vector.broadcast %cst_133 : f32 to vector<16x16xf32>
    %504 = arith.subf %503, %502 : vector<16x16xf32>
    %cst_134 = arith.constant 5.000000e+00 : f32
    %505 = vector.broadcast %cst_134 : f32 to vector<16x16xf32>
    %506 = arith.mulf %505, %504 : vector<16x16xf32>
    %cst_135 = arith.constant 0.254901975 : f32
    %507 = vector.broadcast %cst_135 : f32 to vector<16x16xf32>
    %508 = arith.mulf %507, %439 : vector<16x16xf32>
    %509 = arith.addf %506, %508 : vector<16x16xf32>
    %510 = arith.addf %499, %509 : vector<16x16xf32>
    %cst_136 = arith.constant dense<0.000000e+00> : vector<16xf32>
    %511 = vector.multi_reduction <add>, %510, %cst_136 [1] : vector<16x16xf32> to vector<16xf32>
    %512 = vector.shape_cast %511 : vector<16xf32> to vector<16x1xf32>
    %cst_137 = arith.constant dense<0.000000e+00> : vector<1xf32>
    %513 = vector.multi_reduction <add>, %512, %cst_137 [0] : vector<16x1xf32> to vector<1xf32>
    %514 = vector.shape_cast %513 : vector<1xf32> to vector<1x1xf32>
    %c0_138 = arith.constant 0 : index
    %c0_139 = arith.constant 0 : index
    %c0_140 = arith.constant 0 : index
    %515 = vector.load %arg5[%c0_138, %c0_139, %c0_140] : memref<1x1x1xf32, #tpu.memory_space<vmem>>, vector<1x1x1xf32>
    %516 = vector.shape_cast %515 : vector<1x1x1xf32> to vector<1x1xf32>
    %517 = vector.shape_cast %514 : vector<1x1xf32> to vector<1x1x1xf32>
    tpu.vector_store %arg5[%c0_138, %c0_139, %c0_140], %517 {strides = array<i32>} : memref<1x1x1xf32, #tpu.memory_space<vmem>>, vector<1x1x1xf32>,
    return
  }
  func.func @transform_0(%arg0: i32) -> (i32, i32, i32, i32) {
    %c0_i32 = arith.constant 0 : i32
    %c0_i32_0 = arith.constant 0 : i32
    %c0_i32_1 = arith.constant 0 : i32
    %c0_i32_2 = arith.constant 0 : i32
    return %arg0, %c0_i32, %c0_i32_0, %c0_i32_1 : i32, i32, i32, i32
  }
  func.func @transform_1(%arg0: i32) -> (i32, i32, i32, i32) {
    %c0_i32 = arith.constant 0 : i32
    %c0_i32_0 = arith.constant 0 : i32
    %c0_i32_1 = arith.constant 0 : i32
    %c0_i32_2 = arith.constant 0 : i32
    return %arg0, %c0_i32, %c0_i32_0, %c0_i32_1 : i32, i32, i32, i32
  }
  func.func @transform_2(%arg0: i32) -> (i32, i32, i32) {
    %c0_i32 = arith.constant 0 : i32
    %c0_i32_0 = arith.constant 0 : i32
    %c0_i32_1 = arith.constant 0 : i32
    %c0_i32_2 = arith.constant 0 : i32
    return %c0_i32, %c0_i32_0, %c0_i32_1 : i32, i32, i32
  }
  func.func @transform_3(%arg0: i32) -> (i32, i32, i32) {
    %c0_i32 = arith.constant 0 : i32
    %c0_i32_0 = arith.constant 0 : i32
    %c0_i32_1 = arith.constant 0 : i32
    %c0_i32_2 = arith.constant 0 : i32
    return %c0_i32, %c0_i32_0, %c0_i32_1 : i32, i32, i32
  }
  func.func @transform_4(%arg0: i32) -> (i32, i32, i32) {
    %c0_i32 = arith.constant 0 : i32
    %c0_i32_0 = arith.constant 0 : i32
    %c0_i32_1 = arith.constant 0 : i32
    return %arg0, %c0_i32, %c0_i32_0 : i32, i32, i32
  }
}

</mosaic_0001>

<bundles_post_ra>
// kernel: tpu_custom_call.1
= control target key start
LH: loop header
LB: loop body
LE: loop exit
PB: predicated region body
PF: predicated region fallthrough
CT: control target
= control target key end

     0   :  { %9 = vsyncpa [#allocation3], 0  ;;  %s5201_s0 = inlined_call_operand.hbm [shape: f32[2,3,16,16], index: 0, kind: input, shape index: {}]   ;;  %s5202_s1 = inlined_call_operand.hbm [shape: f32[2,3,16,16], index: 1, kind: input, shape index: {}]   ;;  %s5203_s2 = inlined_call_operand.hbm [shape: f32[5,16,16], index: 2, kind: input, shape index: {}]   ;;  %s5204_s3 = inlined_call_operand.hbm [shape: f32[5,16,16], index: 3, kind: input, shape index: {}]   ;;  %s5205_s4 = inlined_call_operand.hbm [shape: f32[1,1,1], index: 4, kind: output, shape index: {}]  }
   0x1   :  { %10 = vsyncpa [#allocation6], 0 }
   0x2   :  { %11 = vsyncpa [#allocation9], 0 }
   0x3   :  { %12 = vsyncpa [#allocation4], 0  ;;  %s4103_s15 = smov [#allocation5]   ;;  %s4104_s17 = smov [#allocation2]  }
   0x4   :  { %s30_s16 = sshll.u32 %s4103_s15, 4  ;;  %s18_s18 = sshll.u32 %s4104_s17, 4  ;;  %s31_s16 = int_to_ptr.vmem [resolvable:$true] %s30_s16  ;;  %s19_s18 = int_to_ptr.vmem [resolvable:$true] %s18_s18 }
   0x5   :  { %s4003_s19 = scalar_lea.vmem %s31_s16, 1536  ;;  %p4008_p1 = scmp.lt.s32.totalorder %s31_s16, %s31_s16 }
   0x6   :  { %p4004_p0 = scmp.ne.s32.totalorder %s31_s16, %s4003_s19  ;;  %p4009_p2 = scmp.lt.s32.totalorder %s4003_s19, %s4003_s19 }
   0x8   :  { %p4010_p3 = por %p4009_p2, %p4008_p1 }
   0xa   :  { %p4011_p4 = pnand %p4010_p3, %p4004_p0 }
   0xc   :  { %4014 = shalt.err (!%p4011_p4)
}
   0xd   :  { %s4105_s20 = smov 128   ;;  %s4106_s21 = smov 8  }
   0xe   :  { %36 = dma.hbm_to_vmem [thread:$0]  %s5202_s1, 1536, %s31_s16, [#allocation6], %s4105_s20, %s4105_s20, %s4106_s21  }
   0xf   :  { %s4023_s24 = scalar_lea.vmem %s19_s18, 1536  ;;  %p4028_p6 = scmp.lt.s32.totalorder %s19_s18, %s19_s18 }
  0x10   :  { %p4024_p5 = scmp.ne.s32.totalorder %s19_s18, %s4023_s24  ;;  %p4029_p7 = scmp.lt.s32.totalorder %s4023_s24, %s4023_s24 }
  0x12   :  { %p4030_p8 = por %p4029_p7, %p4028_p6 }
  0x14   :  { %p4031_p9 = pnand %p4030_p8, %p4024_p5 }
  0x16   :  { %4034 = shalt.err (!%p4031_p9)
}
  0x17   :  { %24 = dma.hbm_to_vmem [thread:$0]  %s5201_s0, 1536, %s19_s18, [#allocation3], %s4105_s20, %s4105_s20, %s4106_s21  }
  0x18   :  { %s4107_s27 = smov [#allocation7]   ;;  %s4108_s29 = smov [#allocation8]  }
  0x19   :  { %s42_s28 = sshll.u32 %s4107_s27, 4  ;;  %s54_s30 = sshll.u32 %s4108_s29, 4  ;;  %s43_s28 = int_to_ptr.vmem [resolvable:$true] %s42_s28  ;;  %s55_s30 = int_to_ptr.vmem [resolvable:$true] %s54_s30 }
  0x1a   :  { %s4043_s1 = scalar_lea.vmem %s43_s28, 1280  ;;  %p4048_p11 = scmp.lt.s32.totalorder %s43_s28, %s43_s28 }
  0x1b   :  { %p4044_p10 = scmp.ne.s32.totalorder %s43_s28, %s4043_s1  ;;  %p4049_p12 = scmp.lt.s32.totalorder %s4043_s1, %s4043_s1 }
  0x1d   :  { %p4050_p13 = por %p4049_p12, %p4048_p11 }
  0x1f   :  { %p4051_p0 = pnand %p4050_p13, %p4044_p10 }
  0x21   :  { %4054 = shalt.err (!%p4051_p0)
}
  0x22   :  { %48 = dma.hbm_to_vmem [thread:$0]  %s5203_s2, 1280, %s43_s28, [#allocation6], %s4105_s20, %s4105_s20, %s4106_s21  }
  0x23   :  { %s4063_s0 = scalar_lea.vmem %s55_s30, 1280  ;;  %p4068_p2 = scmp.lt.s32.totalorder %s55_s30, %s55_s30 }
  0x24   :  { %p4064_p1 = scmp.ne.s32.totalorder %s55_s30, %s4063_s0  ;;  %p4069_p3 = scmp.lt.s32.totalorder %s4063_s0, %s4063_s0 }
  0x26   :  { %p4070_p4 = por %p4069_p3, %p4068_p2 }
  0x28   :  { %p4071_p5 = pnand %p4070_p4, %p4064_p1 }
  0x2a   :  { %4074 = shalt.err (!%p4071_p5)
}
  0x2b   :  { %60 = dma.hbm_to_vmem [thread:$0]  %s5204_s3, 1280, %s55_s30, [#allocation9], %s4105_s20, %s4105_s20, %s4106_s21  }
  0x2c   :  { %4095 = dma.done.wait [#allocation3], 1536  }
  0x2d   :  { %4096 = vsyncadd [#allocation3], 4294965760 }
  0x2e   :  { %4097 = dma.done.wait [#allocation6], 2816  }
  0x2f   :  { %4098 = vsyncadd [#allocation6], 4294964480 }
  0x30   :  { %4099 = dma.done.wait [#allocation9], 1280  }
  0x31   :  { %4100 = vsyncadd [#allocation9], 4294966016  ;;  %v80_v0 = vld [vmem:[#allocation5 + $0x8] sm:$0xff]  ;;  %v79_v2 = vld [vmem:[#allocation5] sm:$0xff]  ;;  %s4109_s2 = smov 16   ;;  %s4110_s3 = smov 48  }
  0x32   :  { %v4167_v1 = vld [vmem:[#allocation2 + $0x8] sm:$0xff]  ;;  %103 = vrot.lane.b32.xlu0 %v80_v0, %s4109_s2  ;;  %101 = vrot.lane.b32.xlu1 %v79_v2, %s4109_s2  ;;  %v84_v3 = vmul.f32 %v80_v0, %v80_v0  ;;  %v4173_v5 = vld [vmem:[#allocation2] sm:$0xff]  ;;  %s4111_s9 = smov 32   ;;  %s4112_s10 = smov 64   ;;  %v83_v8 = vmul.f32 %v79_v2, %v79_v2  ;;  %v89_v9 = vld [vmem:[#allocation2 + $0x38] sm:$0xff]  ;;  %v4115_v14 = vmov 0.0  }
  0x33   :  { %v82_v4 = vmul.f32 %v4167_v1, %v4167_v1  ;;  %v86_v6 = vmul.f32 %v80_v0, %v4167_v1  ;;  %v81_v7 = vmul.f32 %v4173_v5, %v4173_v5  ;;  %s4113_s11 = smov 80   ;;  %v85_v10 = vmul.f32 %v79_v2, %v4173_v5  ;;  %v92_v11 = vld [vmem:[#allocation5 + $0x38] sm:$0xff]  ;;  %s4114_s12 = smov 96   ;;  %v88_v13 = vld [vmem:[#allocation2 + $0x30] sm:$0xff]  ;;  %256 = vmatprep.mubr.f32.mxu0 %v4115_v14  ;;  %v4218_v27 = vld [vmem:[#allocation2 + $0x48] sm:$0xff] }
  0x34   :  { %v98_v12 = vmul.f32 %v92_v11, %v89_v9  ;;  %v94_v15 = vmul.f32 %v89_v9, %v89_v9  ;;  %v91_v16 = vld [vmem:[#allocation5 + $0x30] sm:$0xff]  ;;  %s4116_s13 = smov 112   ;;  %v93_v17 = vmul.f32 %v88_v13, %v88_v13  ;;  %v4192_v19 = vld [vmem:[#allocation2 + $0x18] sm:$0xff]  ;;  %v4206_v25 = vmul.f32 %v92_v11, %v92_v11  ;;  %v4233_v30 = vld [vmem:[#allocation2 + $0x40] sm:$0xff]  ;;  %s4117_s14 = smov [#allocation10]  }
  0x35   :  { %v97_v18 = vmul.f32 %v91_v16, %v88_v13  ;;  %v577_v20 = vld [vmem:[#allocation5 + $0x18] sm:$0xff]  ;;  %v4197_v22 = vld [vmem:[#allocation2 + $0x10] sm:$0xff]  ;;  %v4216_v26 = vmul.f32 %v91_v16, %v91_v16  ;;  %v579_v28 = vmul.f32 %v4192_v19, %v4192_v19  ;;  %v4235_v31 = vld [vmem:[#allocation5 + $0x48] sm:$0xff]  ;;  %v4246_v33 = vmul.f32 %v4218_v27, %v4218_v27  ;;  %s3317_s15 = sshll.u32 %s4117_s14, 4  ;;  %s3318_s15 = int_to_ptr.vmem [resolvable:$true] %s3317_s15 }
  0x36   :  { %119 = vrot.lane.b32.xlu1 %v84_v3, %s4110_s3  ;;  %111 = vrot.lane.b32.xlu0 %v82_v4, %s4111_s9  ;;  %v583_v21 = vmul.f32 %v577_v20, %v4192_v19  ;;  %v576_v23 = vld [vmem:[#allocation5 + $0x10] sm:$0xff]  ;;  %v578_v29 = vmul.f32 %v4197_v22, %v4197_v22  ;;  %v4242_v32 = vmul.f32 %v4235_v31, %v4235_v31  ;;  %v4260_v36 = vld [vmem:[#allocation5 + $0x40] sm:$0xff]  ;;  %vm163_vm0 = vcmask 130048   ;;  %s4075_s16 = scalar_lea.vmem %s3318_s15, 16  ;;  %s4079_s17 = scalar_lea.vmem %s3318_s15, 32 }
  0x37   :  { %v582_v24 = vmul.f32 %v576_v23, %v4197_v22  ;;  %v4254_v34 = vmul.f32 %v4235_v31, %v4218_v27  ;;  %v4258_v35 = vmul.f32 %v4233_v30, %v4233_v30  ;;  %v4268_v37 = vmul.f32 %v4260_v36, %v4260_v36  ;;  %p4076_p6 = scmp.ne.s32.totalorder %s3318_s15, %s4075_s16  ;;  %p4080_p7 = scmp.lt.s32.totalorder %s3318_s15, %s3318_s15 }
  0x38   :  { %v4272_v38 = vmul.f32 %v4260_v36, %v4233_v30  ;;  %v4278_v39 = vmul.f32 %v577_v20, %v577_v20  ;;  %v4290_v40 = vmul.f32 %v576_v23, %v576_v23  ;;  %vm166_vm1 = vcmask 261120   ;;  %p4081_p8 = scmp.lt.s32.totalorder %s4079_s17, %s4075_s16 }
  0x39   :  { %vm169_vm2 = vcmask 392192   ;;  %vm172_vm3 = vcmask 523264   ;;  %vm175_vm4 = vcmask 654336   ;;  %vm178_vm5 = vcmask 785408  }
  0x3a   :  { %127 = vrot.lane.b32.xlu1 %v86_v6, %s4112_s10  ;;  %109 = vrot.lane.b32.xlu0 %v81_v7, %s4111_s9  ;;  %vm181_vm6 = vcmask 916480   ;;  %vm3309_vm7 = vcmask 0   ;;  %p4082_p9 = por %p4081_p8, %p4080_p7 }
  0x3c   :  { %p4083_p10 = pnand %p4082_p9, %p4076_p6 }
  0x3e   :  { %135 = vrot.lane.b32.xlu1 %v89_v9, %s4113_s11  ;;  %117 = vrot.lane.b32.xlu0 %v83_v8, %s4110_s3 }
  0x42   :  { %143 = vrot.lane.b32.xlu1 %v92_v11, %s4114_s12  ;;  %125 = vrot.lane.b32.xlu0 %v85_v10, %s4112_s10 }
  0x46   :  { %133 = vrot.lane.b32.xlu1 %v88_v13, %s4113_s11  ;;  %159 = vrot.lane.b32.xlu0 %v98_v12, %s4109_s2 }
  0x4a   :  { %141 = vrot.lane.b32.xlu1 %v91_v16, %s4114_s12  ;;  %151 = vrot.lane.b32.xlu0 %v94_v15, %s4116_s13 }
  0x4e   :  { %149 = vrot.lane.b32.xlu1 %v93_v17, %s4116_s13  ;;  %157 = vrot.lane.b32.xlu0 %v97_v18, %s4109_s2 }
  0x52   :  { %630 = vrot.lane.b32.xlu1 %v89_v9, %s4111_s9  ;;  %624 = vrot.lane.b32.xlu0 %v583_v21, %s4109_s2  ;;  %v73_v9 = vld [vmem:[#allocation7] sm:$0xff] }
  0x56   :  { %636 = vrot.lane.b32.xlu1 %v92_v11, %s4110_s3  ;;  %622 = vrot.lane.b32.xlu0 %v582_v24, %s4109_s2 }
  0x5a   :  { %642 = vrot.lane.b32.xlu1 %v94_v15, %s4112_s10  ;;  %628 = vrot.lane.b32.xlu0 %v88_v13, %s4111_s9 }
  0x5e   :  { %650 = vrot.lane.b32.xlu1 %v4206_v25, %s4113_s11  ;;  %634 = vrot.lane.b32.xlu0 %v91_v16, %s4110_s3 }
  0x62   :  { %640 = vrot.lane.b32.xlu1 %v93_v17, %s4112_s10  ;;  %600 = vrot.lane.b32.xlu0 %v4192_v19, %s4113_s11 }
  0x66   :  { %608 = vrot.lane.b32.xlu1 %v577_v20, %s4114_s12  ;;  %656 = vrot.lane.b32.xlu0 %v98_v12, %s4114_s12  ;;  %v74_v12 = vld [vmem:[#allocation7 + $0x8] sm:$0xff] }
  0x6a   :  { %664 = vrot.lane.b32.xlu1 %v4218_v27, %s4116_s13  ;;  %648 = vrot.lane.b32.xlu0 %v4216_v26, %s4113_s11 }
  0x6e   :  { %616 = vrot.lane.b32.xlu1 %v579_v28, %s4116_s13  ;;  %598 = vrot.lane.b32.xlu0 %v4197_v22, %s4113_s11 }
  0x72   :  { %606 = vrot.lane.b32.xlu1 %v576_v23, %s4114_s12  ;;  %654 = vrot.lane.b32.xlu0 %v97_v18, %s4114_s12 }
  0x76   :  { %614 = vrot.lane.b32.xlu1 %v578_v29, %s4116_s13  ;;  %662 = vrot.lane.b32.xlu0 %v4233_v30, %s4116_s13 }
  0x7a   :  { %700 = vrot.lane.b32.xlu1 %v4242_v32, %s4111_s9  ;;  %692 = vrot.lane.b32.xlu0 %v4246_v33, %s4109_s2 }
  0x7e   :  { %708 = vrot.lane.b32.xlu1 %v4254_v34, %s4110_s3  ;;  %690 = vrot.lane.b32.xlu0 %v4258_v35, %s4109_s2 }
  0x82   :  { %698 = vrot.lane.b32.xlu0 %v4268_v37, %s4111_s9  ;;  %706 = vrot.lane.b32.xlu1 %v4272_v38, %s4110_s3 }
  0x86   :  { %1411 = vrot.lane.b32.xlu0 %v577_v20, %s4109_s2  ;;  %1425 = vrot.lane.b32.xlu1 %v4278_v39, %s4110_s3 }
  0x8a   :  { %1417 = vrot.lane.b32.xlu0 %v579_v28, %s4111_s9  ;;  %1431 = vrot.lane.b32.xlu1 %v583_v21, %s4112_s10 }
  0x8e   :  { %1409 = vrot.lane.b32.xlu0 %v576_v23, %s4109_s2  ;;  %1437 = vrot.lane.b32.xlu1 %v4218_v27, %s4113_s11 }
  0x92   :  { %1415 = vrot.lane.b32.xlu0 %v578_v29, %s4111_s9  ;;  %1429 = vrot.lane.b32.xlu1 %v582_v24, %s4112_s10 }
  0x96   :  { %1423 = vrot.lane.b32.xlu0 %v4290_v40, %s4110_s3  ;;  %1457 = vrot.lane.b32.xlu1 %v4254_v34, %s4109_s2 }
  0x9a   :  { %1445 = vrot.lane.b32.xlu0 %v4235_v31, %s4114_s12  ;;  %1435 = vrot.lane.b32.xlu1 %v4233_v30, %s4113_s11 }
  0xa4   :  { %v104_v41 = vpop.permute.xlu0 %103  ;;  %v102_v42 = vpop.permute.xlu1 %101 }
  0xa5   :  { %v165_v51 = vsel %vm163_vm0, %v4167_v1, %v104_v41  ;;  %v164_v58 = vsel %vm163_vm0, %v4173_v5, %v102_v42 }
  0xa8   :  { %v120_v43 = vpop.permute.xlu1 %119  ;;  %v112_v44 = vpop.permute.xlu0 %111 }
  0xa9   :  { %v168_v52 = vsel %vm166_vm1, %v165_v51, %v112_v44 }
  0xaa   :  { %v171_v55 = vsel %vm169_vm2, %v168_v52, %v120_v43 }
  0xac   :  { %v128_v45 = vpop.permute.xlu1 %127  ;;  %v110_v46 = vpop.permute.xlu0 %109 }
  0xad   :  { %v174_v57 = vsel %vm172_vm3, %v171_v55, %v128_v45  ;;  %v167_v60 = vsel %vm166_vm1, %v164_v58, %v110_v46 }
  0xb0   :  { %v136_v47 = vpop.permute.xlu1 %135  ;;  %v118_v48 = vpop.permute.xlu0 %117 }
  0xb1   :  { %v177_v59 = vsel %vm175_vm4, %v174_v57, %v136_v47  ;;  %v170_v0 = vsel %vm169_vm2, %v167_v60, %v118_v48 }
  0xb4   :  { %v144_v49 = vpop.permute.xlu1 %143  ;;  %v126_v50 = vpop.permute.xlu0 %125 }
  0xb5   :  { %v180_v61 = vsel %vm178_vm5, %v177_v59, %v144_v49  ;;  %v173_v2 = vsel %vm172_vm3, %v170_v0, %v126_v50  ;;  %v567_v0 = vld [vmem:[#allocation7 + $0x10] sm:$0xff] }
  0xb8   :  { %v134_v53 = vpop.permute.xlu1 %133  ;;  %v160_v54 = vpop.permute.xlu0 %159 }
  0xb9   :  { %v185_v56 = vsel %vm163_vm0, %v4206_v25, %v160_v54  ;;  %v176_v3 = vsel %vm175_vm4, %v173_v2, %v134_v53 }
  0xba   :  { %220 = vmatprep.subr.mxu0 %v185_v56 }
  0xbc   :  { %v142_v62 = vpop.permute.xlu1 %141  ;;  %v152_v63 = vpop.permute.xlu0 %151 }
  0xbd   :  { %v183_v1 = vsel %vm181_vm6, %v180_v61, %v152_v63  ;;  %v179_v4 = vsel %vm178_vm5, %v176_v3, %v142_v62 }
  0xbe   :  { %221 = vmatpush1.msra.mxu0 %v183_v1 }
  0xc0   :  { %v150_v5 = vpop.permute.xlu1 %149  ;;  %v158_v6 = vpop.permute.xlu0 %157 }
  0xc1   :  { %v184_v7 = vsel %vm163_vm0, %v4216_v26, %v158_v6  ;;  %v182_v8 = vsel %vm181_vm6, %v179_v4, %v150_v5  ;;  %v568_v4 = vld [vmem:[#allocation7 + $0x18] sm:$0xff] }
  0xc2   :  { %222 = vmatprep.subr.mxu0 %v184_v7 }
  0xc3   :  { %223 = vmatpush1.msra.mxu0 %v182_v8 }
  0xc4   :  { %v631_v10 = vpop.permute.xlu1 %630  ;;  %v625_v11 = vpop.permute.xlu0 %624  ;;  %3328 = vmatmul.mubr.msk.f32.vlgmr.msra.gmra.mxu0 %vm163_vm0, %v73_v9 }
  0xc5   :  { %262 = vmatprep.mubr.f32.mxu0 %v4115_v14  ;;  %v675_v24 = vsel %vm163_vm0, %v4278_v39, %v625_v11 }
  0xc6   :  { %v677_v25 = vsel %vm166_vm1, %v675_v24, %v631_v10 }
  0xc8   :  { %v637_v13 = vpop.permute.xlu1 %636  ;;  %v623_v15 = vpop.permute.xlu0 %622  ;;  %3329 = vmatmul.mubr.msk.f32.gmra.mxu0 %vm163_vm0, %v74_v12 }
  0xc9   :  { %788 = vmatprep.mubr.f32.mxu0 %v4115_v14  ;;  %v679_v29 = vsel %vm169_vm2, %v677_v25, %v637_v13  ;;  %v674_v51 = vsel %vm163_vm0, %v4290_v40, %v623_v15  ;;  %v76_v15 = vld [vmem:[#allocation8 + $0x8] sm:$0xff] }
  0xca   :  { %3648 = vmatprep.subr.mxu1 %v76_v15 }
  0xcb   :  { %3649 = vmatpush3.msra.mxu1 %v76_v15 }
  0xcc   :  { %v643_v16 = vpop.permute.xlu1 %642  ;;  %v629_v17 = vpop.permute.xlu0 %628 }
  0xcd   :  { %v681_v41 = vsel %vm172_vm3, %v679_v29, %v643_v16  ;;  %v676_v52 = vsel %vm166_vm1, %v674_v51, %v629_v17  ;;  %v75_v16 = vld [vmem:[#allocation8] sm:$0xff]  ;;  %v571_v17 = vld [vmem:[#allocation8 + $0x18] sm:$0xff]  ;;  %v4437_v51 = vld [vmem:[#allocation2 + $0x20] sm:$0xff] }
  0xce   :  { %3650 = vmatprep.subr.mxu1 %v75_v16 }
  0xcf   :  { %3651 = vmatpush3.msra.mxu1 %v75_v16 }
  0xd0   :  { %v651_v18 = vpop.permute.xlu1 %650  ;;  %v635_v20 = vpop.permute.xlu0 %634  ;;  %3898 = vmatprep.subr.mxu1 %v571_v17 }
  0xd1   :  { %v683_v42 = vsel %vm175_vm4, %v681_v41, %v651_v18  ;;  %v678_v55 = vsel %vm169_vm2, %v676_v52, %v635_v20  ;;  %v570_v18 = vld [vmem:[#allocation8 + $0x10] sm:$0xff] }
  0xd2   :  { %v4439_v52 = vld [vmem:[#allocation5 + $0x20] sm:$0xff] }
  0xd4   :  { %v641_v21 = vpop.permute.xlu1 %640  ;;  %v601_v23 = vpop.permute.xlu0 %600 }
  0xd5   :  { %v669_v47 = vsel %vm175_vm4, %v174_v57, %v601_v23  ;;  %v680_v56 = vsel %vm172_vm3, %v678_v55, %v641_v21 }
  0xd8   :  { %v609_v26 = vpop.permute.xlu1 %608  ;;  %v657_v28 = vpop.permute.xlu0 %656 }
  0xd9   :  { %v685_v43 = vsel %vm178_vm5, %v683_v42, %v657_v28  ;;  %v671_v39 = vsel %vm178_vm5, %v669_v47, %v609_v26 }
  0xdc   :  { %v665_v44 = vpop.permute.xlu1 %664  ;;  %v649_v45 = vpop.permute.xlu0 %648 }
  0xdd   :  { %v687_v46 = vsel %vm181_vm6, %v685_v43, %v665_v44  ;;  %v682_v57 = vsel %vm175_vm4, %v680_v56, %v649_v45 }
  0xde   :  { %752 = vmatprep.subr.mxu0 %v687_v46 }
  0xe0   :  { %v617_v48 = vpop.permute.xlu1 %616  ;;  %v599_v49 = vpop.permute.xlu0 %598 }
  0xe1   :  { %v673_v50 = vsel %vm181_vm6, %v671_v39, %v617_v48  ;;  %v668_v58 = vsel %vm175_vm4, %v173_v2, %v599_v49  ;;  %v4425_v48 = vld [vmem:[#allocation2 + $0x28] sm:$0xff] }
  0xe2   :  { %753 = vmatpush1.msra.mxu0 %v673_v50  ;;  %v4427_v49 = vld [vmem:[#allocation5 + $0x28] sm:$0xff] }
  0xe3   :  { %v4435_v50 = vmul.f32 %v4427_v49, %v4425_v48 }
  0xe4   :  { %v607_v53 = vpop.permute.xlu1 %606  ;;  %v655_v54 = vpop.permute.xlu0 %654 }
  0xe5   :  { %v670_v59 = vsel %vm178_vm5, %v668_v58, %v607_v53  ;;  %v684_v60 = vsel %vm178_vm5, %v682_v57, %v655_v54  ;;  %v4447_v53 = vmul.f32 %v4439_v52, %v4437_v51  ;;  %v4493_v57 = vld [vmem:[#allocation2 + $0x50] sm:$0xff] }
  0xe8   :  { %v615_v61 = vpop.permute.xlu1 %614  ;;  %v663_v62 = vpop.permute.xlu0 %662 }
  0xe9   :  { %v672_v40 = vsel %vm181_vm6, %v670_v59, %v615_v61  ;;  %v686_v63 = vsel %vm181_vm6, %v684_v60, %v663_v62 }
  0xea   :  { %754 = vmatprep.subr.mxu0 %v686_v63 }
  0xeb   :  { %755 = vmatpush1.msra.mxu0 %v672_v40 }
  0xec   :  { %v701_v1 = vpop.permute.xlu1 %700  ;;  %v693_v3 = vpop.permute.xlu0 %692  ;;  %3350 = vmatmul.mubr.msk.f32.vlgmr.msra.gmra.mxu0 %vm163_vm0, %v567_v0 }
  0xed   :  { %v713_v2 = vsel %vm163_vm0, %v4235_v31, %v693_v3  ;;  %794 = vmatprep.mubr.f32.mxu0 %v4115_v14 }
  0xee   :  { %v715_v7 = vsel %vm166_vm1, %v713_v2, %v701_v1 }
  0xf0   :  { %v709_v5 = vpop.permute.xlu1 %708  ;;  %v691_v6 = vpop.permute.xlu0 %690  ;;  %3351 = vmatmul.mubr.msk.f32.gmra.mxu0 %vm163_vm0, %v568_v4 }
  0xf1   :  { %v717_v8 = vsel %vm169_vm2, %v715_v7, %v709_v5  ;;  %3686 = vmatprep.mubr.msk.f32.mxu0 %vm163_vm0, %v567_v0  ;;  %v712_v9 = vsel %vm163_vm0, %v4260_v36, %v691_v6 }
  0xf2   :  { %3682 = vmatprep.subr.mxu0 %v717_v8 }
  0xf3   :  { %3683 = vmatpush3.msra.mxu0 %v717_v8 }
  0xf4   :  { %v699_v10 = vpop.permute.xlu0 %698  ;;  %v707_v11 = vpop.permute.xlu1 %706 }
  0xf5   :  { %v714_v12 = vsel %vm166_vm1, %v712_v9, %v699_v10 }
  0xf6   :  { %v716_v13 = vsel %vm169_vm2, %v714_v12, %v707_v11 }
  0xf7   :  { %3684 = vmatprep.subr.mxu0 %v716_v13 }
  0xf8   :  { %3685 = vmatpush3.msra.mxu0 %v716_v13  ;;  %v4359_v20 = vpop.permute.xlu1 %1425  ;;  %v1412_v54 = vpop.permute.xlu0 %1411 }
  0xf9   :  { %3687 = vmatmul.mubr.msk.f32.vlgmr.msra.gmra.mxu0 %vm163_vm0, %v568_v4  ;;  %3689 = vmatprep.subr.mxu0 %v571_v17  ;;  %v1462_v9 = vsel %vm163_vm0, %v4192_v19, %v1412_v54 }
  0xfa   :  { %3690 = vmatpush3.msra.mxu0 %v571_v17 }
  0xfb   :  { %3691 = vmatprep.subr.mxu0 %v570_v18 }
  0xfc   :  { %3692 = vmatpush3.msra.mxu0 %v570_v18  ;;  %v4361_v21 = vpop.permute.xlu1 %1431  ;;  %v1418_v55 = vpop.permute.xlu0 %1417 }
  0xfd   :  { %v1464_v10 = vsel %vm166_vm1, %v1462_v9, %v1418_v55 }
  0xfe   :  { %v1466_v11 = vsel %vm169_vm2, %v1464_v10, %v4359_v20 }
  0xff   :  { %v4526_v15 = vsel %vm172_vm3, %v1466_v11, %v4361_v21 }
 0x100   :  { %v4363_v23 = vpop.permute.xlu1 %1437 }
 0x101   :  { %v1470_v19 = vsel %vm175_vm4, %v4526_v15, %v4363_v23 }
 0x104   :  { %v4367_v25 = vpop.permute.xlu1 %1429 }
 0x108   :  { %v1458_v29 = vpop.permute.xlu1 %1457 }
 0x109   :  { %v1476_v41 = vsel %vm163_vm0, %v4242_v32, %v1458_v29 }
 0x10c   :  { %v4495_v58 = vpop.permute.xlu1 %1435 }
 0x184   :  { %v258_v24 = vpop.f32.mrf.mxu0 }
 0x185   :  { %271 = vrot.lane.b32.xlu0 %v258_v24, %s4116_s13  ;;  %3652 = vmatprep.mubr.msk.f32.mxu1 %vm163_vm0, %v258_v24 }
 0x186   :  { %v4369_v26 = vpop.f32.mrf.mxu0 }
 0x188   :  { %v264_v28 = vpop.f32.mrf.mxu0 }
 0x189   :  { %275 = vrot.lane.b32.xlu0 %v258_v24, %s4114_s12  ;;  %273 = vrot.lane.b32.xlu1 %v264_v28, %s4116_s13 }
 0x18a   :  { %3653 = vmatmul.mubr.msk.f32.vlgmr.msra.gmra.mxu1 %vm163_vm0, %v264_v28  ;;  %v4389_v42 = vpop.f32.mrf.mxu0 }
 0x18b   :  { %3900 = vmatpush3.msra.mxu1 %v571_v17 }
 0x18c   :  { %3899 = vmatprep.subr.mxu1 %v570_v18 }
 0x18d   :  { %279 = vrot.lane.b32.xlu0 %v258_v24, %s4113_s11  ;;  %277 = vrot.lane.b32.xlu1 %v264_v28, %s4114_s12 }
 0x18e   :  { %3901 = vmatpush3.msra.mxu1 %v570_v18 }
 0x18f   :  { %1511 = vmatprep.subr.mxu1 %v1476_v41 }
 0x191   :  { %283 = vrot.lane.b32.xlu0 %v258_v24, %s4112_s10  ;;  %281 = vrot.lane.b32.xlu1 %v264_v28, %s4113_s11 }
 0x195   :  { %287 = vrot.lane.b32.xlu0 %v258_v24, %s4110_s3  ;;  %285 = vrot.lane.b32.xlu1 %v264_v28, %s4112_s10 }
 0x199   :  { %291 = vrot.lane.b32.xlu0 %v258_v24, %s4111_s9  ;;  %289 = vrot.lane.b32.xlu1 %v264_v28, %s4110_s3 }
 0x19d   :  { %295 = vrot.lane.b32.xlu0 %v258_v24, %s4109_s2  ;;  %293 = vrot.lane.b32.xlu1 %v264_v28, %s4111_s9 }
 0x1a1   :  { %301 = vrot.lane.b32.xlu0 %v4369_v26, %s4116_s13  ;;  %297 = vrot.lane.b32.xlu1 %v264_v28, %s4109_s2 }
 0x1a5   :  { %303 = vrot.lane.b32.xlu1 %v4389_v42, %s4116_s13 }
 0x1ac   :  { %v4393_v43 = vpop.f32.mrf.mxu0 }
 0x1ad   :  { %3693 = vmatprep.mubr.msk.f32.mxu0 %vm163_vm0, %v4393_v43 }
 0x1ae   :  { %v4397_v44 = vpop.f32.mrf.mxu0 }
 0x1b0   :  { %v4399_v45 = vpop.f32.mrf.mxu0 }
 0x1b1   :  { %3694 = vmatmul.mubr.msk.f32.vlgmr.msra.gmra.mxu0 %vm163_vm0, %v4399_v45 }
 0x1b2   :  { %v4403_v46 = vpop.f32.mrf.mxu0 }
 0x1b9   :  { %v4405_v47 = vpop.f32.mrf.mxu0 }
 0x1ba   :  { %948 = vrot.lane.b32.xlu0 %v4405_v47, %s4113_s11  ;;  %940 = vrot.lane.b32.xlu1 %v4405_v47, %s4116_s13 }
 0x1bb   :  { %v4411_v39 = vpop.f32.mrf.mxu0 }
 0x1be   :  { %944 = vrot.lane.b32.xlu1 %v4405_v47, %s4114_s12  ;;  %938 = vrot.lane.b32.xlu0 %v4411_v39, %s4116_s13 }
 0x1c2   :  { %942 = vrot.lane.b32.xlu1 %v4411_v39, %s4114_s12  ;;  %1451 = vrot.lane.b32.xlu0 %v4246_v33, %s4116_s13 }
 0x1c6   :  { %1443 = vrot.lane.b32.xlu1 %v4260_v36, %s4114_s12  ;;  %946 = vrot.lane.b32.xlu0 %v4411_v39, %s4113_s11 }
 0x1ca   :  { %1449 = vrot.lane.b32.xlu1 %v4258_v35, %s4116_s13  ;;  %1455 = vrot.lane.b32.xlu0 %v4272_v38, %s4109_s2 }
 0x1ce   :  { %1919 = vrot.lane.b32.xlu0 %v4435_v50, %s4109_s2  ;;  %1925 = vrot.lane.b32.xlu1 %v4218_v27, %s4111_s9  ;;  %v1410_v27 = vpop.permute.xlu0 %1409 }
 0x1cf   :  { %v1461_v16 = vsel %vm163_vm0, %v4197_v22, %v1410_v27 }
 0x1d2   :  { %1917 = vrot.lane.b32.xlu0 %v4447_v53, %s4109_s2  ;;  %1931 = vrot.lane.b32.xlu1 %v4235_v31, %s4110_s3 }
 0x1d6   :  { %1923 = vrot.lane.b32.xlu0 %v4233_v30, %s4111_s9  ;;  %1937 = vrot.lane.b32.xlu1 %v4246_v33, %s4112_s10  ;;  %v4471_v30 = vmul.f32 %v4425_v48, %v4425_v48  ;;  %v1416_v33 = vpop.permute.xlu0 %1415 }
 0x1d7   :  { %v1463_v24 = vsel %vm166_vm1, %v1461_v16, %v1416_v33  ;;  %v1407_v16 = vld [vmem:[#allocation8 + $0x20] sm:$0xff] }
 0x1da   :  { %1929 = vrot.lane.b32.xlu0 %v4260_v36, %s4110_s3  ;;  %1943 = vrot.lane.b32.xlu1 %v4242_v32, %s4113_s11  ;;  %v4477_v32 = vld [vmem:[#allocation2 + $0x58] sm:$0xff] }
 0x1de   :  { %1895 = vrot.lane.b32.xlu0 %v4425_v48, %s4113_s11  ;;  %1935 = vrot.lane.b32.xlu1 %v4258_v35, %s4112_s10  ;;  %v1424_v35 = vpop.permute.xlu0 %1423 }
 0x1df   :  { %v1465_v28 = vsel %vm169_vm2, %v1463_v24, %v1424_v35  ;;  %v1404_v35 = vld [vmem:[#allocation7 + $0x20] sm:$0xff] }
 0x1e0   :  { %v4543_v23 = vsel %vm172_vm3, %v1465_v28, %v4367_v25 }
 0x1e2   :  { %1949 = vrot.lane.b32.xlu0 %v4254_v34, %s4114_s12  ;;  %1941 = vrot.lane.b32.xlu1 %v4268_v37, %s4113_s11  ;;  %v4485_v34 = vmul.f32 %v4437_v51, %v4437_v51  ;;  %v1446_v56 = vpop.permute.xlu0 %1445 }
 0x1e3   :  { %v1472_v20 = vsel %vm178_vm5, %v1470_v19, %v1446_v56  ;;  %v1405_v56 = vld [vmem:[#allocation7 + $0x28] sm:$0xff] }
 0x1e6   :  { %1903 = vrot.lane.b32.xlu0 %v4427_v49, %s4114_s12  ;;  %1911 = vrot.lane.b32.xlu1 %v4471_v30, %s4116_s13 }
 0x1ea   :  { %1957 = vrot.lane.b32.xlu0 %v4477_v32, %s4116_s13  ;;  %1901 = vrot.lane.b32.xlu1 %v4439_v52, %s4114_s12 }
 0x1ee   :  { %1893 = vrot.lane.b32.xlu0 %v4437_v51, %s4113_s11  ;;  %1909 = vrot.lane.b32.xlu1 %v4485_v34, %s4116_s13 }
 0x1f2   :  { %1947 = vrot.lane.b32.xlu0 %v4272_v38, %s4114_s12 }
 0x1f6   :  { %1955 = vrot.lane.b32.xlu0 %v4493_v57, %s4116_s13 }
 0x1f7   :  { %v272_v59 = vpop.permute.xlu0 %271 }
 0x1f8   :  { %3655 = vmatprep.mubr.msk.f32.mxu1 %vm163_vm0, %v272_v59 }
 0x1fb   :  { %v276_v60 = vpop.permute.xlu0 %275  ;;  %v274_v61 = vpop.permute.xlu1 %273 }
 0x1fc   :  { %3656 = vmatmul.mubr.msk.f32.gmra.mxu1 %vm163_vm0, %v274_v61 }
 0x1fd   :  { %3658 = vmatprep.mubr.msk.f32.mxu1 %vm163_vm0, %v276_v60 }
 0x1ff   :  { %v280_v62 = vpop.permute.xlu0 %279  ;;  %v278_v40 = vpop.permute.xlu1 %277 }
 0x200   :  { %3659 = vmatmul.mubr.msk.f32.gmra.mxu1 %vm163_vm0, %v278_v40 }
 0x201   :  { %3661 = vmatprep.mubr.msk.f32.mxu1 %vm163_vm0, %v280_v62 }
 0x203   :  { %v284_v38 = vpop.permute.xlu0 %283  ;;  %v282_v63 = vpop.permute.xlu1 %281 }
 0x204   :  { %3662 = vmatmul.mubr.msk.f32.gmra.mxu1 %vm163_vm0, %v282_v63 }
 0x205   :  { %3664 = vmatprep.mubr.msk.f32.mxu1 %vm163_vm0, %v284_v38 }
 0x207   :  { %v288_v0 = vpop.permute.xlu0 %287  ;;  %v286_v1 = vpop.permute.xlu1 %285 }
 0x208   :  { %3665 = vmatmul.mubr.msk.f32.gmra.mxu1 %vm163_vm0, %v286_v1 }
 0x209   :  { %3667 = vmatprep.mubr.msk.f32.mxu1 %vm163_vm0, %v288_v0 }
 0x20b   :  { %v292_v3 = vpop.permute.xlu0 %291  ;;  %v290_v2 = vpop.permute.xlu1 %289 }
 0x20c   :  { %3668 = vmatmul.mubr.msk.f32.gmra.mxu1 %vm163_vm0, %v290_v2 }
 0x20d   :  { %3670 = vmatprep.mubr.msk.f32.mxu1 %vm163_vm0, %v292_v3 }
 0x20f   :  { %v296_v4 = vpop.permute.xlu0 %295  ;;  %v294_v5 = vpop.permute.xlu1 %293 }
 0x210   :  { %3671 = vmatmul.mubr.msk.f32.gmra.mxu1 %vm163_vm0, %v294_v5  ;;  %v4578_v5 = vmul.f32 %v4477_v32, %v4477_v32 }
 0x211   :  { %3673 = vmatprep.mubr.msk.f32.mxu1 %vm163_vm0, %v296_v4  ;;  %v4574_v4 = vld [vmem:[#allocation5 + $0x58] sm:$0xff] }
 0x212   :  { %1985 = vrot.lane.b32.xlu0 %v4578_v5, %s4109_s2 }
 0x213   :  { %v298_v6 = vpop.permute.xlu1 %297  ;;  %v302_v7 = vpop.permute.xlu0 %301 }
 0x214   :  { %3674 = vmatmul.mubr.msk.f32.gmra.mxu1 %vm163_vm0, %v298_v6  ;;  %v4582_v6 = vmul.f32 %v4574_v4, %v4574_v4 }
 0x215   :  { %3676 = vmatprep.mubr.msk.f32.mxu1 %vm163_vm0, %v4369_v26 }
 0x216   :  { %1993 = vrot.lane.b32.xlu1 %v4582_v6, %s4111_s9 }
 0x217   :  { %v304_v8 = vpop.permute.xlu1 %303 }
 0x218   :  { %3677 = vmatmul.mubr.msk.f32.gmra.mxu1 %vm163_vm0, %v4389_v42  ;;  %v1469_v42 = vsel %vm175_vm4, %v4543_v23, %v4495_v58 }
 0x219   :  { %3679 = vmatprep.mubr.msk.f32.mxu1 %vm163_vm0, %v302_v7 }
 0x21c   :  { %3680 = vmatmul.mubr.msk.f32.gmra.mxu1 %vm163_vm0, %v304_v8  ;;  %v4591_v8 = vmul.f32 %v4493_v57, %v4493_v57 }
 0x21e   :  { %1983 = vrot.lane.b32.xlu1 %v4591_v8, %s4109_s2 }
 0x22c   :  { %v949_v12 = vpop.permute.xlu0 %948  ;;  %v941_v13 = vpop.permute.xlu1 %940 }
 0x230   :  { %v945_v17 = vpop.permute.xlu1 %944  ;;  %v939_v18 = vpop.permute.xlu0 %938 }
 0x231   :  { %3744 = vmatprep.mubr.msk.f32.mxu1 %vm163_vm0, %v939_v18 }
 0x232   :  { %3745 = vmatmul.mubr.msk.f32.vlgmr.msra.gmra.mxu1 %vm163_vm0, %v941_v13 }
 0x234   :  { %v943_v26 = vpop.permute.xlu1 %942  ;;  %v1452_v21 = vpop.permute.xlu0 %1451 }
 0x235   :  { %v1474_v22 = vsel %vm181_vm6, %v1472_v20, %v1452_v21  ;;  %3747 = vmatprep.mubr.msk.f32.mxu1 %vm163_vm0, %v943_v26 }
 0x236   :  { %3748 = vmatmul.mubr.msk.f32.gmra.mxu1 %vm163_vm0, %v945_v17 }
 0x237   :  { %1512 = vmatpush1.msra.mxu1 %v1474_v22 }
 0x238   :  { %v1444_v29 = vpop.permute.xlu1 %1443  ;;  %v947_v41 = vpop.permute.xlu0 %946 }
 0x239   :  { %3750 = vmatprep.mubr.msk.f32.mxu1 %vm163_vm0, %v947_v41  ;;  %v1471_v54 = vsel %vm178_vm5, %v1469_v42, %v1444_v29 }
 0x23a   :  { %3751 = vmatmul.mubr.msk.f32.gmra.mxu1 %vm163_vm0, %v949_v12  ;;  %v1408_v12 = vld [vmem:[#allocation8 + $0x28] sm:$0xff] }
 0x23b   :  { %1547 = vmatprep.mubr.f32.mxu1 %v4115_v14 }
 0x23c   :  { %v1450_v55 = vpop.permute.xlu1 %1449  ;;  %v1456_v27 = vpop.permute.xlu0 %1455 }
 0x23d   :  { %v1473_v33 = vsel %vm181_vm6, %v1471_v54, %v1450_v55  ;;  %v1475_v25 = vsel %vm163_vm0, %v4268_v37, %v1456_v27  ;;  %v4566_v37 = vmul.f32 %v4427_v49, %v4427_v49 }
 0x23e   :  { %1513 = vmatprep.subr.mxu1 %v1475_v25 }
 0x23f   :  { %1514 = vmatpush1.msra.mxu1 %v1473_v33 }
 0x240   :  { %3394 = vmatmul.mubr.msk.f32.vlgmr.msra.gmra.mxu1 %vm163_vm0, %v1404_v35  ;;  %v1920_v58 = vpop.permute.xlu0 %1919  ;;  %v1926_v61 = vpop.permute.xlu1 %1925  ;;  %3753 = vmatprep.subr.mxu1 %v1408_v12 }
 0x241   :  { %1553 = vmatprep.mubr.f32.mxu1 %v4115_v14  ;;  %v1968_v63 = vsel %vm163_vm0, %v4566_v37, %v1920_v58  ;;  %3754 = vmatpush3.msra.mxu1 %v1408_v12 }
 0x242   :  { %v1970_v0 = vsel %vm166_vm1, %v1968_v63, %v1926_v61  ;;  %3755 = vmatprep.subr.mxu1 %v1407_v16 }
 0x243   :  { %3756 = vmatpush3.msra.mxu1 %v1407_v16 }
 0x244   :  { %3395 = vmatmul.mubr.msk.f32.gmra.mxu1 %vm163_vm0, %v1405_v56  ;;  %v4558_v59 = vpop.permute.xlu0 %1917  ;;  %v1932_v40 = vpop.permute.xlu1 %1931 }
 0x245   :  { %v1972_v2 = vsel %vm169_vm2, %v1970_v0, %v1932_v40 }
 0x248   :  { %v4560_v60 = vpop.permute.xlu0 %1923  ;;  %v1938_v1 = vpop.permute.xlu1 %1937 }
 0x249   :  { %v1974_v7 = vsel %vm172_vm3, %v1972_v2, %v1938_v1 }
 0x24a   :  { %v3654_v19 = vpop.f32.mrf.mxu1 }
 0x24b   :  { %v511_v29 = vmul.f32 %v3654_v19, %v3654_v19 }
 0x24c   :  { %v4562_v62 = vpop.permute.xlu0 %1929  ;;  %v1944_v9 = vpop.permute.xlu1 %1943 }
 0x24d   :  { %v1976_v11 = vsel %vm175_vm4, %v1974_v7, %v1944_v9  ;;  %v411_v24 = vpop.f32.mrf.mxu1 }
 0x24e   :  { %v510_v54 = vmul.f32 %v411_v24, %v411_v24 }
 0x250   :  { %v4568_v38 = vpop.permute.xlu0 %1895 }
 0x254   :  { %v1950_v3 = vpop.permute.xlu0 %1949 }
 0x255   :  { %v1978_v13 = vsel %vm178_vm5, %v1976_v11, %v1950_v3 }
 0x258   :  { %v4593_v10 = vpop.permute.xlu0 %1903 }
 0x25c   :  { %v1958_v17 = vpop.permute.xlu0 %1957 }
 0x25d   :  { %v1980_v18 = vsel %vm181_vm6, %v1978_v13, %v1958_v17 }
 0x25e   :  { %2045 = vmatprep.subr.mxu1 %v1980_v18 }
 0x2bc   :  { %v3657_v20 = vpop.f32.mrf.mxu1 }
 0x2bd   :  { %v513_v28 = vmul.f32 %v3657_v20, %v3657_v20  ;;  %v515_v25 = vmul.f32 %v3657_v20, %v3654_v19 }
 0x2be   :  { %v421_v26 = vpop.f32.mrf.mxu1 }
 0x2bf   :  { %v512_v41 = vmul.f32 %v421_v26, %v421_v26  ;;  %v514_v40 = vmul.f32 %v421_v26, %v411_v24 }
 0x2c0   :  { %v3660_v21 = vpop.f32.mrf.mxu1 }
 0x2c1   :  { %v517_v55 = vsub.f32 %v3660_v21, %v511_v29 }
 0x2c2   :  { %v431_v22 = vpop.f32.mrf.mxu1 }
 0x2c3   :  { %v516_v35 = vsub.f32 %v431_v22, %v510_v54 }
 0x2c4   :  { %v3663_v42 = vpop.f32.mrf.mxu1 }
 0x2c5   :  { %v519_v27 = vsub.f32 %v3663_v42, %v513_v28 }
 0x2c6   :  { %v441_v33 = vpop.f32.mrf.mxu1 }
 0x2c7   :  { %v527_v56 = vadd.f32 %v519_v27, %v517_v55  ;;  %v518_v58 = vsub.f32 %v441_v33, %v512_v41 }
 0x2c8   :  { %v3666_v61 = vpop.f32.mrf.mxu1 }
 0x2c9   :  { %v529_v63 = vadd.f32 58.5225, %v527_v56  ;;  %v526_v0 = vadd.f32 %v518_v58, %v516_v35  ;;  %v521_v1 = vsub.f32 %v3666_v61, %v515_v25 }
 0x2ca   :  { %v451_v3 = vpop.f32.mrf.mxu1 }
 0x2cb   :  { %3917 = vrcp.f32 %v529_v63  ;;  %v528_v2 = vadd.f32 58.5225, %v526_v0  ;;  %v520_v7 = vsub.f32 %v451_v3, %v514_v40  ;;  %v523_v17 = vmul.f32 2.0, %v521_v1 }
 0x2cc   :  { %v3669_v9 = vpop.f32.mrf.mxu1 }
 0x2cd   :  { %3919 = vrcp.f32 %v528_v2  ;;  %v539_v18 = vmul.f32 %v3669_v9, %v3669_v9  ;;  %v522_v21 = vmul.f32 2.0, %v520_v7  ;;  %v525_v22 = vadd.f32 58.5225, %v523_v17 }
 0x2ce   :  { %v461_v11 = vpop.f32.mrf.mxu1 }
 0x2cf   :  { %v538_v28 = vmul.f32 %v461_v11, %v461_v11  ;;  %v524_v27 = vadd.f32 58.5225, %v522_v21 }
 0x2d0   :  { %v3672_v12 = vpop.f32.mrf.mxu1 }
 0x2d1   :  { %v543_v13 = vmul.f32 %v3672_v12, %v3669_v9  ;;  %v541_v29 = vmul.f32 %v3672_v12, %v3672_v12 }
 0x2d2   :  { %v471_v16 = vpop.f32.mrf.mxu1 }
 0x2d3   :  { %v542_v19 = vmul.f32 %v471_v16, %v461_v11  ;;  %v540_v33 = vmul.f32 %v471_v16, %v471_v16 }
 0x2d4   :  { %v3675_v20 = vpop.f32.mrf.mxu1 }
 0x2d5   :  { %v545_v24 = vsub.f32 %v3675_v20, %v539_v18  ;;  %v1936_v18 = vpop.permute.xlu1 %1935 }
 0x2d6   :  { %v481_v26 = vpop.f32.mrf.mxu1 }
 0x2d7   :  { %v544_v41 = vsub.f32 %v481_v26, %v538_v28 }
 0x2d8   :  { %v3918_v42 = vpop.eup %3917  ;;  %v3678_v54 = vpop.f32.mrf.mxu1 }
 0x2d9   :  { %v4600_v55 = vmul.f32 %v3918_v42, %v525_v22  ;;  %v547_v25 = vsub.f32 %v3678_v54, %v541_v29  ;;  %v1894_v54 = vpop.permute.xlu0 %1893 }
 0x2da   :  { %v3920_v35 = vpop.eup %3919  ;;  %v491_v56 = vpop.f32.mrf.mxu1 }
 0x2db   :  { %v4602_v58 = vmul.f32 %v3920_v35, %v524_v27  ;;  %v555_v61 = vadd.f32 %v547_v25, %v545_v24  ;;  %v546_v40 = vsub.f32 %v491_v56, %v540_v33  ;;  %v4608_v24 = vmul.f32 %v4439_v52, %v4439_v52 }
 0x2dc   :  { %v3681_v63 = vpop.f32.mrf.mxu1 }
 0x2dd   :  { %v557_v0 = vadd.f32 58.5225, %v555_v61  ;;  %v554_v1 = vadd.f32 %v546_v40, %v544_v41  ;;  %v549_v3 = vsub.f32 %v3681_v63, %v543_v13  ;;  %v1967_v13 = vsel %vm163_vm0, %v4608_v24, %v4558_v59  ;;  %v1948_v56 = vpop.permute.xlu0 %1947 }
 0x2de   :  { %v501_v2 = vpop.f32.mrf.mxu1  ;;  %v1969_v41 = vsel %vm166_vm1, %v1967_v13, %v4560_v60  ;;  %v3983_v13 = vld [vmem:[#allocation2 + $0x18] sm:$0xff] }
 0x2df   :  { %3921 = vrcp.f32 %v557_v0  ;;  %v556_v7 = vadd.f32 58.5225, %v554_v1  ;;  %v548_v9 = vsub.f32 %v501_v2, %v542_v19  ;;  %v551_v11 = vmul.f32 2.0, %v549_v3  ;;  %v1942_v19 = vpop.permute.xlu1 %1941 }
 0x2e0   :  { %v1971_v27 = vsel %vm169_vm2, %v1969_v41, %v4562_v62  ;;  %v1962_v0 = vsel %vm175_vm4, %v4526_v15, %v4568_v38  ;;  %v1961_v62 = vsel %vm175_vm4, %v4543_v23, %v1894_v54 }
 0x2e1   :  { %3923 = vrcp.f32 %v556_v7  ;;  %v550_v12 = vmul.f32 2.0, %v548_v9  ;;  %v553_v17 = vadd.f32 58.5225, %v551_v11  ;;  %v1973_v59 = vsel %vm172_vm3, %v1971_v27, %v1936_v18  ;;  %v1956_v3 = vpop.permute.xlu0 %1955  ;;  %v3981_v18 = vld [vmem:[#allocation5 + $0x8] sm:$0xff] }
 0x2e2   :  { %v1975_v61 = vsel %vm175_vm4, %v1973_v59, %v1942_v19  ;;  %v1964_v2 = vsel %vm178_vm5, %v1962_v0, %v4593_v10  ;;  %v3984_v19 = vld [vmem:[#allocation5 + $0x18] sm:$0xff]  ;;  %v3987_v0 = vld [vmem:[#allocation2 + $0x10] sm:$0xff] }
 0x2e3   :  { %v552_v21 = vadd.f32 58.5225, %v550_v12  ;;  %v1912_v33 = vpop.permute.xlu1 %1911  ;;  %v1977_v1 = vsel %vm178_vm5, %v1975_v61, %v1948_v56  ;;  %v1890_v12 = vmul.f32 %v4574_v4, %v4477_v32  ;;  %v2707_v41 = vsub.f32 %v3983_v13, %v3984_v19  ;;  %v3994_v19 = vld [vmem:[#allocation2 + $0x40] sm:$0xff] }
 0x2e4   :  { %v1979_v23 = vsel %vm181_vm6, %v1977_v1, %v1956_v3  ;;  %v1966_v11 = vsel %vm181_vm6, %v1964_v2, %v1912_v33  ;;  %v3989_v3 = vld [vmem:[#allocation2 + $0x38] sm:$0xff] }
 0x2e5   :  { %v2709_v33 = vand.u32 2147483647, %v2707_v41  ;;  %v3990_v2 = vld [vmem:[#allocation5 + $0x38] sm:$0xff]  ;;  %v2722_v41 = vsub.f32 %v3994_v19, %v4260_v36 }
 0x2e7   :  { %v1902_v40 = vpop.permute.xlu1 %1901 }
 0x2e8   :  { %v1963_v15 = vsel %vm178_vm5, %v1961_v62, %v1902_v40  ;;  %v3985_v40 = vld [vmem:[#allocation5] sm:$0xff]  ;;  %v3988_v62 = vld [vmem:[#allocation5 + $0x10] sm:$0xff] }
 0x2e9   :  { %v2706_v1 = vsub.f32 %v3987_v0, %v3988_v62 }
 0x2eb   :  { %v1910_v9 = vpop.permute.xlu1 %1909 }
 0x2ec   :  { %v3922_v16 = vpop.eup %3921  ;;  %v1965_v10 = vsel %vm181_vm6, %v1963_v15, %v1910_v9  ;;  %v3991_v9 = vld [vmem:[#allocation2 + $0x48] sm:$0xff] }
 0x2ed   :  { %v4604_v20 = vmul.f32 %v3922_v16, %v553_v17  ;;  %v4668_v17 = vld [vmem:[#allocation5 + $0x50] sm:$0xff]  ;;  %v2723_v15 = vsub.f32 %v3991_v9, %v4235_v31 }
 0x2ee   :  { %v3924_v28 = vpop.eup %3923  ;;  %v1887_v16 = vmul.f32 %v4668_v17, %v4668_v17  ;;  %v1889_v59 = vmul.f32 %v4668_v17, %v4493_v57 }
 0x2ef   :  { %v4610_v26 = vmul.f32 %v3924_v28, %v552_v21  ;;  %v3982_v21 = vld [vmem:[#allocation2 + $0x8] sm:$0xff] }
 0x2f0   :  { %v2703_v28 = vsub.f32 %v3982_v21, %v3981_v18  ;;  %v3992_v21 = vld [vmem:[#allocation2 + $0x30] sm:$0xff] }
 0x2f2   :  { %v4615_v22 = vpop.f32.mrf.mxu1  ;;  %v2705_v27 = vand.u32 2147483647, %v2703_v28  ;;  %v3993_v28 = vld [vmem:[#allocation5 + $0x30] sm:$0xff] }
 0x2f3   :  { %v2718_v13 = vsub.f32 %v3992_v21, %v3993_v28  ;;  %v1862_v21 = vld [vmem:[#allocation7 + $0x30] sm:$0xff] }
 0x2f4   :  { %v4617_v29 = vpop.f32.mrf.mxu1  ;;  %v2711_v56 = vadd.f32 %v2709_v33, %v2705_v27 }
 0x2f5   :  { %v2720_v33 = vand.u32 2147483647, %v2718_v13  ;;  %v1863_v13 = vld [vmem:[#allocation7 + $0x38] sm:$0xff] }
 0x2f6   :  { %v4621_v42 = vpop.f32.mrf.mxu1 }
 0x2f8   :  { %v4625_v25 = vpop.f32.mrf.mxu1 }
 0x2fa   :  { %v4627_v35 = vpop.f32.mrf.mxu1 }
 0x2fc   :  { %v4631_v63 = vpop.f32.mrf.mxu1 }
 0x300   :  { %v1549_v60 = vpop.f32.mrf.mxu1 }
 0x301   :  { %1562 = vrot.lane.b32.xlu0 %v1549_v60, %s4116_s13  ;;  %3757 = vmatprep.mubr.msk.f32.mxu1 %vm163_vm0, %v1549_v60 }
 0x302   :  { %v4643_v7 = vpop.f32.mrf.mxu1 }
 0x303   :  { %1592 = vrot.lane.b32.xlu1 %v4643_v7, %s4116_s13 }
 0x304   :  { %v1555_v38 = vpop.f32.mrf.mxu1 }
 0x305   :  { %1566 = vrot.lane.b32.xlu0 %v1549_v60, %s4114_s12  ;;  %3758 = vmatmul.mubr.msk.f32.vlgmr.msra.gmra.mxu1 %vm163_vm0, %v1555_v38 }
 0x306   :  { %2046 = vmatpush1.msra.mxu1 %v1966_v11  ;;  %v4677_v54 = vpop.f32.mrf.mxu1 }
 0x307   :  { %2047 = vmatprep.subr.mxu1 %v1979_v23  ;;  %1564 = vrot.lane.b32.xlu1 %v1555_v38, %s4116_s13  ;;  %v2708_v23 = vand.u32 2147483647, %v2706_v1 }
 0x308   :  { %2048 = vmatpush1.msra.mxu1 %v1965_v10  ;;  %v2725_v10 = vand.u32 2147483647, %v2723_v15 }
 0x309   :  { %1570 = vrot.lane.b32.xlu0 %v1549_v60, %s4113_s11 }
 0x30b   :  { %1568 = vrot.lane.b32.xlu1 %v1555_v38, %s4114_s12 }
 0x30d   :  { %1574 = vrot.lane.b32.xlu0 %v1549_v60, %s4112_s10 }
 0x30f   :  { %1572 = vrot.lane.b32.xlu1 %v1555_v38, %s4113_s11 }
 0x311   :  { %1578 = vrot.lane.b32.xlu0 %v1549_v60, %s4110_s3 }
 0x313   :  { %1576 = vrot.lane.b32.xlu1 %v1555_v38, %s4112_s10 }
 0x315   :  { %1582 = vrot.lane.b32.xlu0 %v1549_v60, %s4111_s9 }
 0x317   :  { %1580 = vrot.lane.b32.xlu1 %v1555_v38, %s4110_s3 }
 0x319   :  { %1586 = vrot.lane.b32.xlu0 %v1549_v60, %s4109_s2  ;;  %v3986_v60 = vld [vmem:[#allocation2] sm:$0xff] }
 0x31b   :  { %1584 = vrot.lane.b32.xlu1 %v1555_v38, %s4111_s9 }
 0x31d   :  { %2736 = vrot.lane.b32.xlu0 %v4427_v49, %s4109_s2 }
 0x31f   :  { %1588 = vrot.lane.b32.xlu1 %v1555_v38, %s4109_s2 }
 0x321   :  { %2001 = vrot.lane.b32.xlu0 %v1890_v12, %s4110_s3 }
 0x323   :  { %2742 = vrot.lane.b32.xlu1 %v4471_v30, %s4111_s9  ;;  %v2713_v30 = vsub.f32 %v4425_v48, %v4427_v49 }
 0x325   :  { %1991 = vrot.lane.b32.xlu0 %v1887_v16, %s4111_s9  ;;  %v2715_v61 = vand.u32 2147483647, %v2713_v30  ;;  %v2724_v30 = vand.u32 2147483647, %v2722_v41 }
 0x327   :  { %1594 = vrot.lane.b32.xlu1 %v4677_v54, %s4116_s13  ;;  %v2717_v49 = vadd.f32 %v2715_v61, %v2711_v56  ;;  %v2726_v61 = vadd.f32 %v2724_v30, %v2720_v33 }
 0x329   :  { %2750 = vrot.lane.b32.xlu0 %v4566_v37, %s4110_s3  ;;  %v2702_v37 = vsub.f32 %v3986_v60, %v3985_v40 }
 0x32b   :  { %2734 = vrot.lane.b32.xlu1 %v4439_v52, %s4109_s2  ;;  %v2704_v38 = vand.u32 2147483647, %v2702_v37 }
 0x32d   :  { %2740 = vrot.lane.b32.xlu0 %v4485_v34, %s4111_s9  ;;  %v2719_v34 = vsub.f32 %v3989_v3, %v3990_v2  ;;  %v2710_v18 = vadd.f32 %v2708_v23, %v2704_v38 }
 0x32f   :  { %1999 = vrot.lane.b32.xlu1 %v1889_v59, %s4110_s3  ;;  %v2721_v11 = vand.u32 2147483647, %v2719_v34 }
 0x331   :  { %2784 = vrot.lane.b32.xlu0 %v4582_v6, %s4109_s2  ;;  %v2712_v6 = vsub.f32 %v4437_v51, %v4439_v52  ;;  %v2727_v52 = vadd.f32 %v2725_v10, %v2721_v11 }
 0x333   :  { %2756 = vrot.lane.b32.xlu1 %v4435_v50, %s4112_s10  ;;  %v2729_v50 = vsub.f32 %v4477_v32, %v4574_v4  ;;  %v2714_v31 = vand.u32 2147483647, %v2712_v6 }
 0x335   :  { %2764 = vrot.lane.b32.xlu0 %v2717_v49, %s4113_s11  ;;  %v2716_v27 = vadd.f32 %v2714_v31, %v2710_v18 }
 0x337   :  { %2748 = vrot.lane.b32.xlu1 %v4608_v24, %s4110_s3  ;;  %v2731_v24 = vand.u32 2147483647, %v2729_v50 }
 0x339   :  { %2754 = vrot.lane.b32.xlu0 %v4447_v53, %s4112_s10  ;;  %v2728_v53 = vsub.f32 %v4493_v57, %v4668_v17  ;;  %v2733_v56 = vadd.f32 %v2731_v24, %v2727_v52 }
 0x33b   :  { %2790 = vrot.lane.b32.xlu1 %v1890_v12, %s4111_s9  ;;  %v2730_v36 = vand.u32 2147483647, %v2728_v53 }
 0x33d   :  { %2782 = vrot.lane.b32.xlu0 %v1887_v16, %s4109_s2  ;;  %v2732_v12 = vadd.f32 %v2730_v36, %v2726_v61 }
 0x33f   :  { %2770 = vrot.lane.b32.xlu1 %v4477_v32, %s4114_s12  ;;  %v1994_v32 = vpop.permute.xlu1 %1993 }
 0x341   :  { %2762 = vrot.lane.b32.xlu0 %v2716_v27, %s4113_s11 }
 0x343   :  { %2798 = vrot.lane.b32.xlu1 %v2733_v56, %s4110_s3  ;;  %v4757_v16 = vpop.permute.xlu1 %1983 }
 0x345   :  { %2788 = vrot.lane.b32.xlu0 %v1889_v59, %s4111_s9 }
 0x347   :  { %2778 = vrot.lane.b32.xlu1 %v4574_v4, %s4116_s13 }
 0x349   :  { %2796 = vrot.lane.b32.xlu0 %v2732_v12, %s4110_s3 }
 0x34b   :  { %2768 = vrot.lane.b32.xlu1 %v4493_v57, %s4114_s12  ;;  %v1986_v57 = vpop.permute.xlu0 %1985 }
 0x34c   :  { %v2006_v38 = vsel %vm163_vm0, %v4574_v4, %v1986_v57 }
 0x34d   :  { %878 = vrot.lane.b32.xlu0 %v4393_v43, %s4116_s13  ;;  %v2008_v11 = vsel %vm166_vm1, %v2006_v38, %v1994_v32 }
 0x34f   :  { %2776 = vrot.lane.b32.xlu1 %v4668_v17, %s4116_s13 }
 0x351   :  { %882 = vrot.lane.b32.xlu0 %v4393_v43, %s4114_s12 }
 0x353   :  { %880 = vrot.lane.b32.xlu1 %v4399_v45, %s4116_s13 }
 0x355   :  { %886 = vrot.lane.b32.xlu0 %v4393_v43, %s4113_s11 }
 0x357   :  { %884 = vrot.lane.b32.xlu1 %v4399_v45, %s4114_s12 }
 0x359   :  { %890 = vrot.lane.b32.xlu0 %v4393_v43, %s4112_s10 }
 0x35b   :  { %888 = vrot.lane.b32.xlu1 %v4399_v45, %s4113_s11 }
 0x35d   :  { %894 = vrot.lane.b32.xlu0 %v4393_v43, %s4110_s3 }
 0x35f   :  { %892 = vrot.lane.b32.xlu1 %v4399_v45, %s4112_s10 }
 0x361   :  { %898 = vrot.lane.b32.xlu0 %v4393_v43, %s4111_s9 }
 0x363   :  { %896 = vrot.lane.b32.xlu1 %v4399_v45, %s4110_s3 }
 0x365   :  { %902 = vrot.lane.b32.xlu0 %v4393_v43, %s4109_s2 }
 0x367   :  { %900 = vrot.lane.b32.xlu1 %v4399_v45, %s4111_s9 }
 0x369   :  { %908 = vrot.lane.b32.xlu0 %v4397_v44, %s4116_s13 }
 0x36b   :  { %904 = vrot.lane.b32.xlu1 %v4399_v45, %s4109_s2 }
 0x36d   :  { %912 = vrot.lane.b32.xlu0 %v4397_v44, %s4114_s12 }
 0x36f   :  { %910 = vrot.lane.b32.xlu1 %v4403_v46, %s4116_s13 }
 0x371   :  { %916 = vrot.lane.b32.xlu0 %v4397_v44, %s4113_s11 }
 0x373   :  { %v1563_v43 = vpop.permute.xlu0 %1562  ;;  %914 = vrot.lane.b32.xlu1 %v4403_v46, %s4114_s12 }
 0x374   :  { %3760 = vmatprep.mubr.msk.f32.mxu1 %vm163_vm0, %v1563_v43 }
 0x375   :  { %920 = vrot.lane.b32.xlu0 %v4397_v44, %s4112_s10  ;;  %v1593_v45 = vpop.permute.xlu1 %1592 }
 0x377   :  { %v1567_v59 = vpop.permute.xlu0 %1566  ;;  %918 = vrot.lane.b32.xlu1 %v4403_v46, %s4113_s11 }
 0x379   :  { %924 = vrot.lane.b32.xlu0 %v4397_v44, %s4110_s3  ;;  %v1565_v40 = vpop.permute.xlu1 %1564 }
 0x37a   :  { %3761 = vmatmul.mubr.msk.f32.gmra.mxu1 %vm163_vm0, %v1565_v40 }
 0x37b   :  { %v1571_v60 = vpop.permute.xlu0 %1570  ;;  %3763 = vmatprep.mubr.msk.f32.mxu1 %vm163_vm0, %v1567_v59  ;;  %922 = vrot.lane.b32.xlu1 %v4403_v46, %s4112_s10 }
 0x37d   :  { %928 = vrot.lane.b32.xlu0 %v4397_v44, %s4111_s9  ;;  %v1569_v37 = vpop.permute.xlu1 %1568 }
 0x37e   :  { %3764 = vmatmul.mubr.msk.f32.gmra.mxu1 %vm163_vm0, %v1569_v37 }
 0x37f   :  { %v1575_v49 = vpop.permute.xlu0 %1574  ;;  %3766 = vmatprep.mubr.msk.f32.mxu1 %vm163_vm0, %v1571_v60  ;;  %926 = vrot.lane.b32.xlu1 %v4403_v46, %s4110_s3 }
 0x381   :  { %932 = vrot.lane.b32.xlu0 %v4397_v44, %s4109_s2  ;;  %v1573_v0 = vpop.permute.xlu1 %1572 }
 0x382   :  { %3767 = vmatmul.mubr.msk.f32.gmra.mxu1 %vm163_vm0, %v1573_v0 }
 0x383   :  { %v1579_v62 = vpop.permute.xlu0 %1578  ;;  %3769 = vmatprep.mubr.msk.f32.mxu1 %vm163_vm0, %v1575_v49  ;;  %930 = vrot.lane.b32.xlu1 %v4403_v46, %s4111_s9 }
 0x385   :  { %v1577_v1 = vpop.permute.xlu1 %1576 }
 0x386   :  { %3770 = vmatmul.mubr.msk.f32.gmra.mxu1 %vm163_vm0, %v1577_v1 }
 0x387   :  { %v1583_v3 = vpop.permute.xlu0 %1582  ;;  %3772 = vmatprep.mubr.msk.f32.mxu1 %vm163_vm0, %v1579_v62  ;;  %934 = vrot.lane.b32.xlu1 %v4403_v46, %s4109_s2 }
 0x389   :  { %v1581_v2 = vpop.permute.xlu1 %1580 }
 0x38a   :  { %3773 = vmatmul.mubr.msk.f32.gmra.mxu1 %vm163_vm0, %v1581_v2 }
 0x38b   :  { %v1587_v34 = vpop.permute.xlu0 %1586  ;;  %3775 = vmatprep.mubr.msk.f32.mxu1 %vm163_vm0, %v1583_v3 }
 0x38d   :  { %v1585_v9 = vpop.permute.xlu1 %1584 }
 0x38e   :  { %3776 = vmatmul.mubr.msk.f32.gmra.mxu1 %vm163_vm0, %v1585_v9 }
 0x38f   :  { %v2737_v15 = vpop.permute.xlu0 %2736  ;;  %3778 = vmatprep.mubr.msk.f32.mxu1 %vm163_vm0, %v1587_v34 }
 0x390   :  { %v2803_v61 = vsel %vm163_vm0, %v4425_v48, %v2737_v15 }
 0x391   :  { %v1589_v23 = vpop.permute.xlu1 %1588 }
 0x392   :  { %3779 = vmatmul.mubr.msk.f32.gmra.mxu1 %vm163_vm0, %v1589_v23 }
 0x393   :  { %v2002_v6 = vpop.permute.xlu0 %2001  ;;  %3781 = vmatprep.mubr.msk.f32.mxu1 %vm163_vm0, %v4643_v7 }
 0x394   :  { %v2010_v10 = vsel %vm169_vm2, %v2008_v11, %v2002_v6  ;;  %v2697_v11 = vld [vmem:[#allocation7 + $0x40] sm:$0xff] }
 0x395   :  { %v2743_v50 = vpop.permute.xlu1 %2742  ;;  %3787 = vmatprep.subr.mxu1 %v2010_v10 }
 0x396   :  { %3782 = vmatmul.mubr.msk.f32.gmra.mxu1 %vm163_vm0, %v4677_v54  ;;  %v2005_v54 = vsel %vm163_vm0, %v4668_v17, %v4757_v16  ;;  %v2805_v12 = vsel %vm166_vm1, %v2803_v61, %v2743_v50 }
 0x397   :  { %v1992_v18 = vpop.permute.xlu0 %1991  ;;  %3784 = vmatprep.mubr.msk.f32.mxu1 %vm163_vm0, %v1593_v45 }
 0x398   :  { %v2007_v19 = vsel %vm166_vm1, %v2005_v54, %v1992_v18 }
 0x399   :  { %v1595_v4 = vpop.permute.xlu1 %1594 }
 0x39a   :  { %3785 = vmatmul.mubr.msk.f32.gmra.mxu1 %vm163_vm0, %v1595_v4  ;;  %v2698_v4 = vld [vmem:[#allocation7 + $0x48] sm:$0xff] }
 0x39b   :  { %v2751_v31 = vpop.permute.xlu0 %2750  ;;  %2081 = vmatprep.mubr.f32.mxu1 %v4115_v14 }
 0x39c   :  { %v2807_v57 = vsel %vm169_vm2, %v2805_v12, %v2751_v31 }
 0x39d   :  { %v2735_v7 = vpop.permute.xlu1 %2734 }
 0x39e   :  { %3416 = vmatmul.mubr.msk.f32.vlgmr.msra.gmra.mxu1 %vm163_vm0, %v1862_v21  ;;  %v2802_v48 = vsel %vm163_vm0, %v4437_v51, %v2735_v7 }
 0x39f   :  { %3788 = vmatpush3.msra.mxu1 %v2010_v10  ;;  %v2741_v28 = vpop.permute.xlu0 %2740  ;;  %2087 = vmatprep.mubr.f32.mxu1 %v4115_v14 }
 0x3a0   :  { %v2804_v1 = vsel %vm166_vm1, %v2802_v48, %v2741_v28 }
 0x3a1   :  { %v2000_v41 = vpop.permute.xlu1 %1999 }
 0x3a2   :  { %3417 = vmatmul.mubr.msk.f32.gmra.mxu1 %vm163_vm0, %v1863_v13  ;;  %v2009_v52 = vsel %vm169_vm2, %v2007_v19, %v2000_v41 }
 0x3a3   :  { %v2785_v24 = vpop.permute.xlu0 %2784  ;;  %3789 = vmatprep.subr.mxu1 %v2009_v52  ;;  %3791 = vmatprep.mubr.msk.f32.mxu1 %vm163_vm0, %v1862_v21 }
 0x3a4   :  { %3790 = vmatpush3.msra.mxu1 %v2009_v52  ;;  %v2817_v16 = vsel %vm163_vm0, %v4578_v5, %v2785_v24 }
 0x3a5   :  { %v2757_v27 = vpop.permute.xlu1 %2756 }
 0x3a6   :  { %3792 = vmatmul.mubr.msk.f32.vlgmr.msra.gmra.mxu1 %vm163_vm0, %v1863_v13  ;;  %v2809_v43 = vsel %vm172_vm3, %v2807_v57, %v2757_v27 }
 0x3a7   :  { %v2765_v33 = vpop.permute.xlu0 %2764  ;;  %2892 = vmatprep.mubr.f32.mxu1 %v4115_v14 }
 0x3a8   :  { %v2811_v37 = vsel %vm175_vm4, %v2809_v43, %v2765_v33 }
 0x3a9   :  { %v2749_v30 = vpop.permute.xlu1 %2748 }
 0x3aa   :  { %v2806_v34 = vsel %vm169_vm2, %v2804_v1, %v2749_v30  ;;  %v1866_v30 = vld [vmem:[#allocation8 + $0x38] sm:$0xff] }
 0x3ab   :  { %v2755_v17 = vpop.permute.xlu0 %2754  ;;  %3794 = vmatprep.subr.mxu0 %v1866_v30 }
 0x3ac   :  { %v2808_v15 = vsel %vm172_vm3, %v2806_v34, %v2755_v17  ;;  %3795 = vmatpush3.msra.mxu0 %v1866_v30 }
 0x3ad   :  { %v2791_v53 = vpop.permute.xlu1 %2790 }
 0x3ae   :  { %v2819_v45 = vsel %vm166_vm1, %v2817_v16, %v2791_v53  ;;  %v1865_v53 = vld [vmem:[#allocation8 + $0x30] sm:$0xff] }
 0x3af   :  { %v2783_v56 = vpop.permute.xlu0 %2782  ;;  %3796 = vmatprep.subr.mxu0 %v1865_v53 }
 0x3b0   :  { %v2816_v5 = vsel %vm163_vm0, %v4591_v8, %v2783_v56  ;;  %3797 = vmatpush3.msra.mxu0 %v1865_v53 }
 0x3b1   :  { %v2771_v36 = vpop.permute.xlu1 %2770 }
 0x3b2   :  { %v2813_v49 = vsel %vm178_vm5, %v2811_v37, %v2771_v36 }
 0x3b3   :  { %v2763_v32 = vpop.permute.xlu0 %2762 }
 0x3b4   :  { %v2810_v23 = vsel %vm175_vm4, %v2808_v15, %v2763_v32 }
 0x3b5   :  { %v2799_v59 = vpop.permute.xlu1 %2798 }
 0x3b6   :  { %v2821_v40 = vsel %vm169_vm2, %v2819_v45, %v2799_v59  ;;  %v2701_v59 = vld [vmem:[#allocation8 + $0x48] sm:$0xff] }
 0x3b7   :  { %v2789_v60 = vpop.permute.xlu0 %2788  ;;  %2856 = vmatprep.subr.mxu1 %v2821_v40  ;;  %v2700_v40 = vld [vmem:[#allocation8 + $0x40] sm:$0xff] }
 0x3b8   :  { %v2818_v3 = vsel %vm166_vm1, %v2816_v5, %v2789_v60 }
 0x3b9   :  { %v2779_v0 = vpop.permute.xlu1 %2778 }
 0x3ba   :  { %v2815_v62 = vsel %vm181_vm6, %v2813_v49, %v2779_v0 }
 0x3bb   :  { %v2797_v2 = vpop.permute.xlu0 %2796  ;;  %2857 = vmatpush1.msra.mxu1 %v2815_v62 }
 0x3bc   :  { %v2820_v51 = vsel %vm169_vm2, %v2818_v3, %v2797_v2 }
 0x3bd   :  { %v2769_v9 = vpop.permute.xlu1 %2768  ;;  %2858 = vmatprep.subr.mxu1 %v2820_v51 }
 0x3be   :  { %v2812_v8 = vsel %vm178_vm5, %v2810_v23, %v2769_v9 }
 0x3bf   :  { %v879_v38 = vpop.permute.xlu0 %878 }
 0x3c0   :  { %3696 = vmatprep.mubr.msk.f32.mxu0 %vm163_vm0, %v879_v38 }
 0x3c1   :  { %v2777_v6 = vpop.permute.xlu1 %2776 }
 0x3c2   :  { %v2814_v10 = vsel %vm181_vm6, %v2812_v8, %v2777_v6 }
 0x3c3   :  { %v883_v50 = vpop.permute.xlu0 %882  ;;  %2859 = vmatpush1.msra.mxu1 %v2814_v10 }
 0x3c4   :  { %3460 = vmatmul.mubr.msk.f32.vlgmr.msra.gmra.mxu1 %vm163_vm0, %v2697_v11  ;;  %3858 = vmatprep.subr.mxu1 %v2701_v59 }
 0x3c5   :  { %v881_v18 = vpop.permute.xlu1 %880  ;;  %2898 = vmatprep.mubr.f32.mxu1 %v4115_v14  ;;  %3859 = vmatpush3.msra.mxu1 %v2701_v59  ;;  %v3759_v60 = vpop.f32.mrf.mxu1 }
 0x3c6   :  { %3697 = vmatmul.mubr.msk.f32.gmra.mxu0 %vm163_vm0, %v881_v18  ;;  %3860 = vmatprep.subr.mxu1 %v2700_v40  ;;  %v1802_v62 = vmul.f32 %v3759_v60, %v3759_v60 }
 0x3c7   :  { %v887_v31 = vpop.permute.xlu0 %886  ;;  %3699 = vmatprep.mubr.msk.f32.mxu0 %vm163_vm0, %v883_v50  ;;  %3861 = vmatpush3.msra.mxu1 %v2700_v40  ;;  %v1702_v48 = vpop.f32.mrf.mxu1 }
 0x3c8   :  { %3461 = vmatmul.mubr.msk.f32.gmra.mxu1 %vm163_vm0, %v2698_v4  ;;  %v1801_v2 = vmul.f32 %v1702_v48, %v1702_v48 }
 0x3c9   :  { %v885_v21 = vpop.permute.xlu1 %884 }
 0x3ca   :  { %3700 = vmatmul.mubr.msk.f32.gmra.mxu0 %vm163_vm0, %v885_v21 }
 0x3cb   :  { %v891_v7 = vpop.permute.xlu0 %890  ;;  %3702 = vmatprep.mubr.msk.f32.mxu0 %vm163_vm0, %v887_v31 }
 0x3cd   :  { %v889_v28 = vpop.permute.xlu1 %888 }
 0x3ce   :  { %3703 = vmatmul.mubr.msk.f32.gmra.mxu0 %vm163_vm0, %v889_v28 }
 0x3cf   :  { %v895_v13 = vpop.permute.xlu0 %894  ;;  %3705 = vmatprep.mubr.msk.f32.mxu0 %vm163_vm0, %v891_v7 }
 0x3d1   :  { %v893_v14 = vpop.permute.xlu1 %892 }
 0x3d2   :  { %3706 = vmatmul.mubr.msk.f32.gmra.mxu0 %vm163_vm0, %v893_v14 }
 0x3d3   :  { %v899_v54 = vpop.permute.xlu0 %898  ;;  %3708 = vmatprep.mubr.msk.f32.mxu0 %vm163_vm0, %v895_v13 }
 0x3d5   :  { %v897_v19 = vpop.permute.xlu1 %896 }
 0x3d6   :  { %3709 = vmatmul.mubr.msk.f32.gmra.mxu0 %vm163_vm0, %v897_v19 }
 0x3d7   :  { %v903_v41 = vpop.permute.xlu0 %902  ;;  %3711 = vmatprep.mubr.msk.f32.mxu0 %vm163_vm0, %v899_v54 }
 0x3d9   :  { %v901_v52 = vpop.permute.xlu1 %900 }
 0x3da   :  { %3712 = vmatmul.mubr.msk.f32.gmra.mxu0 %vm163_vm0, %v901_v52 }
 0x3db   :  { %v909_v24 = vpop.permute.xlu0 %908  ;;  %3714 = vmatprep.mubr.msk.f32.mxu0 %vm163_vm0, %v903_v41 }
 0x3dd   :  { %v905_v27 = vpop.permute.xlu1 %904 }
 0x3de   :  { %3715 = vmatmul.mubr.msk.f32.gmra.mxu0 %vm163_vm0, %v905_v27 }
 0x3df   :  { %v913_v33 = vpop.permute.xlu0 %912  ;;  %3717 = vmatprep.mubr.msk.f32.mxu0 %vm163_vm0, %v4397_v44 }
 0x3e1   :  { %v911_v17 = vpop.permute.xlu1 %910 }
 0x3e2   :  { %3718 = vmatmul.mubr.msk.f32.gmra.mxu0 %vm163_vm0, %v4403_v46 }
 0x3e3   :  { %v917_v56 = vpop.permute.xlu0 %916  ;;  %3720 = vmatprep.mubr.msk.f32.mxu0 %vm163_vm0, %v909_v24 }
 0x3e5   :  { %v915_v61 = vpop.permute.xlu1 %914 }
 0x3e6   :  { %3721 = vmatmul.mubr.msk.f32.gmra.mxu0 %vm163_vm0, %v911_v17 }
 0x3e7   :  { %3723 = vmatprep.mubr.msk.f32.mxu0 %vm163_vm0, %v913_v33  ;;  %v921_v36 = vpop.permute.xlu0 %920 }
 0x3e9   :  { %v919_v44 = vpop.permute.xlu1 %918 }
 0x3ea   :  { %3724 = vmatmul.mubr.msk.f32.gmra.mxu0 %vm163_vm0, %v915_v61 }
 0x3eb   :  { %3726 = vmatprep.mubr.msk.f32.mxu0 %vm163_vm0, %v917_v56  ;;  %v925_v32 = vpop.permute.xlu0 %924 }
 0x3ed   :  { %v923_v12 = vpop.permute.xlu1 %922 }
 0x3ee   :  { %3727 = vmatmul.mubr.msk.f32.gmra.mxu0 %vm163_vm0, %v919_v44 }
 0x3ef   :  { %3729 = vmatprep.mubr.msk.f32.mxu0 %vm163_vm0, %v921_v36  ;;  %v929_v57 = vpop.permute.xlu0 %928 }
 0x3f1   :  { %v927_v46 = vpop.permute.xlu1 %926 }
 0x3f2   :  { %3730 = vmatmul.mubr.msk.f32.gmra.mxu0 %vm163_vm0, %v923_v12 }
 0x3f3   :  { %3732 = vmatprep.mubr.msk.f32.mxu0 %vm163_vm0, %v925_v32  ;;  %v933_v43 = vpop.permute.xlu0 %932 }
 0x3f5   :  { %v931_v16 = vpop.permute.xlu1 %930 }
 0x3f6   :  { %3733 = vmatmul.mubr.msk.f32.gmra.mxu0 %vm163_vm0, %v927_v46 }
 0x3f7   :  { %3735 = vmatprep.mubr.msk.f32.mxu0 %vm163_vm0, %v929_v57 }
 0x3f9   :  { %v935_v45 = vpop.permute.xlu1 %934 }
 0x3fa   :  { %3736 = vmatmul.mubr.msk.f32.gmra.mxu0 %vm163_vm0, %v931_v16 }
 0x3fb   :  { %3738 = vmatprep.mubr.msk.f32.mxu0 %vm163_vm0, %v933_v43 }
 0x3fe   :  { %3739 = vmatmul.mubr.msk.f32.gmra.mxu0 %vm163_vm0, %v935_v45 }
 0x3ff   :  { %3741 = vmatprep.mubr.msk.f32.mxu0 %vm163_vm0, %v4411_v39 }
 0x402   :  { %3742 = vmatmul.mubr.msk.f32.gmra.mxu0 %vm163_vm0, %v4405_v47 }
 0x43a   :  { %v3762_v37 = vpop.f32.mrf.mxu1 }
 0x43b   :  { %v1804_v1 = vmul.f32 %v3762_v37, %v3762_v37  ;;  %v1806_v9 = vmul.f32 %v3762_v37, %v3759_v60 }
 0x43c   :  { %v1712_v49 = vpop.f32.mrf.mxu1 }
 0x43d   :  { %v1803_v39 = vmul.f32 %v1712_v49, %v1712_v49  ;;  %v1805_v6 = vmul.f32 %v1712_v49, %v1702_v48 }
 0x43e   :  { %v3765_v0 = vpop.f32.mrf.mxu1 }
 0x43f   :  { %v1808_v34 = vsub.f32 %v3765_v0, %v1802_v62 }
 0x440   :  { %v1722_v5 = vpop.f32.mrf.mxu1 }
 0x441   :  { %v1807_v15 = vsub.f32 %v1722_v5, %v1801_v2 }
 0x442   :  { %v3768_v3 = vpop.f32.mrf.mxu1 }
 0x443   :  { %v1810_v51 = vsub.f32 %v3768_v3, %v1804_v1 }
 0x444   :  { %v1732_v47 = vpop.f32.mrf.mxu1 }
 0x445   :  { %v1818_v38 = vadd.f32 %v1810_v51, %v1808_v34  ;;  %v1809_v23 = vsub.f32 %v1732_v47, %v1803_v39 }
 0x446   :  { %v3771_v8 = vpop.f32.mrf.mxu1 }
 0x447   :  { %v1820_v11 = vadd.f32 58.5225, %v1818_v38  ;;  %v1817_v10 = vadd.f32 %v1809_v23, %v1807_v15  ;;  %v1812_v50 = vsub.f32 %v3771_v8, %v1806_v9 }
 0x448   :  { %v1742_v18 = vpop.f32.mrf.mxu1 }
 0x449   :  { %3925 = vrcp.f32 %v1820_v11  ;;  %v1819_v4 = vadd.f32 58.5225, %v1817_v10  ;;  %v1811_v31 = vsub.f32 %v1742_v18, %v1805_v6  ;;  %v1814_v54 = vmul.f32 2.0, %v1812_v50  ;;  %v3695_v6 = vpop.f32.mrf.mxu0 }
 0x44a   :  { %v3774_v21 = vpop.f32.mrf.mxu1 }
 0x44b   :  { %3927 = vrcp.f32 %v1819_v4  ;;  %v1832_v19 = vmul.f32 %v3774_v21, %v3774_v21  ;;  %v1813_v24 = vmul.f32 2.0, %v1811_v31  ;;  %v1816_v17 = vadd.f32 58.5225, %v1814_v54  ;;  %v1096_v10 = vpop.f32.mrf.mxu0 }
 0x44c   :  { %v1752_v7 = vpop.f32.mrf.mxu1 }
 0x44d   :  { %v1831_v27 = vmul.f32 %v1752_v7, %v1752_v7  ;;  %v1815_v12 = vadd.f32 58.5225, %v1813_v24 }
 0x44e   :  { %v3777_v28 = vpop.f32.mrf.mxu1 }
 0x44f   :  { %v1836_v13 = vmul.f32 %v3777_v28, %v3774_v21  ;;  %v1834_v53 = vmul.f32 %v3777_v28, %v3777_v28 }
 0x450   :  { %v1762_v14 = vpop.f32.mrf.mxu1 }
 0x451   :  { %v1835_v41 = vmul.f32 %v1762_v14, %v1752_v7  ;;  %v1833_v32 = vmul.f32 %v1762_v14, %v1762_v14 }
 0x452   :  { %v3780_v52 = vpop.f32.mrf.mxu1 }
 0x453   :  { %v1838_v33 = vsub.f32 %v3780_v52, %v1832_v19  ;;  %v1295_v19 = vmul.f32 %v1096_v10, %v1096_v10 }
 0x454   :  { %v1772_v30 = vpop.f32.mrf.mxu1 }
 0x455   :  { %v1837_v56 = vsub.f32 %v1772_v30, %v1831_v27 }
 0x456   :  { %v3926_v61 = vpop.eup %3925  ;;  %v3783_v36 = vpop.f32.mrf.mxu1 }
 0x457   :  { %v4880_v44 = vmul.f32 %v3926_v61, %v1816_v17  ;;  %v1840_v46 = vsub.f32 %v3783_v36, %v1834_v53 }
 0x458   :  { %v3928_v57 = vpop.eup %3927  ;;  %v1782_v16 = vpop.f32.mrf.mxu1 }
 0x459   :  { %v4882_v43 = vmul.f32 %v3928_v57, %v1815_v12  ;;  %v1848_v45 = vadd.f32 %v1840_v46, %v1838_v33  ;;  %v1839_v59 = vsub.f32 %v1782_v16, %v1833_v32 }
 0x45a   :  { %v3786_v40 = vpop.f32.mrf.mxu1 }
 0x45b   :  { %v1850_v60 = vadd.f32 58.5225, %v1848_v45  ;;  %v1847_v48 = vadd.f32 %v1839_v59, %v1837_v56  ;;  %v1842_v37 = vsub.f32 %v3786_v40, %v1836_v13  ;;  %v1296_v13 = vmul.f32 %v3695_v6, %v3695_v6 }
 0x45c   :  { %v1792_v49 = vpop.f32.mrf.mxu1 }
 0x45d   :  { %3929 = vrcp.f32 %v1850_v60  ;;  %v1849_v0 = vadd.f32 58.5225, %v1847_v48  ;;  %v1841_v5 = vsub.f32 %v1792_v49, %v1835_v41  ;;  %v1844_v2 = vmul.f32 2.0, %v1842_v37 }
 0x45e   :  { %v2083_v62 = vpop.f32.mrf.mxu1 }
 0x45f   :  { %3931 = vrcp.f32 %v1849_v0  ;;  %2171 = vrot.lane.b32.xlu0 %v2083_v62, %s4116_s13  ;;  %3798 = vmatprep.mubr.msk.f32.mxu0 %vm163_vm0, %v2083_v62  ;;  %v1843_v39 = vmul.f32 2.0, %v1841_v5  ;;  %v1846_v34 = vadd.f32 58.5225, %v1844_v2 }
 0x460   :  { %v4886_v1 = vpop.f32.mrf.mxu1 }
 0x461   :  { %v1845_v9 = vadd.f32 58.5225, %v1843_v39  ;;  %v535_v39 = vmul.f32 %v4600_v55, %v4600_v55 }
 0x462   :  { %v2089_v3 = vpop.f32.mrf.mxu1 }
 0x463   :  { %2175 = vrot.lane.b32.xlu0 %v2083_v62, %s4114_s12  ;;  %2173 = vrot.lane.b32.xlu1 %v2089_v3, %s4116_s13 }
 0x464   :  { %3799 = vmatmul.mubr.msk.f32.vlgmr.msra.gmra.mxu0 %vm163_vm0, %v2089_v3  ;;  %v4908_v23 = vpop.f32.mrf.mxu1 }
 0x466   :  { %v4910_v8 = vpop.f32.mrf.mxu1 }
 0x467   :  { %2179 = vrot.lane.b32.xlu0 %v2083_v62, %s4113_s11  ;;  %2177 = vrot.lane.b32.xlu1 %v2089_v3, %s4114_s12 }
 0x468   :  { %v4916_v11 = vpop.f32.mrf.mxu1 }
 0x46a   :  { %v3930_v51 = vpop.eup %3929 }
 0x46b   :  { %v4893_v47 = vmul.f32 %v3930_v51, %v1846_v34  ;;  %2183 = vrot.lane.b32.xlu0 %v2083_v62, %s4112_s10  ;;  %2181 = vrot.lane.b32.xlu1 %v2089_v3, %s4113_s11 }
 0x46c   :  { %v3932_v15 = vpop.eup %3931 }
 0x46d   :  { %v4897_v38 = vmul.f32 %v3932_v15, %v1845_v9 }
 0x46f   :  { %2187 = vrot.lane.b32.xlu0 %v2083_v62, %s4110_s3  ;;  %2185 = vrot.lane.b32.xlu1 %v2089_v3, %s4112_s10 }
 0x473   :  { %2191 = vrot.lane.b32.xlu0 %v2083_v62, %s4111_s9  ;;  %2189 = vrot.lane.b32.xlu1 %v2089_v3, %s4110_s3 }
 0x477   :  { %2195 = vrot.lane.b32.xlu0 %v2083_v62, %s4109_s2  ;;  %2193 = vrot.lane.b32.xlu1 %v2089_v3, %s4111_s9 }
 0x47b   :  { %2201 = vrot.lane.b32.xlu0 %v4886_v1, %s4116_s13  ;;  %2197 = vrot.lane.b32.xlu1 %v2089_v3, %s4109_s2 }
 0x47f   :  { %2205 = vrot.lane.b32.xlu0 %v4886_v1, %s4114_s12  ;;  %2203 = vrot.lane.b32.xlu1 %v4908_v23, %s4116_s13 }
 0x483   :  { %2209 = vrot.lane.b32.xlu0 %v4886_v1, %s4113_s11 }
 0x484   :  { %v4920_v50 = vpop.f32.mrf.mxu1 }
 0x485   :  { %2907 = vrot.lane.b32.xlu1 %v4920_v50, %s4116_s13  ;;  %3862 = vmatprep.mubr.msk.f32.mxu1 %vm163_vm0, %v4920_v50 }
 0x486   :  { %v3698_v18 = vpop.f32.mrf.mxu0  ;;  %v4926_v4 = vpop.f32.mrf.mxu1 }
 0x487   :  { %2213 = vrot.lane.b32.xlu0 %v4886_v1, %s4112_s10  ;;  %v1298_v14 = vmul.f32 %v3698_v18, %v3698_v18  ;;  %v1300_v33 = vmul.f32 %v3698_v18, %v3695_v6 }
 0x488   :  { %v1106_v31 = vpop.f32.mrf.mxu0  ;;  %v4930_v21 = vpop.f32.mrf.mxu1 }
 0x489   :  { %2911 = vrot.lane.b32.xlu1 %v4920_v50, %s4114_s12  ;;  %3863 = vmatmul.mubr.msk.f32.vlgmr.msra.gmra.mxu1 %vm163_vm0, %v4930_v21  ;;  %v1297_v41 = vmul.f32 %v1106_v31, %v1106_v31  ;;  %v1299_v61 = vmul.f32 %v1106_v31, %v1096_v10  ;;  %v534_v10 = vmul.f32 %v4602_v58, %v4602_v58 }
 0x48a   :  { %v3701_v7 = vpop.f32.mrf.mxu0 }
 0x48b   :  { %2217 = vrot.lane.b32.xlu0 %v4886_v1, %s4110_s3  ;;  %v1302_v52 = vsub.f32 %v3701_v7, %v1296_v13 }
 0x48c   :  { %v1116_v28 = vpop.f32.mrf.mxu0 }
 0x48d   :  { %2915 = vrot.lane.b32.xlu1 %v4920_v50, %s4113_s11  ;;  %v1301_v30 = vsub.f32 %v1116_v28, %v1295_v19 }
 0x48e   :  { %v3704_v54 = vpop.f32.mrf.mxu0 }
 0x48f   :  { %v1304_v24 = vsub.f32 %v3704_v54, %v1298_v14  ;;  %2221 = vrot.lane.b32.xlu0 %v4886_v1, %s4111_s9  ;;  %v537_v54 = vmul.f32 %v535_v39, %v4600_v55 }
 0x490   :  { %v1126_v27 = vpop.f32.mrf.mxu0 }
 0x491   :  { %v1312_v17 = vadd.f32 %v1304_v24, %v1302_v52  ;;  %v1303_v53 = vsub.f32 %v1126_v27, %v1297_v41  ;;  %2919 = vrot.lane.b32.xlu1 %v4920_v50, %s4112_s10 }
 0x492   :  { %v3707_v56 = vpop.f32.mrf.mxu0 }
 0x493   :  { %v1314_v36 = vadd.f32 58.5225, %v1312_v17  ;;  %v1311_v12 = vadd.f32 %v1303_v53, %v1301_v30  ;;  %v1306_v32 = vsub.f32 %v3707_v56, %v1300_v33  ;;  %2225 = vrot.lane.b32.xlu0 %v4886_v1, %s4109_s2  ;;  %v536_v33 = vmul.f32 %v534_v10, %v4602_v58 }
 0x494   :  { %v1136_v46 = vpop.f32.mrf.mxu0 }
 0x495   :  { %3933 = vrcp.f32 %v1314_v36  ;;  %v1313_v57 = vadd.f32 58.5225, %v1311_v12  ;;  %v1305_v16 = vsub.f32 %v1136_v46, %v1299_v61  ;;  %2923 = vrot.lane.b32.xlu1 %v4920_v50, %s4110_s3  ;;  %v1308_v37 = vmul.f32 2.0, %v1306_v32 }
 0x496   :  { %v3710_v45 = vpop.f32.mrf.mxu0 }
 0x497   :  { %3935 = vrcp.f32 %v1313_v57  ;;  %2207 = vrot.lane.b32.xlu0 %v4908_v23, %s4114_s12  ;;  %v1324_v49 = vmul.f32 %v3710_v45, %v3710_v45  ;;  %v1307_v62 = vmul.f32 2.0, %v1305_v16  ;;  %v1310_v51 = vadd.f32 58.5225, %v1308_v37 }
 0x498   :  { %v1146_v59 = vpop.f32.mrf.mxu0 }
 0x499   :  { %2927 = vrot.lane.b32.xlu1 %v4920_v50, %s4111_s9  ;;  %v1323_v3 = vmul.f32 %v1146_v59, %v1146_v59  ;;  %v1309_v7 = vadd.f32 58.5225, %v1307_v62 }
 0x49a   :  { %v3713_v40 = vpop.f32.mrf.mxu0 }
 0x49b   :  { %v1328_v60 = vmul.f32 %v3713_v40, %v3710_v45  ;;  %2211 = vrot.lane.b32.xlu0 %v4908_v23, %s4113_s11  ;;  %v1326_v9 = vmul.f32 %v3713_v40, %v3713_v40 }
 0x49c   :  { %v1156_v48 = vpop.f32.mrf.mxu0 }
 0x49d   :  { %v1327_v0 = vmul.f32 %v1156_v48, %v1146_v59  ;;  %2233 = vrot.lane.b32.xlu1 %v4910_v8, %s4116_s13  ;;  %v1325_v28 = vmul.f32 %v1156_v48, %v1156_v48 }
 0x49e   :  { %v3716_v5 = vpop.f32.mrf.mxu0 }
 0x49f   :  { %v1330_v2 = vsub.f32 %v3716_v5, %v1324_v49  ;;  %2215 = vrot.lane.b32.xlu0 %v4908_v23, %s4112_s10 }
 0x4a0   :  { %v1166_v34 = vpop.f32.mrf.mxu0 }
 0x4a1   :  { %v1329_v15 = vsub.f32 %v1166_v34, %v1323_v3  ;;  %2909 = vrot.lane.b32.xlu1 %v4930_v21, %s4116_s13  ;;  %v1826_v34 = vmul.f32 %v4880_v44, %v4880_v44 }
 0x4a2   :  { %v3934_v6 = vpop.eup %3933  ;;  %v3719_v18 = vpop.f32.mrf.mxu0 }
 0x4a3   :  { %v1318_v31 = vmul.f32 %v3934_v6, %v1310_v51  ;;  %v1332_v13 = vsub.f32 %v3719_v18, %v1326_v9  ;;  %2219 = vrot.lane.b32.xlu0 %v4908_v23, %s4110_s3 }
 0x4a4   :  { %v3936_v14 = vpop.eup %3935  ;;  %v1176_v19 = vpop.f32.mrf.mxu0 }
 0x4a5   :  { %v1320_v41 = vmul.f32 %v1318_v31, %v1318_v31  ;;  %v1316_v52 = vmul.f32 %v3936_v14, %v1309_v7  ;;  %v1340_v24 = vadd.f32 %v1332_v13, %v1330_v2  ;;  %v1331_v27 = vsub.f32 %v1176_v19, %v1325_v28  ;;  %2913 = vrot.lane.b32.xlu1 %v4930_v21, %s4114_s12 }
 0x4a6   :  { %v3722_v30 = vpop.f32.mrf.mxu0  ;;  %v1825_v31 = vmul.f32 %v4882_v43, %v4882_v43  ;;  %v1828_v19 = vmul.f32 %v1826_v34, %v4880_v44 }
 0x4a7   :  { %v1322_v17 = vmul.f32 %v1320_v41, %v537_v54  ;;  %v1319_v53 = vmul.f32 %v1316_v52, %v1316_v52  ;;  %v1342_v56 = vadd.f32 58.5225, %v1340_v24  ;;  %v1339_v61 = vadd.f32 %v1331_v27, %v1329_v15  ;;  %2223 = vrot.lane.b32.xlu0 %v4908_v23, %s4111_s9 }
 0x4a8   :  { %v1334_v36 = vsub.f32 %v3722_v30, %v1328_v60  ;;  %v1186_v55 = vpop.f32.mrf.mxu0  ;;  %v1827_v30 = vmul.f32 %v1825_v31, %v4882_v43 }
 0x4a9   :  { %v1321_v12 = vmul.f32 %v1319_v53, %v536_v33  ;;  %3937 = vrcp.f32 %v1342_v56  ;;  %v1341_v32 = vadd.f32 58.5225, %v1339_v61  ;;  %v1333_v46 = vsub.f32 %v1186_v55, %v1327_v0  ;;  %2917 = vrot.lane.b32.xlu1 %v4930_v21, %s4113_s11 }
 0x4aa   :  { %v3725_v57 = vpop.f32.mrf.mxu0  ;;  %v1336_v40 = vmul.f32 2.0, %v1334_v36  ;;  %v5006_v36 = vpop.f32.mrf.mxu1 }
 0x4ab   :  { %3939 = vrcp.f32 %v1341_v32  ;;  %2227 = vrot.lane.b32.xlu0 %v4908_v23, %s4109_s2  ;;  %v1350_v60 = vmul.f32 %v3725_v57, %v3725_v57  ;;  %v1335_v49 = vmul.f32 2.0, %v1333_v46 }
 0x4ac   :  { %v1196_v58 = vpop.f32.mrf.mxu0  ;;  %v1338_v3 = vadd.f32 58.5225, %v1336_v40 }
 0x4ad   :  { %2921 = vrot.lane.b32.xlu1 %v4930_v21, %s4112_s10  ;;  %v1349_v0 = vmul.f32 %v1196_v58, %v1196_v58  ;;  %v1337_v15 = vadd.f32 58.5225, %v1335_v49 }
 0x4ae   :  { %v3728_v16 = vpop.f32.mrf.mxu0 }
 0x4af   :  { %v1354_v45 = vmul.f32 %v3728_v16, %v3725_v57  ;;  %2931 = vrot.lane.b32.xlu0 %v4920_v50, %s4109_s2  ;;  %v1352_v2 = vmul.f32 %v3728_v16, %v3728_v16 }
 0x4b0   :  { %v1206_v59 = vpop.f32.mrf.mxu0 }
 0x4b1   :  { %v1353_v48 = vmul.f32 %v1206_v59, %v1196_v58  ;;  %2925 = vrot.lane.b32.xlu1 %v4930_v21, %s4110_s3  ;;  %v1351_v6 = vmul.f32 %v1206_v59, %v1206_v59 }
 0x4b2   :  { %v3731_v37 = vpop.f32.mrf.mxu0 }
 0x4b3   :  { %v1356_v5 = vsub.f32 %v3731_v37, %v1350_v60  ;;  %2231 = vrot.lane.b32.xlu0 %v4916_v11, %s4116_s13 }
 0x4b4   :  { %v1216_v62 = vpop.f32.mrf.mxu0 }
 0x4b5   :  { %v1355_v39 = vsub.f32 %v1216_v62, %v1349_v0  ;;  %2929 = vrot.lane.b32.xlu1 %v4930_v21, %s4111_s9  ;;  %v563_v0 = vmul.f32 %v4604_v20, %v4604_v20 }
 0x4b6   :  { %v3938_v50 = vpop.eup %3937  ;;  %v3734_v51 = vpop.f32.mrf.mxu0 }
 0x4b7   :  { %v1346_v9 = vmul.f32 %v3938_v50, %v1338_v3  ;;  %v1358_v10 = vsub.f32 %v3734_v51, %v1352_v2  ;;  %2235 = vrot.lane.b32.xlu0 %v4916_v11, %s4114_s12  ;;  %v562_v3 = vmul.f32 %v4610_v26, %v4610_v26  ;;  %v565_v50 = vmul.f32 %v563_v0, %v4604_v20 }
 0x4b8   :  { %v3940_v18 = vpop.eup %3939  ;;  %v1226_v7 = vpop.f32.mrf.mxu0 }
 0x4b9   :  { %v1348_v28 = vmul.f32 %v1346_v9, %v1322_v17  ;;  %v1344_v13 = vmul.f32 %v3940_v18, %v1337_v15  ;;  %v1366_v14 = vadd.f32 %v1358_v10, %v1356_v5  ;;  %v1357_v54 = vsub.f32 %v1226_v7, %v1351_v6  ;;  %2933 = vrot.lane.b32.xlu1 %v4930_v21, %s4109_s2 }
 0x4ba   :  { %v3737_v41 = vpop.f32.mrf.mxu0  ;;  %v564_v15 = vmul.f32 %v562_v3, %v4610_v26 }
 0x4bb   :  { %v1347_v52 = vmul.f32 %v1344_v13, %v1321_v12  ;;  %v1368_v24 = vadd.f32 58.5225, %v1366_v14  ;;  %v1365_v27 = vadd.f32 %v1357_v54, %v1355_v39  ;;  %v1360_v33 = vsub.f32 %v3737_v41, %v1354_v45  ;;  %2237 = vrot.lane.b32.xlu0 %v4910_v8, %s4114_s12 }
 0x4bc   :  { %v1236_v53 = vpop.f32.mrf.mxu0  ;;  %v4998_v17 = vmul.f32 %v1828_v19, %v1348_v28  ;;  %v1856_v19 = vmul.f32 %v4893_v47, %v4893_v47 }
 0x4bd   :  { %3941 = vrcp.f32 %v1368_v24  ;;  %v1367_v56 = vadd.f32 58.5225, %v1365_v27  ;;  %v1359_v61 = vsub.f32 %v1236_v53, %v1353_v48  ;;  %2937 = vrot.lane.b32.xlu1 %v4926_v4, %s4116_s13  ;;  %v5002_v21 = vmul.f32 %v1827_v30, %v1347_v52 }
 0x4be   :  { %v3740_v44 = vpop.f32.mrf.mxu0  ;;  %v1362_v16 = vmul.f32 2.0, %v1360_v33  ;;  %v1858_v30 = vmul.f32 %v1856_v19, %v4893_v47 }
 0x4bf   :  { %3943 = vrcp.f32 %v1367_v56  ;;  %2239 = vrot.lane.b32.xlu0 %v4916_v11, %s4113_s11  ;;  %v1378_v43 = vmul.f32 %v3740_v44, %v3740_v44  ;;  %v1361_v60 = vmul.f32 2.0, %v1359_v61 }
 0x4c0   :  { %v1246_v55 = vpop.f32.mrf.mxu0  ;;  %v1364_v5 = vadd.f32 58.5225, %v1362_v16 }
 0x4c1   :  { %2939 = vrot.lane.b32.xlu1 %v5006_v36, %s4116_s13  ;;  %v1377_v32 = vmul.f32 %v1246_v55, %v1246_v55  ;;  %v1384_v45 = vsub.f32 %v4615_v22, %v1378_v43  ;;  %v1363_v2 = vadd.f32 58.5225, %v1361_v60 }
 0x4c2   :  { %v3743_v12 = vpop.f32.mrf.mxu0 }
 0x4c3   :  { %v1380_v46 = vmul.f32 %v3743_v12, %v3743_v12  ;;  %v1382_v57 = vmul.f32 %v3743_v12, %v3740_v44  ;;  %2241 = vrot.lane.b32.xlu0 %v4910_v8, %s4113_s11  ;;  %v1383_v48 = vsub.f32 %v4617_v29, %v1377_v32 }
 0x4c4   :  { %v1256_v58 = vpop.f32.mrf.mxu0 }
 0x4c5   :  { %v1386_v59 = vsub.f32 %v4621_v42, %v1380_v46  ;;  %v1379_v40 = vmul.f32 %v1256_v58, %v1256_v58  ;;  %2941 = vrot.lane.b32.xlu1 %v4926_v4, %s4114_s12  ;;  %v1381_v9 = vmul.f32 %v1256_v58, %v1246_v55  ;;  %v1388_v18 = vsub.f32 %v4627_v35, %v1382_v57 }
 0x4c6   :  { %v1855_v35 = vmul.f32 %v4897_v38, %v4897_v38 }
 0x4c7   :  { %v1394_v37 = vadd.f32 %v1386_v59, %v1384_v45  ;;  %v1385_v49 = vsub.f32 %v4625_v25, %v1379_v40  ;;  %2945 = vrot.lane.b32.xlu0 %v4926_v4, %s4113_s11  ;;  %v1387_v7 = vsub.f32 %v4631_v63, %v1381_v9  ;;  %v1390_v20 = vmul.f32 2.0, %v1388_v18 }
 0x4c8   :  { %v1857_v61 = vmul.f32 %v1855_v35, %v4897_v38 }
 0x4c9   :  { %v1396_v22 = vadd.f32 58.5225, %v1394_v37  ;;  %v1393_v62 = vadd.f32 %v1385_v49, %v1383_v48  ;;  %2943 = vrot.lane.b32.xlu1 %v5006_v36, %s4114_s12  ;;  %v1389_v13 = vmul.f32 2.0, %v1387_v7  ;;  %v1392_v26 = vadd.f32 58.5225, %v1390_v20 }
 0x4ca   :  { %v3942_v42 = vpop.eup %3941 }
 0x4cb   :  { %v1372_v29 = vmul.f32 %v3942_v42, %v1364_v5  ;;  %3945 = vrcp.f32 %v1396_v22  ;;  %v1395_v25 = vadd.f32 58.5225, %v1393_v62  ;;  %v1391_v52 = vadd.f32 58.5225, %v1389_v13 }
 0x4cc   :  { %v3944_v39 = vpop.eup %3943 }
 0x4cd   :  { %v1374_v34 = vmul.f32 %v1372_v29, %v1372_v29  ;;  %v1370_v51 = vmul.f32 %v3944_v39, %v1363_v2  ;;  %3947 = vrcp.f32 %v1395_v25  ;;  %2947 = vrot.lane.b32.xlu1 %v5006_v36, %s4113_s11 }
 0x4cf   :  { %v1376_v6 = vmul.f32 %v1374_v34, %v565_v50  ;;  %v1373_v10 = vmul.f32 %v1370_v51, %v1370_v51 }
 0x4d1   :  { %v1375_v31 = vmul.f32 %v1373_v10, %v564_v15  ;;  %v2172_v28 = vpop.permute.xlu0 %2171 }
 0x4d2   :  { %3801 = vmatprep.mubr.msk.f32.mxu0 %vm163_vm0, %v2172_v28 }
 0x4d5   :  { %v2176_v14 = vpop.permute.xlu0 %2175  ;;  %v2174_v54 = vpop.permute.xlu1 %2173 }
 0x4d6   :  { %3802 = vmatmul.mubr.msk.f32.gmra.mxu0 %vm163_vm0, %v2174_v54 }
 0x4d7   :  { %3804 = vmatprep.mubr.msk.f32.mxu0 %vm163_vm0, %v2176_v14 }
 0x4d8   :  { %v3946_v41 = vpop.eup %3945 }
 0x4d9   :  { %v1400_v63 = vmul.f32 %v3946_v41, %v1392_v26  ;;  %v2180_v24 = vpop.permute.xlu0 %2179  ;;  %v2178_v27 = vpop.permute.xlu1 %2177 }
 0x4da   :  { %v3948_v33 = vpop.eup %3947  ;;  %3805 = vmatmul.mubr.msk.f32.gmra.mxu0 %vm163_vm0, %v2178_v27 }
 0x4db   :  { %v1402_v53 = vmul.f32 %v1400_v63, %v1376_v6  ;;  %v1398_v56 = vmul.f32 %v3948_v33, %v1391_v52  ;;  %3807 = vmatprep.mubr.msk.f32.mxu0 %vm163_vm0, %v2180_v24 }
 0x4dd   :  { %v1401_v44 = vmul.f32 %v1398_v56, %v1375_v31  ;;  %v2184_v55 = vpop.permute.xlu0 %2183  ;;  %v2182_v43 = vpop.permute.xlu1 %2181  ;;  %v5043_v12 = vmul.f32 %v1858_v30, %v1402_v53 }
 0x4de   :  { %3808 = vmatmul.mubr.msk.f32.gmra.mxu0 %vm163_vm0, %v2182_v43 }
 0x4df   :  { %3810 = vmatprep.mubr.msk.f32.mxu0 %vm163_vm0, %v2184_v55  ;;  %v5047_v32 = vmul.f32 %v1857_v61, %v1401_v44 }
 0x4e1   :  { %v2188_v46 = vpop.permute.xlu0 %2187  ;;  %v2186_v57 = vpop.permute.xlu1 %2185 }
 0x4e2   :  { %3811 = vmatmul.mubr.msk.f32.gmra.mxu0 %vm163_vm0, %v2186_v57 }
 0x4e3   :  { %3813 = vmatprep.mubr.msk.f32.mxu0 %vm163_vm0, %v2188_v46 }
 0x4e5   :  { %v2192_v47 = vpop.permute.xlu0 %2191  ;;  %v2190_v58 = vpop.permute.xlu1 %2189 }
 0x4e6   :  { %3814 = vmatmul.mubr.msk.f32.gmra.mxu0 %vm163_vm0, %v2190_v58 }
 0x4e7   :  { %3816 = vmatprep.mubr.msk.f32.mxu0 %vm163_vm0, %v2192_v47 }
 0x4e9   :  { %v2196_v38 = vpop.permute.xlu0 %2195  ;;  %v2194_v16 = vpop.permute.xlu1 %2193 }
 0x4ea   :  { %3817 = vmatmul.mubr.msk.f32.gmra.mxu0 %vm163_vm0, %v2194_v16 }
 0x4eb   :  { %3819 = vmatprep.mubr.msk.f32.mxu0 %vm163_vm0, %v2196_v38 }
 0x4ed   :  { %v2202_v45 = vpop.permute.xlu0 %2201  ;;  %v2198_v59 = vpop.permute.xlu1 %2197 }
 0x4ee   :  { %3820 = vmatmul.mubr.msk.f32.gmra.mxu0 %vm163_vm0, %v2198_v59 }
 0x4ef   :  { %3822 = vmatprep.mubr.msk.f32.mxu0 %vm163_vm0, %v4886_v1 }
 0x4f1   :  { %v2206_v40 = vpop.permute.xlu0 %2205  ;;  %v2204_v60 = vpop.permute.xlu1 %2203 }
 0x4f2   :  { %3823 = vmatmul.mubr.msk.f32.gmra.mxu0 %vm163_vm0, %v4908_v23 }
 0x4f3   :  { %3825 = vmatprep.mubr.msk.f32.mxu0 %vm163_vm0, %v2202_v45 }
 0x4f5   :  { %v2210_v48 = vpop.permute.xlu0 %2209 }
 0x4f6   :  { %3826 = vmatmul.mubr.msk.f32.gmra.mxu0 %vm163_vm0, %v2204_v60 }
 0x4f7   :  { %3828 = vmatprep.mubr.msk.f32.mxu0 %vm163_vm0, %v2206_v40  ;;  %v2908_v37 = vpop.permute.xlu1 %2907 }
 0x4f8   :  { %3865 = vmatprep.mubr.msk.f32.mxu1 %vm163_vm0, %v2908_v37 }
 0x4f9   :  { %v2214_v49 = vpop.permute.xlu0 %2213 }
 0x4fb   :  { %v2912_v0 = vpop.permute.xlu1 %2911 }
 0x4fd   :  { %v2218_v5 = vpop.permute.xlu0 %2217 }
 0x4ff   :  { %v2916_v22 = vpop.permute.xlu1 %2915 }
 0x501   :  { %v2222_v1 = vpop.permute.xlu0 %2221 }
 0x503   :  { %v2920_v62 = vpop.permute.xlu1 %2919 }
 0x505   :  { %v2226_v42 = vpop.permute.xlu0 %2225 }
 0x507   :  { %v2924_v3 = vpop.permute.xlu1 %2923 }
 0x509   :  { %v2208_v23 = vpop.permute.xlu0 %2207 }
 0x50a   :  { %3829 = vmatmul.mubr.msk.f32.gmra.mxu0 %vm163_vm0, %v2208_v23 }
 0x50b   :  { %3831 = vmatprep.mubr.msk.f32.mxu0 %vm163_vm0, %v2210_v48  ;;  %v2928_v29 = vpop.permute.xlu1 %2927 }
 0x50d   :  { %v2212_v2 = vpop.permute.xlu0 %2211 }
 0x50e   :  { %3832 = vmatmul.mubr.msk.f32.gmra.mxu0 %vm163_vm0, %v2212_v2 }
 0x50f   :  { %3834 = vmatprep.mubr.msk.f32.mxu0 %vm163_vm0, %v2214_v49  ;;  %v2234_v25 = vpop.permute.xlu1 %2233 }
 0x511   :  { %v2216_v39 = vpop.permute.xlu0 %2215 }
 0x512   :  { %3835 = vmatmul.mubr.msk.f32.gmra.mxu0 %vm163_vm0, %v2216_v39 }
 0x513   :  { %3837 = vmatprep.mubr.msk.f32.mxu0 %vm163_vm0, %v2218_v5  ;;  %v2910_v50 = vpop.permute.xlu1 %2909 }
 0x514   :  { %3866 = vmatmul.mubr.msk.f32.gmra.mxu1 %vm163_vm0, %v2910_v50 }
 0x515   :  { %v2220_v34 = vpop.permute.xlu0 %2219  ;;  %3868 = vmatprep.mubr.msk.f32.mxu1 %vm163_vm0, %v2912_v0 }
 0x516   :  { %3838 = vmatmul.mubr.msk.f32.gmra.mxu0 %vm163_vm0, %v2220_v34 }
 0x517   :  { %3840 = vmatprep.mubr.msk.f32.mxu0 %vm163_vm0, %v2222_v1  ;;  %v2914_v51 = vpop.permute.xlu1 %2913 }
 0x518   :  { %3869 = vmatmul.mubr.msk.f32.gmra.mxu1 %vm163_vm0, %v2914_v51 }
 0x519   :  { %v2224_v9 = vpop.permute.xlu0 %2223  ;;  %3871 = vmatprep.mubr.msk.f32.mxu1 %vm163_vm0, %v2916_v22 }
 0x51a   :  { %3841 = vmatmul.mubr.msk.f32.gmra.mxu0 %vm163_vm0, %v2224_v9 }
 0x51b   :  { %3843 = vmatprep.mubr.msk.f32.mxu0 %vm163_vm0, %v2226_v42  ;;  %v2918_v15 = vpop.permute.xlu1 %2917 }
 0x51c   :  { %3872 = vmatmul.mubr.msk.f32.gmra.mxu1 %vm163_vm0, %v2918_v15 }
 0x51d   :  { %v2228_v6 = vpop.permute.xlu0 %2227  ;;  %3874 = vmatprep.mubr.msk.f32.mxu1 %vm163_vm0, %v2920_v62 }
 0x51e   :  { %3844 = vmatmul.mubr.msk.f32.gmra.mxu0 %vm163_vm0, %v2228_v6 }
 0x51f   :  { %v2922_v10 = vpop.permute.xlu1 %2921  ;;  %3846 = vmatprep.mubr.msk.f32.mxu0 %vm163_vm0, %v4916_v11 }
 0x520   :  { %3875 = vmatmul.mubr.msk.f32.gmra.mxu1 %vm163_vm0, %v2922_v10 }
 0x521   :  { %v2932_v18 = vpop.permute.xlu0 %2931  ;;  %3877 = vmatprep.mubr.msk.f32.mxu1 %vm163_vm0, %v2924_v3 }
 0x522   :  { %3847 = vmatmul.mubr.msk.f32.gmra.mxu0 %vm163_vm0, %v4910_v8 }
 0x523   :  { %v2926_v31 = vpop.permute.xlu1 %2925 }
 0x524   :  { %3878 = vmatmul.mubr.msk.f32.gmra.mxu1 %vm163_vm0, %v2926_v31  ;;  %v3800_v35 = vpop.f32.mrf.mxu0 }
 0x525   :  { %v2232_v7 = vpop.permute.xlu0 %2231  ;;  %3880 = vmatprep.mubr.msk.f32.mxu1 %vm163_vm0, %v2928_v29  ;;  %v2589_v30 = vmul.f32 %v3800_v35, %v3800_v35 }
 0x526   :  { %3849 = vmatprep.mubr.msk.f32.mxu0 %vm163_vm0, %v2232_v7  ;;  %v2389_v63 = vpop.f32.mrf.mxu0 }
 0x527   :  { %v2930_v28 = vpop.permute.xlu1 %2929  ;;  %3850 = vmatmul.mubr.msk.f32.gmra.mxu0 %vm163_vm0, %v2234_v25  ;;  %v2588_v61 = vmul.f32 %v2389_v63, %v2389_v63 }
 0x528   :  { %3881 = vmatmul.mubr.msk.f32.gmra.mxu1 %vm163_vm0, %v2930_v28 }
 0x529   :  { %v2236_v11 = vpop.permute.xlu0 %2235  ;;  %3883 = vmatprep.mubr.msk.f32.mxu1 %vm163_vm0, %v2932_v18 }
 0x52a   :  { %3852 = vmatprep.mubr.msk.f32.mxu0 %vm163_vm0, %v2236_v11 }
 0x52b   :  { %v2934_v20 = vpop.permute.xlu1 %2933 }
 0x52c   :  { %3884 = vmatmul.mubr.msk.f32.gmra.mxu1 %vm163_vm0, %v2934_v20 }
 0x52d   :  { %v2238_v8 = vpop.permute.xlu0 %2237  ;;  %3886 = vmatprep.mubr.msk.f32.mxu1 %vm163_vm0, %v4926_v4 }
 0x52e   :  { %3853 = vmatmul.mubr.msk.f32.gmra.mxu0 %vm163_vm0, %v2238_v8 }
 0x52f   :  { %v2938_v13 = vpop.permute.xlu1 %2937 }
 0x530   :  { %3887 = vmatmul.mubr.msk.f32.gmra.mxu1 %vm163_vm0, %v5006_v36 }
 0x531   :  { %v2240_v14 = vpop.permute.xlu0 %2239  ;;  %3889 = vmatprep.mubr.msk.f32.mxu1 %vm163_vm0, %v2938_v13 }
 0x532   :  { %3855 = vmatprep.mubr.msk.f32.mxu0 %vm163_vm0, %v2240_v14 }
 0x533   :  { %v2940_v54 = vpop.permute.xlu1 %2939 }
 0x534   :  { %3890 = vmatmul.mubr.msk.f32.gmra.mxu1 %vm163_vm0, %v2940_v54 }
 0x535   :  { %v2242_v19 = vpop.permute.xlu0 %2241 }
 0x536   :  { %3856 = vmatmul.mubr.msk.f32.gmra.mxu0 %vm163_vm0, %v2242_v19 }
 0x537   :  { %v2942_v26 = vpop.permute.xlu1 %2941 }
 0x538   :  { %3892 = vmatprep.mubr.msk.f32.mxu1 %vm163_vm0, %v2942_v26 }
 0x539   :  { %v2946_v41 = vpop.permute.xlu0 %2945 }
 0x53b   :  { %v2944_v4 = vpop.permute.xlu1 %2943 }
 0x53c   :  { %3893 = vmatmul.mubr.msk.f32.gmra.mxu1 %vm163_vm0, %v2944_v4 }
 0x53d   :  { %3895 = vmatprep.mubr.msk.f32.mxu1 %vm163_vm0, %v2946_v41 }
 0x53f   :  { %v2948_v36 = vpop.permute.xlu1 %2947 }
 0x540   :  { %3896 = vmatmul.mubr.msk.f32.gmra.mxu1 %vm163_vm0, %v2948_v36 }
 0x596   :  { %v3803_v52 = vpop.f32.mrf.mxu0 }
 0x597   :  { %v2591_v53 = vmul.f32 %v3803_v52, %v3803_v52  ;;  %v2593_v57 = vmul.f32 %v3803_v52, %v3800_v35 }
 0x598   :  { %v2399_v24 = vpop.f32.mrf.mxu0 }
 0x599   :  { %v2590_v44 = vmul.f32 %v2399_v24, %v2399_v24  ;;  %v2592_v45 = vmul.f32 %v2399_v24, %v2389_v63 }
 0x59a   :  { %v3806_v27 = vpop.f32.mrf.mxu0 }
 0x59b   :  { %v2595_v55 = vsub.f32 %v3806_v27, %v2589_v30 }
 0x59c   :  { %v2409_v33 = vpop.f32.mrf.mxu0 }
 0x59d   :  { %v2594_v47 = vsub.f32 %v2409_v33, %v2588_v61 }
 0x59e   :  { %v3809_v56 = vpop.f32.mrf.mxu0 }
 0x59f   :  { %v2597_v43 = vsub.f32 %v3809_v56, %v2591_v53 }
 0x5a0   :  { %v2419_v46 = vpop.f32.mrf.mxu0 }
 0x5a1   :  { %v2605_v58 = vadd.f32 %v2597_v43, %v2595_v55  ;;  %v2596_v38 = vsub.f32 %v2419_v46, %v2590_v44 }
 0x5a2   :  { %v3812_v16 = vpop.f32.mrf.mxu0 }
 0x5a3   :  { %v2607_v59 = vadd.f32 58.5225, %v2605_v58  ;;  %v2604_v40 = vadd.f32 %v2596_v38, %v2594_v47  ;;  %v2599_v60 = vsub.f32 %v3812_v16, %v2593_v57  ;;  %v3864_v57 = vpop.f32.mrf.mxu1 }
 0x5a4   :  { %v2429_v48 = vpop.f32.mrf.mxu0 }
 0x5a5   :  { %3949 = vrcp.f32 %v2607_v59  ;;  %v2606_v37 = vadd.f32 58.5225, %v2604_v40  ;;  %v2598_v49 = vsub.f32 %v2429_v48, %v2592_v45  ;;  %v2601_v62 = vmul.f32 2.0, %v2599_v60  ;;  %v3063_v38 = vpop.f32.mrf.mxu1 }
 0x5a6   :  { %v3815_v0 = vpop.f32.mrf.mxu0 }
 0x5a7   :  { %3951 = vrcp.f32 %v2606_v37  ;;  %v2600_v42 = vmul.f32 2.0, %v2598_v49  ;;  %v2603_v29 = vadd.f32 58.5225, %v2601_v62  ;;  %v2615_v2 = vmul.f32 %v3815_v0, %v3815_v0 }
 0x5a8   :  { %v2439_v5 = vpop.f32.mrf.mxu0  ;;  %v3183_v62 = vmul.f32 %v3864_v57, %v3864_v57 }
 0x5a9   :  { %v2602_v50 = vadd.f32 58.5225, %v2600_v42  ;;  %v2614_v34 = vmul.f32 %v2439_v5, %v2439_v5 }
 0x5aa   :  { %v3818_v22 = vpop.f32.mrf.mxu0 }
 0x5ab   :  { %v2617_v25 = vmul.f32 %v3818_v22, %v3818_v22  ;;  %v2619_v4 = vmul.f32 %v3818_v22, %v3815_v0 }
 0x5ac   :  { %v2449_v1 = vpop.f32.mrf.mxu0 }
 0x5ad   :  { %v2616_v15 = vmul.f32 %v2449_v1, %v2449_v1  ;;  %v2618_v36 = vmul.f32 %v2449_v1, %v2439_v5 }
 0x5ae   :  { %v3821_v3 = vpop.f32.mrf.mxu0 }
 0x5af   :  { %v2621_v6 = vsub.f32 %v3821_v3, %v2615_v2  ;;  %v3182_v2 = vmul.f32 %v3063_v38, %v3063_v38 }
 0x5b0   :  { %v2459_v23 = vpop.f32.mrf.mxu0 }
 0x5b1   :  { %v2620_v31 = vsub.f32 %v2459_v23, %v2614_v34 }
 0x5b2   :  { %v3950_v39 = vpop.eup %3949  ;;  %v3824_v51 = vpop.f32.mrf.mxu0 }
 0x5b3   :  { %v2611_v9 = vmul.f32 %v3950_v39, %v2603_v29  ;;  %v2623_v10 = vsub.f32 %v3824_v51, %v2617_v25 }
 0x5b4   :  { %v3952_v18 = vpop.eup %3951  ;;  %v2469_v7 = vpop.f32.mrf.mxu0 }
 0x5b5   :  { %v2613_v28 = vmul.f32 %v2611_v9, %v4998_v17  ;;  %v2609_v11 = vmul.f32 %v3952_v18, %v2602_v50  ;;  %v2631_v20 = vadd.f32 %v2623_v10, %v2621_v6  ;;  %v2622_v8 = vsub.f32 %v2469_v7, %v2616_v15 }
 0x5b6   :  { %v3827_v19 = vpop.f32.mrf.mxu0 }
 0x5b7   :  { %v2612_v13 = vmul.f32 %v2609_v11, %v5002_v21  ;;  %v2633_v14 = vadd.f32 58.5225, %v2631_v20  ;;  %v2630_v54 = vadd.f32 %v2622_v8, %v2620_v31  ;;  %v2625_v35 = vsub.f32 %v3827_v19, %v2619_v4 }
 0x5b8   :  { %v2479_v41 = vpop.f32.mrf.mxu0 }
 0x5b9   :  { %3953 = vrcp.f32 %v2633_v14  ;;  %v2632_v26 = vadd.f32 58.5225, %v2630_v54  ;;  %v2624_v63 = vsub.f32 %v2479_v41, %v2618_v36  ;;  %v2627_v52 = vmul.f32 2.0, %v2625_v35 }
 0x5bb   :  { %3955 = vrcp.f32 %v2632_v26  ;;  %v2626_v24 = vmul.f32 2.0, %v2624_v63  ;;  %v2629_v27 = vadd.f32 58.5225, %v2627_v52 }
 0x5bd   :  { %v2628_v30 = vadd.f32 58.5225, %v2626_v24 }
 0x5c6   :  { %v3954_v17 = vpop.eup %3953 }
 0x5c7   :  { %v2637_v33 = vmul.f32 %v3954_v17, %v2629_v27 }
 0x5c8   :  { %v3956_v53 = vpop.eup %3955 }
 0x5c9   :  { %v2639_v56 = vmul.f32 %v2637_v33, %v2637_v33  ;;  %v2635_v21 = vmul.f32 %v3956_v53, %v2628_v30 }
 0x5ca   :  { %v5110_v61 = vpop.f32.mrf.mxu0 }
 0x5cb   :  { %v5112_v44 = vmul.f32 %v2639_v56, %v2613_v28  ;;  %v2638_v55 = vmul.f32 %v2635_v21, %v2635_v21  ;;  %v2643_v28 = vmul.f32 %v5110_v61, %v5110_v61 }
 0x5cc   :  { %v5114_v43 = vpop.f32.mrf.mxu0 }
 0x5cd   :  { %v5116_v46 = vmul.f32 %v2638_v55, %v2612_v13  ;;  %v2642_v54 = vmul.f32 %v5114_v43, %v5114_v43 }
 0x5ce   :  { %v5118_v47 = vpop.f32.mrf.mxu0 }
 0x5cf   :  { %v2645_v10 = vmul.f32 %v5118_v47, %v5118_v47 }
 0x5d0   :  { %v5120_v58 = vpop.f32.mrf.mxu0 }
 0x5d1   :  { %v2644_v11 = vmul.f32 %v5120_v58, %v5120_v58 }
 0x5d2   :  { %v3836_v16 = vpop.f32.mrf.mxu0 }
 0x5d3   :  { %v2649_v19 = vsub.f32 %v3836_v16, %v2643_v28 }
 0x5d4   :  { %v2509_v45 = vpop.f32.mrf.mxu0  ;;  %v3867_v59 = vpop.f32.mrf.mxu1 }
 0x5d5   :  { %v3185_v5 = vmul.f32 %v3867_v59, %v3867_v59  ;;  %v2648_v63 = vsub.f32 %v2509_v45, %v2642_v54  ;;  %v3187_v45 = vmul.f32 %v3867_v59, %v3864_v57 }
 0x5d6   :  { %v3839_v40 = vpop.f32.mrf.mxu0  ;;  %v3073_v60 = vpop.f32.mrf.mxu1 }
 0x5d7   :  { %v3184_v42 = vmul.f32 %v3073_v60, %v3073_v60  ;;  %v3217_v20 = vadd.f32 %v3185_v5, %v3183_v62  ;;  %v2651_v8 = vsub.f32 %v3839_v40, %v2645_v10 }
 0x5d8   :  { %v2519_v48 = vpop.f32.mrf.mxu0  ;;  %v3870_v37 = vpop.f32.mrf.mxu1 }
 0x5d9   :  { %v3189_v25 = vsub.f32 %v3870_v37, %v3183_v62  ;;  %v3216_v26 = vadd.f32 %v3184_v42, %v3182_v2  ;;  %v2650_v4 = vsub.f32 %v2519_v48, %v2644_v11  ;;  %v3219_v52 = vadd.f32 6.5025, %v3217_v20 }
 0x5da   :  { %v5122_v49 = vpop.f32.mrf.mxu0  ;;  %v3083_v0 = vpop.f32.mrf.mxu1  ;;  %v2659_v24 = vadd.f32 %v2651_v8, %v2649_v19  ;;  %v3186_v48 = vmul.f32 %v3073_v60, %v3063_v38 }
 0x5db   :  { %v3188_v51 = vsub.f32 %v3083_v0, %v3182_v2  ;;  %v3218_v17 = vadd.f32 6.5025, %v3216_v26  ;;  %v2658_v33 = vadd.f32 %v2650_v4, %v2648_v63 }
 0x5dc   :  { %v5124_v22 = vpop.f32.mrf.mxu0  ;;  %v3873_v1 = vpop.f32.mrf.mxu1  ;;  %v2661_v40 = vadd.f32 58.5225, %v2659_v24 }
 0x5dd   :  { %v3191_v3 = vsub.f32 %v3873_v1, %v3185_v5  ;;  %v2660_v2 = vadd.f32 58.5225, %v2658_v33 }
 0x5de   :  { %v5126_v23 = vpop.f32.mrf.mxu0  ;;  %v3093_v29 = vpop.f32.mrf.mxu1 }
 0x5df   :  { %v3190_v39 = vsub.f32 %v3093_v29, %v3184_v42  ;;  %v3199_v9 = vadd.f32 %v3191_v3, %v3189_v25  ;;  %v2669_v56 = vmul.f32 %v5126_v23, %v5126_v23 }
 0x5e0   :  { %v5128_v50 = vpop.f32.mrf.mxu0  ;;  %v5130_v34 = vpop.f32.mrf.mxu1 }
 0x5e1   :  { %v3198_v18 = vadd.f32 %v3190_v39, %v3188_v51  ;;  %v3201_v13 = vadd.f32 58.5225, %v3199_v9  ;;  %v2668_v3 = vmul.f32 %v5128_v50, %v5128_v50  ;;  %v3193_v29 = vsub.f32 %v5130_v34, %v3187_v45 }
 0x5e2   :  { %v5132_v15 = vpop.f32.mrf.mxu0  ;;  %v5134_v6 = vpop.f32.mrf.mxu1 }
 0x5e3   :  { %v3200_v41 = vadd.f32 58.5225, %v3198_v18  ;;  %3957 = vrcp.f32 %v3201_v13  ;;  %v2671_v21 = vmul.f32 %v5132_v15, %v5132_v15  ;;  %v3192_v39 = vsub.f32 %v5134_v6, %v3186_v48 }
 0x5e4   :  { %v5138_v31 = vpop.f32.mrf.mxu0  ;;  %v5140_v7 = vpop.f32.mrf.mxu1  ;;  %v3195_v34 = vmul.f32 2.0, %v3193_v29 }
 0x5e5   :  { %3959 = vrcp.f32 %v3200_v41  ;;  %v2670_v57 = vmul.f32 %v5138_v31, %v5138_v31  ;;  %v3194_v26 = vmul.f32 2.0, %v3192_v39 }
 0x5e6   :  { %v5146_v14 = vpop.f32.mrf.mxu1  ;;  %3961 = vrcp.f32 %v3219_v52 }
 0x5e7   :  { %v3851_v36 = vpop.f32.mrf.mxu0  ;;  %3963 = vrcp.f32 %v3218_v17  ;;  %v3197_v17 = vadd.f32 58.5225, %v3195_v34 }
 0x5e8   :  { %v5150_v35 = vpop.f32.mrf.mxu1  ;;  %v2675_v5 = vsub.f32 %v3851_v36, %v2669_v56  ;;  %3965 = vrcp.f32 %v2661_v40 }
 0x5e9   :  { %v2559_v30 = vpop.f32.mrf.mxu0  ;;  %v3225_v55 = vmul.f32 %v5150_v35, %v5150_v35 }
 0x5ea   :  { %v5152_v27 = vpop.f32.mrf.mxu1  ;;  %v2674_v51 = vsub.f32 %v2559_v30, %v2668_v3  ;;  %v2673_v30 = vmul.f32 %v5132_v15, %v5126_v23  ;;  %v2646_v23 = vmul.f32 %v5120_v58, %v5114_v43  ;;  %v3212_v15 = vmul.f32 2.0, %v3186_v48 }
 0x5eb   :  { %v3224_v38 = vmul.f32 %v5152_v27, %v5152_v27 }
 0x5ec   :  { %v5154_v53 = vpop.f32.mrf.mxu1 }
 0x5ed   :  { %v3227_v16 = vmul.f32 %v5154_v53, %v5154_v53 }
 0x5ee   :  { %v3854_v37 = vpop.f32.mrf.mxu0  ;;  %v5164_v0 = vpop.f32.mrf.mxu1 }
 0x5ef   :  { %v3259_v1 = vadd.f32 %v3227_v16, %v3225_v55  ;;  %v2677_v62 = vsub.f32 %v3854_v37, %v2671_v21  ;;  %v3226_v42 = vmul.f32 %v5164_v0, %v5164_v0  ;;  %v3196_v37 = vadd.f32 58.5225, %v3194_v26 }
 0x5f0   :  { %v2569_v59 = vpop.f32.mrf.mxu0  ;;  %v3888_v60 = vpop.f32.mrf.mxu1 }
 0x5f1   :  { %v2685_v25 = vadd.f32 %v2677_v62, %v2675_v5  ;;  %v3258_v9 = vadd.f32 %v3226_v42, %v3224_v38  ;;  %v2676_v10 = vsub.f32 %v2569_v59, %v2670_v57  ;;  %v3261_v28 = vadd.f32 6.5025, %v3259_v1  ;;  %v3958_v6 = vpop.eup %3957 }
 0x5f2   :  { %v3143_v18 = vpop.f32.mrf.mxu1  ;;  %v3231_v54 = vsub.f32 %v3888_v60, %v3225_v55  ;;  %v3960_v33 = vpop.eup %3959  ;;  %v2647_v55 = vmul.f32 %v5118_v47, %v5110_v61  ;;  %v3205_v40 = vmul.f32 %v3958_v6, %v3197_v17  ;;  %v2672_v62 = vmul.f32 %v5138_v31, %v5128_v50 }
 0x5f3   :  { %v2687_v11 = vadd.f32 58.5225, %v2685_v25  ;;  %v2684_v20 = vadd.f32 %v2676_v10, %v2674_v51  ;;  %v3260_v13 = vadd.f32 6.5025, %v3258_v9  ;;  %v3230_v63 = vsub.f32 %v3143_v18, %v3224_v38  ;;  %v3962_v1 = vpop.eup %3961 }
 0x5f4   :  { %v3891_v8 = vpop.f32.mrf.mxu1  ;;  %v2653_v29 = vsub.f32 %v5122_v49, %v2647_v55  ;;  %v3203_v57 = vmul.f32 %v3960_v33, %v3196_v37  ;;  %v3229_v61 = vmul.f32 %v5154_v53, %v5150_v35  ;;  %v2652_v50 = vsub.f32 %v5124_v22, %v2646_v23 }
 0x5f5   :  { %3967 = vrcp.f32 %v2687_v11  ;;  %v3233_v19 = vsub.f32 %v3891_v8, %v3227_v16  ;;  %v2686_v4 = vadd.f32 58.5225, %v2684_v20  ;;  %v3213_v16 = vmul.f32 2.0, %v3187_v45  ;;  %v3964_v45 = vpop.eup %3963 }
 0x5f6   :  { %3969 = vrcp.f32 %v2660_v2  ;;  %v3857_v41 = vpop.f32.mrf.mxu0  ;;  %v3153_v36 = vpop.f32.mrf.mxu1  ;;  %v3207_v31 = vmul.f32 %v3205_v40, %v3205_v40  ;;  %v3228_v2 = vmul.f32 %v5164_v0, %v5152_v27  ;;  %v3214_v49 = vadd.f32 6.5025, %v3212_v15 }
 0x5f7   :  { %3971 = vrcp.f32 %v3261_v28  ;;  %v3241_v52 = vadd.f32 %v3233_v19, %v3231_v54  ;;  %v3232_v24 = vsub.f32 %v3153_v36, %v3226_v42  ;;  %v2679_v42 = vsub.f32 %v3857_v41, %v2673_v30  ;;  %v3966_v51 = vpop.eup %3965 }
 0x5f8   :  { %3973 = vrcp.f32 %v2686_v4  ;;  %v2579_v5 = vpop.f32.mrf.mxu0  ;;  %v3215_v59 = vadd.f32 6.5025, %v3213_v16  ;;  %v2655_v25 = vmul.f32 2.0, %v2653_v29  ;;  %v3206_v39 = vmul.f32 %v3203_v57, %v3203_v57 }
 0x5f9   :  { %3975 = vrcp.f32 %v3260_v13  ;;  %v3243_v56 = vadd.f32 58.5225, %v3241_v52  ;;  %v3240_v21 = vadd.f32 %v3232_v24, %v3230_v63  ;;  %v2678_v47 = vsub.f32 %v2579_v5, %v2672_v62 }
 0x5fa   :  { %v2681_v43 = vmul.f32 2.0, %v2679_v42  ;;  %v3223_v48 = vmul.f32 %v3962_v1, %v3215_v59  ;;  %v3255_v9 = vmul.f32 2.0, %v3229_v61  ;;  %v3221_v18 = vmul.f32 %v3964_v45, %v3214_v49 }
 0x5fb   :  { %3977 = vrcp.f32 %v3243_v56  ;;  %v3242_v3 = vadd.f32 58.5225, %v3240_v21  ;;  %v2680_v35 = vmul.f32 2.0, %v2678_v47  ;;  %v2654_v28 = vmul.f32 2.0, %v2652_v50 }
 0x5fc   :  { %v3894_v38 = vpop.f32.mrf.mxu1  ;;  %v3209_v11 = vmul.f32 %v3207_v31, %v3205_v40  ;;  %v3254_v34 = vmul.f32 2.0, %v3228_v2  ;;  %v2683_v20 = vadd.f32 58.5225, %v2681_v43  ;;  %v3267_v27 = vmul.f32 %v3223_v48, %v3223_v48 }
 0x5fd   :  { %3979 = vrcp.f32 %v3242_v3  ;;  %v3235_v58 = vsub.f32 %v3894_v38, %v3229_v61  ;;  %v2657_v0 = vadd.f32 58.5225, %v2655_v25  ;;  %v3208_v54 = vmul.f32 %v3206_v39, %v3203_v57 }
 0x5fe   :  { %v3163_v60 = vpop.f32.mrf.mxu1  ;;  %v3257_v26 = vadd.f32 6.5025, %v3255_v9  ;;  %v2682_v41 = vadd.f32 58.5225, %v2680_v35  ;;  %v3266_v63 = vmul.f32 %v3221_v18, %v3221_v18  ;;  %v2656_v24 = vadd.f32 58.5225, %v2654_v28 }
 0x5ff   :  { %v3234_v53 = vsub.f32 %v3163_v60, %v3228_v2  ;;  %v3237_v8 = vmul.f32 2.0, %v3235_v58  ;;  %v2665_v52 = vmul.f32 %v3966_v51, %v2657_v0  ;;  %v3211_v17 = vmul.f32 %v3209_v11, %v5112_v44 }
 0x600   :  { %v3256_v30 = vadd.f32 6.5025, %v3254_v34  ;;  %v3269_v40 = vmul.f32 %v3267_v27, %v3223_v48  ;;  %v3210_v37 = vmul.f32 %v3208_v54, %v5116_v46  ;;  %v3268_v29 = vmul.f32 %v3266_v63, %v3221_v18  ;;  %v3897_v49 = vpop.f32.mrf.mxu1 }
 0x601   :  { %v3236_v36 = vmul.f32 2.0, %v3234_v53  ;;  %v3239_v21 = vadd.f32 58.5225, %v3237_v8  ;;  %v2667_v23 = vmul.f32 %v2665_v52, %v5043_v12  ;;  %v3291_v11 = vmul.f32 0.25490198, %v3897_v49 }
 0x602   :  { %v3968_v10 = vpop.eup %3967  ;;  %v3271_v15 = vmul.f32 %v3269_v40, %v3211_v17  ;;  %v3270_v45 = vmul.f32 %v3268_v29, %v3210_v37  ;;  %v3276_v34 = vmul.f32 0.25490198, %v5146_v14 }
 0x603   :  { %v3970_v22 = vpop.eup %3969  ;;  %v2691_v4 = vmul.f32 %v3968_v10, %v2683_v20  ;;  %v3238_v42 = vadd.f32 58.5225, %v3236_v36  ;;  %v3173_v10 = vpop.f32.mrf.mxu1 }
 0x604   :  { %v3972_v13 = vpop.eup %3971  ;;  %v2663_v16 = vmul.f32 %v3970_v22, %v2656_v24  ;;  %v3273_v60 = vsub.f32 1.0, %v3271_v15  ;;  %v3272_v12 = vsub.f32 1.0, %v3270_v45  ;;  %v3290_v27 = vmul.f32 0.25490198, %v3173_v10 }
 0x605   :  { %v3974_v19 = vpop.eup %3973  ;;  %v3265_v33 = vmul.f32 %v3972_v13, %v3257_v26  ;;  %v2693_v1 = vmul.f32 %v2691_v4, %v2691_v4 }
 0x606   :  { %v3976_v6 = vpop.eup %3975  ;;  %v2689_v56 = vmul.f32 %v3974_v19, %v2682_v41  ;;  %v2666_v47 = vmul.f32 %v2663_v16, %v5047_v32  ;;  %v3275_v9 = vmul.f32 5.0, %v3273_v60  ;;  %v3277_v32 = vmul.f32 0.25490198, %v5140_v7 }
 0x607   :  { %v3263_v5 = vmul.f32 %v3976_v6, %v3256_v30  ;;  %v3281_v57 = vmul.f32 %v3265_v33, %v3265_v33  ;;  %v2695_v50 = vmul.f32 %v2693_v1, %v2667_v23  ;;  %v3274_v18 = vmul.f32 5.0, %v3272_v12 }
 0x608   :  { %v3978_v55 = vpop.eup %3977  ;;  %v2692_v44 = vmul.f32 %v2689_v56, %v2689_v56  ;;  %v3279_v20 = vadd.f32 %v3277_v32, %v3275_v9 }
 0x609   :  { %v3247_v62 = vmul.f32 %v3978_v55, %v3239_v21  ;;  %v3280_v59 = vmul.f32 %v3263_v5, %v3263_v5  ;;  %v3283_v48 = vmul.f32 %v3281_v57, %v3265_v33  ;;  %v3278_v0 = vadd.f32 %v3276_v34, %v3274_v18 }
 0x60a   :  { %v3980_v3 = vpop.eup %3979  ;;  %v2694_v2 = vmul.f32 %v2692_v44, %v2666_v47 }
 0x60b   :  { %v3249_v38 = vmul.f32 %v3247_v62, %v3247_v62  ;;  %v3245_v61 = vmul.f32 %v3980_v3, %v3238_v42  ;;  %v3282_v51 = vmul.f32 %v3280_v59, %v3263_v5 }
 0x60d   :  { %v3251_v31 = vmul.f32 %v3249_v38, %v3247_v62  ;;  %v3248_v46 = vmul.f32 %v3245_v61, %v3245_v61 }
 0x60f   :  { %v3250_v43 = vmul.f32 %v3248_v46, %v3245_v61  ;;  %v3253_v58 = vmul.f32 %v3251_v31, %v2695_v50 }
 0x611   :  { %v3285_v25 = vmul.f32 %v3283_v48, %v3253_v58  ;;  %v3252_v39 = vmul.f32 %v3250_v43, %v2694_v2 }
 0x613   :  { %v3287_v35 = vsub.f32 1.0, %v3285_v25  ;;  %v3284_v53 = vmul.f32 %v3282_v51, %v3252_v39 }
 0x615   :  { %v3289_v28 = vmul.f32 5.0, %v3287_v35  ;;  %v3286_v22 = vsub.f32 1.0, %v3284_v53 }
 0x617   :  { %v3293_v8 = vadd.f32 %v3291_v11, %v3289_v28  ;;  %v3288_v13 = vmul.f32 5.0, %v3286_v22 }
 0x619   :  { %v3292_v54 = vadd.f32 %v3290_v27, %v3288_v13  ;;  %v3295_v19 = vadd.f32 %v3293_v8, %v3279_v20 }
 0x61b   :  { %v3299_v26 = vsel %vm163_vm0, %v3295_v19, 0.0  ;;  %v3294_v4 = vadd.f32 %v3292_v54, %v3278_v0 }
 0x61c   :  { %3300 = vadd.xlane.f32.xlu1 %v3299_v26 }
 0x61d   :  { %v3296_v7 = vsel %vm163_vm0, %v3294_v4, 0.0 }
 0x61e   :  { %3297 = vadd.xlane.f32.xlu0 %v3296_v7 }
 0x6a5   :  { %v3301_v41 = vpop.xlane.xlu1 %3300 }
 0x6a7   :  { %v3298_v36 = vpop.xlane.xlu0 %3297 }
 0x6a8   :  { %v3302_v6 = vadd.f32 %v3301_v41, %v3298_v36 }
 0x6aa   :  { %v3303_v63 = vrot.slane %v3302_v6, 4 }
 0x6ac   :  { %v3304_v52 = vadd.f32 %v3303_v63, %v3302_v6 }
 0x6ae   :  { %v3305_v14 = vrot.slane %v3304_v52, 2 }
 0x6b0   :  { %v3306_v24 = vadd.f32 %v3305_v14, %v3304_v52 }
 0x6b2   :  { %v3307_v17 = vrot.slane %v3306_v24, 1 }
 0x6b4   :  { %v3308_v33 = vadd.f32 %v3307_v17, %v3306_v24 }
 0x6b6   :  { %3310 = vst.msk [vmem:[#allocation10] sm:$0x1] %vm3309_vm7, %v3308_v33 }
 0x6b7   :  { %4086 = shalt.err (!%p4083_p10)
}
 0x6b8   :  { %3320 = dma.vmem_to_hbm [thread:$0]  %s3318_s15, 16, %s5205_s4, [#allocation4]  }
 0x6b9   :  { %4101 = dma.done.wait [#allocation4], 16  }
 0x6ba   :  { %4102 = vsyncadd [#allocation4], 4294967280 }
 0x6bb   :  { %3324 = vsyncpa [#allocation3], 1 }
 0x6bc   :  { %3325 = vsyncpa [#allocation6], 1 }
 0x6bd   :  { %3326 = vsyncpa [#allocation9], 1 }
 0x6be   :  { %3327 = vsyncpa [#allocation4], 1 }

</bundles_post_ra>
